<compile_context>
chip_gen: v6e
topology: v6e:2x2x1
jax: 0.10.0
libtpu: 0.0.40
codegen_flags: <defaults>
</compile_context>

<pallas_src>
import math
import functools

import jax
import jax.numpy as jnp
from jax.experimental import pallas as pl
from jax.experimental.pallas import tpu as pltpu

D_EMB = 768          # per-embedding feature width
D_IN = 2 * D_EMB     # 1536 after (virtual) concat
D_H1 = 512
D_H2 = 768
D_H3 = 512
D_OUT = 768

_INV_SQRT2 = 1.0 / math.sqrt(2.0)


def _gelu_exact(x):
    # PyTorch nn.GELU() default = exact erf formulation (kept in f32).
    return 0.5 * x * (1.0 + jax.lax.erf(x * _INV_SQRT2))


def _mlp_kernel(cond_ref, uncond_ref,
                w1a_ref, w1b_ref, b1_ref,
                w2_ref, b2_ref,
                w3_ref, b3_ref,
                w4_ref, b4_ref,
                o_ref):
    # Layer 1: fused "concat" as a split matmul; bf16 operands, f32 accumulate.
    c = cond_ref[...].astype(jnp.bfloat16)
    u = uncond_ref[...].astype(jnp.bfloat16)
    h = (jnp.dot(c, w1a_ref[...], preferred_element_type=jnp.float32)
         + jnp.dot(u, w1b_ref[...], preferred_element_type=jnp.float32)
         + b1_ref[...])
    h = _gelu_exact(h)
    h = jnp.dot(h.astype(jnp.bfloat16), w2_ref[...],
                preferred_element_type=jnp.float32) + b2_ref[...]
    h = _gelu_exact(h)
    h = jnp.dot(h.astype(jnp.bfloat16), w3_ref[...],
                preferred_element_type=jnp.float32) + b3_ref[...]
    h = _gelu_exact(h)
    h = jnp.dot(h.astype(jnp.bfloat16), w4_ref[...],
                preferred_element_type=jnp.float32) + b4_ref[...]
    o_ref[...] = h.astype(o_ref.dtype)


@functools.partial(jax.jit, static_argnames=("tm",))
def learned_embedding_forward(cond_embedding, uncond_embedding, kparams, *, tm=256):
    """cond_embedding, uncond_embedding: (B, S, 768). Returns (B, S, 768) float32.

    tm: max token-row tile. 256 for v6e/v7x; use 128 on v5e (128x128 MXU tiles).
    """
    B, S, D = cond_embedding.shape
    assert D == D_EMB and uncond_embedding.shape == cond_embedding.shape

    w1a, w1b, b1, w2, b2, w3, b3, w4, b4 = kparams

    # Flatten tokens; shrink the tile for small inputs (multiple of 8 sublanes).
    M = B * S
    tm_eff = min(tm, ((M + 7) // 8) * 8)
    n_tiles = pl.cdiv(M, tm_eff)
    M_pad = n_tiles * tm_eff

    cond = cond_embedding.reshape(M, D_EMB)
    uncond = uncond_embedding.reshape(M, D_EMB)
    if M_pad != M:
        pad = ((0, M_pad - M), (0, 0))
        cond = jnp.pad(cond, pad)
        uncond = jnp.pad(uncond, pad)

    row = lambda i: (i, 0)     # row-tiled activations
    full = lambda i: (0, 0)    # weights / biases resident for every row tile

    out = pl.pallas_call(
        _mlp_kernel,
        out_shape=jax.ShapeDtypeStruct((M_pad, D_OUT), jnp.float32),
        grid_spec=pltpu.PrefetchScalarGridSpec(
            num_scalar_prefetch=0,
            grid=(n_tiles,),
            in_specs=[
                pl.BlockSpec((tm_eff, D_EMB), row),
                pl.BlockSpec((tm_eff, D_EMB), row),
                pl.BlockSpec((D_EMB, D_H1), full), pl.BlockSpec((D_EMB, D_H1), full),
                pl.BlockSpec((1, D_H1), full),
                pl.BlockSpec((D_H1, D_H2), full), pl.BlockSpec((1, D_H2), full),
                pl.BlockSpec((D_H2, D_H3), full), pl.BlockSpec((1, D_H3), full),
                pl.BlockSpec((D_H3, D_OUT), full), pl.BlockSpec((1, D_OUT), full),
            ],
            out_specs=pl.BlockSpec((tm_eff, D_OUT), row),
        ),
        compiler_params=pltpu.CompilerParams(
            dimension_semantics=("parallel",),
        ),
    )(cond, uncond, w1a, w1b, b1, w2, b2, w3, b3, w4, b4)

    return out[:M].reshape(B, S, D_OUT)


def init_params(key):
    """Deterministic nn.Linear-style init: U(-1/sqrt(fan_in), 1/sqrt(fan_in)).
    Weights stored as (in, out) f32; biases as (1, out) f32."""
    dims = [(D_IN, D_H1), (D_H1, D_H2), (D_H2, D_H3), (D_H3, D_OUT)]
    params = []
    for fan_in, fan_out in dims:
        key, kw, kb = jax.random.split(key, 3)
        bound = 1.0 / math.sqrt(fan_in)
        w = jax.random.uniform(kw, (fan_in, fan_out), jnp.float32, -bound, bound)
        b = jax.random.uniform(kb, (1, fan_out), jnp.float32, -bound, bound)
        params += [w, b]
    return tuple(params)


def prepare_kernel_params(params):
    """One-time prep (done outside the jitted forward): split W1 into its
    cond/uncond halves and pre-cast weights to bf16. Biases stay f32."""
    w1, b1, w2, b2, w3, b3, w4, b4 = params
    return (
        w1[:D_EMB].astype(jnp.bfloat16), w1[D_EMB:].astype(jnp.bfloat16),
        b1.astype(jnp.float32),
        w2.astype(jnp.bfloat16), b2.astype(jnp.float32),
        w3.astype(jnp.bfloat16), b3.astype(jnp.float32),
        w4.astype(jnp.bfloat16), b4.astype(jnp.float32),
    )


def _reference_f32(cond, uncond, params):
    """Exact-f32 reference (PyTorch semantics)."""
    w1, b1, w2, b2, w3, b3, w4, b4 = params
    x = jnp.concatenate([cond, uncond], axis=-1).astype(jnp.float32)
    g = lambda t: jax.nn.gelu(t, approximate=False)
    h = g(x @ w1 + b1)
    h = g(h @ w2 + b2)
    h = g(h @ w3 + b3)
    return h @ w4 + b4


def _reference_bf16(cond, uncond, kparams):
    """Reference with the same bf16-operand / f32-accumulate numerics as the kernel."""
    w1a, w1b, b1, w2, b2, w3, b3, w4, b4 = kparams
    B, S, _ = cond.shape
    c = cond.reshape(-1, D_EMB).astype(jnp.bfloat16)
    u = uncond.reshape(-1, D_EMB).astype(jnp.bfloat16)
    g = lambda t: jax.nn.gelu(t, approximate=False)
    h = g(jnp.dot(c, w1a, preferred_element_type=jnp.float32)
          + jnp.dot(u, w1b, preferred_element_type=jnp.float32) + b1)
    h = g(jnp.dot(h.astype(jnp.bfloat16), w2, preferred_element_type=jnp.float32) + b2)
    h = g(jnp.dot(h.astype(jnp.bfloat16), w3, preferred_element_type=jnp.float32) + b3)
    h = jnp.dot(h.astype(jnp.bfloat16), w4, preferred_element_type=jnp.float32) + b4
    return h.reshape(B, S, D_OUT)


if __name__ == "__main__":
    key = jax.random.PRNGKey(0)
    k1, k2, k3 = jax.random.split(key, 3)

    B, S = 2, 8
    cond = jax.random.normal(k1, (B, S, D_EMB), dtype=jnp.float32)
    uncond = jax.random.normal(k2, (B, S, D_EMB), dtype=jnp.float32)

    params = init_params(k3)
    kparams = prepare_kernel_params(params)

    out = learned_embedding_forward(cond, uncond, kparams)
    out = jax.block_until_ready(out)
    assert out.shape == (B, S, D_OUT), out.shape

    # Tight check vs a reference with identical bf16/f32-acc numerics.
    ref_bf16 = _reference_bf16(cond, uncond, kparams)
    err_bf16 = float(jnp.max(jnp.abs(out - ref_bf16)))
    assert jnp.allclose(out, ref_bf16, atol=2e-3, rtol=2e-3), err_bf16

    # Loose check vs the exact-f32 PyTorch-semantics reference (bf16 matmul inputs
    # loosen the tolerance; accumulation is still f32).
    ref_f32 = _reference_f32(cond, uncond, params)
    err_f32 = float(jnp.max(jnp.abs(out - ref_f32)))
    assert jnp.allclose(out, ref_f32, atol=5e-2, rtol=5e-2), err_f32

    print("KERNEL_OK")
</pallas_src>

<mosaic_0001>
module attributes {stable_mosaic.version = 11 : i64} {
  func.func @_mlp_kernel(%arg0: i32, %arg1: memref<16x768xf32, #tpu.memory_space<vmem>>, %arg2: memref<16x768xf32, #tpu.memory_space<vmem>>, %arg3: memref<768x512xbf16, #tpu.memory_space<vmem>>, %arg4: memref<768x512xbf16, #tpu.memory_space<vmem>>, %arg5: memref<1x512xf32, #tpu.memory_space<vmem>>, %arg6: memref<512x768xbf16, #tpu.memory_space<vmem>>, %arg7: memref<1x768xf32, #tpu.memory_space<vmem>>, %arg8: memref<768x512xbf16, #tpu.memory_space<vmem>>, %arg9: memref<1x512xf32, #tpu.memory_space<vmem>>, %arg10: memref<512x768xbf16, #tpu.memory_space<vmem>>, %arg11: memref<1x768xf32, #tpu.memory_space<vmem>>, %arg12: memref<16x768xf32, #tpu.memory_space<vmem>>) attributes {dimension_semantics = [#tpu.dimension_semantics<parallel>], iteration_bounds = array<i64: 1>, scalar_prefetch = 0 : i64, scratch_operands = 0 : i64, tpu.core_type = #tpu.core_type<tc>, window_params = [{transform_indices = @transform_0, window_bounds = array<i64: 16, 768>}, {transform_indices = @transform_1, window_bounds = array<i64: 16, 768>}, {pipeline_mode = #tpu.pipeline_mode<synchronous>, transform_indices = @transform_2, window_bounds = array<i64: 768, 512>}, {pipeline_mode = #tpu.pipeline_mode<synchronous>, transform_indices = @transform_3, window_bounds = array<i64: 768, 512>}, {pipeline_mode = #tpu.pipeline_mode<synchronous>, transform_indices = @transform_4, window_bounds = array<i64: 1, 512>}, {pipeline_mode = #tpu.pipeline_mode<synchronous>, transform_indices = @transform_5, window_bounds = array<i64: 512, 768>}, {pipeline_mode = #tpu.pipeline_mode<synchronous>, transform_indices = @transform_6, window_bounds = array<i64: 1, 768>}, {pipeline_mode = #tpu.pipeline_mode<synchronous>, transform_indices = @transform_7, window_bounds = array<i64: 768, 512>}, {pipeline_mode = #tpu.pipeline_mode<synchronous>, transform_indices = @transform_8, window_bounds = array<i64: 1, 512>}, {pipeline_mode = #tpu.pipeline_mode<synchronous>, transform_indices = @transform_9, window_bounds = array<i64: 512, 768>}, {pipeline_mode = #tpu.pipeline_mode<synchronous>, transform_indices = @transform_10, window_bounds = array<i64: 1, 768>}, {transform_indices = @transform_11, window_bounds = array<i64: 16, 768>}]} {
    %c0 = arith.constant 0 : index
    %c0_0 = arith.constant 0 : index
    %0 = vector.load %arg1[%c0, %c0_0] : memref<16x768xf32, #tpu.memory_space<vmem>>, vector<16x768xf32>
    %1 = arith.truncf %0 : vector<16x768xf32> to vector<16x768xbf16>
    %c0_1 = arith.constant 0 : index
    %c0_2 = arith.constant 0 : index
    %2 = vector.load %arg2[%c0_1, %c0_2] : memref<16x768xf32, #tpu.memory_space<vmem>>, vector<16x768xf32>
    %3 = arith.truncf %2 : vector<16x768xf32> to vector<16x768xbf16>
    %c0_3 = arith.constant 0 : index
    %c0_4 = arith.constant 0 : index
    %4 = vector.load %arg3[%c0_3, %c0_4] : memref<768x512xbf16, #tpu.memory_space<vmem>>, vector<768x512xbf16>
    %cst = arith.constant dense<0.000000e+00> : vector<16x512xf32>
    %5 = tpu.matmul %1, %4, %cst {dimension_numbers = #tpu.dot_dimension_numbers<[1], [0], [0], [1], [0, 0, 1, 1], [], []>} : vector<16x768xbf16>, vector<768x512xbf16>, vector<16x512xf32> -> vector<16x512xf32>
    %c0_5 = arith.constant 0 : index
    %c0_6 = arith.constant 0 : index
    %6 = vector.load %arg4[%c0_5, %c0_6] : memref<768x512xbf16, #tpu.memory_space<vmem>>, vector<768x512xbf16>
    %cst_7 = arith.constant dense<0.000000e+00> : vector<16x512xf32>
    %7 = tpu.matmul %3, %6, %cst_7 {dimension_numbers = #tpu.dot_dimension_numbers<[1], [0], [0], [1], [0, 0, 1, 1], [], []>} : vector<16x768xbf16>, vector<768x512xbf16>, vector<16x512xf32> -> vector<16x512xf32>
    %8 = arith.addf %5, %7 : vector<16x512xf32>
    %c0_8 = arith.constant 0 : index
    %c0_9 = arith.constant 0 : index
    %9 = vector.load %arg5[%c0_8, %c0_9] : memref<1x512xf32, #tpu.memory_space<vmem>>, vector<1x512xf32>
    %10 = vector.broadcast %9 : vector<1x512xf32> to vector<16x512xf32>
    %11 = arith.addf %8, %10 : vector<16x512xf32>
    %cst_10 = arith.constant 5.000000e-01 : f32
    %12 = vector.broadcast %cst_10 : f32 to vector<16x512xf32>
    %13 = arith.mulf %12, %11 : vector<16x512xf32>
    %cst_11 = arith.constant 0.707106769 : f32
    %14 = vector.broadcast %cst_11 : f32 to vector<16x512xf32>
    %15 = arith.mulf %11, %14 : vector<16x512xf32>
    %16 = math.erf %15 : vector<16x512xf32>
    %cst_12 = arith.constant 1.000000e+00 : f32
    %17 = vector.broadcast %cst_12 : f32 to vector<16x512xf32>
    %18 = arith.addf %17, %16 : vector<16x512xf32>
    %19 = arith.mulf %13, %18 : vector<16x512xf32>
    %20 = arith.truncf %19 : vector<16x512xf32> to vector<16x512xbf16>
    %c0_13 = arith.constant 0 : index
    %c0_14 = arith.constant 0 : index
    %21 = vector.load %arg6[%c0_13, %c0_14] : memref<512x768xbf16, #tpu.memory_space<vmem>>, vector<512x768xbf16>
    %cst_15 = arith.constant dense<0.000000e+00> : vector<16x768xf32>
    %22 = tpu.matmul %20, %21, %cst_15 {dimension_numbers = #tpu.dot_dimension_numbers<[1], [0], [0], [1], [0, 0, 1, 1], [], []>} : vector<16x512xbf16>, vector<512x768xbf16>, vector<16x768xf32> -> vector<16x768xf32>
    %c0_16 = arith.constant 0 : index
    %c0_17 = arith.constant 0 : index
    %23 = vector.load %arg7[%c0_16, %c0_17] : memref<1x768xf32, #tpu.memory_space<vmem>>, vector<1x768xf32>
    %24 = vector.broadcast %23 : vector<1x768xf32> to vector<16x768xf32>
    %25 = arith.addf %22, %24 : vector<16x768xf32>
    %cst_18 = arith.constant 5.000000e-01 : f32
    %26 = vector.broadcast %cst_18 : f32 to vector<16x768xf32>
    %27 = arith.mulf %26, %25 : vector<16x768xf32>
    %cst_19 = arith.constant 0.707106769 : f32
    %28 = vector.broadcast %cst_19 : f32 to vector<16x768xf32>
    %29 = arith.mulf %25, %28 : vector<16x768xf32>
    %30 = math.erf %29 : vector<16x768xf32>
    %cst_20 = arith.constant 1.000000e+00 : f32
    %31 = vector.broadcast %cst_20 : f32 to vector<16x768xf32>
    %32 = arith.addf %31, %30 : vector<16x768xf32>
    %33 = arith.mulf %27, %32 : vector<16x768xf32>
    %34 = arith.truncf %33 : vector<16x768xf32> to vector<16x768xbf16>
    %c0_21 = arith.constant 0 : index
    %c0_22 = arith.constant 0 : index
    %35 = vector.load %arg8[%c0_21, %c0_22] : memref<768x512xbf16, #tpu.memory_space<vmem>>, vector<768x512xbf16>
    %cst_23 = arith.constant dense<0.000000e+00> : vector<16x512xf32>
    %36 = tpu.matmul %34, %35, %cst_23 {dimension_numbers = #tpu.dot_dimension_numbers<[1], [0], [0], [1], [0, 0, 1, 1], [], []>} : vector<16x768xbf16>, vector<768x512xbf16>, vector<16x512xf32> -> vector<16x512xf32>
    %c0_24 = arith.constant 0 : index
    %c0_25 = arith.constant 0 : index
    %37 = vector.load %arg9[%c0_24, %c0_25] : memref<1x512xf32, #tpu.memory_space<vmem>>, vector<1x512xf32>
    %38 = vector.broadcast %37 : vector<1x512xf32> to vector<16x512xf32>
    %39 = arith.addf %36, %38 : vector<16x512xf32>
    %cst_26 = arith.constant 5.000000e-01 : f32
    %40 = vector.broadcast %cst_26 : f32 to vector<16x512xf32>
    %41 = arith.mulf %40, %39 : vector<16x512xf32>
    %cst_27 = arith.constant 0.707106769 : f32
    %42 = vector.broadcast %cst_27 : f32 to vector<16x512xf32>
    %43 = arith.mulf %39, %42 : vector<16x512xf32>
    %44 = math.erf %43 : vector<16x512xf32>
    %cst_28 = arith.constant 1.000000e+00 : f32
    %45 = vector.broadcast %cst_28 : f32 to vector<16x512xf32>
    %46 = arith.addf %45, %44 : vector<16x512xf32>
    %47 = arith.mulf %41, %46 : vector<16x512xf32>
    %48 = arith.truncf %47 : vector<16x512xf32> to vector<16x512xbf16>
    %c0_29 = arith.constant 0 : index
    %c0_30 = arith.constant 0 : index
    %49 = vector.load %arg10[%c0_29, %c0_30] : memref<512x768xbf16, #tpu.memory_space<vmem>>, vector<512x768xbf16>
    %cst_31 = arith.constant dense<0.000000e+00> : vector<16x768xf32>
    %50 = tpu.matmul %48, %49, %cst_31 {dimension_numbers = #tpu.dot_dimension_numbers<[1], [0], [0], [1], [0, 0, 1, 1], [], []>} : vector<16x512xbf16>, vector<512x768xbf16>, vector<16x768xf32> -> vector<16x768xf32>
    %c0_32 = arith.constant 0 : index
    %c0_33 = arith.constant 0 : index
    %51 = vector.load %arg11[%c0_32, %c0_33] : memref<1x768xf32, #tpu.memory_space<vmem>>, vector<1x768xf32>
    %52 = vector.broadcast %51 : vector<1x768xf32> to vector<16x768xf32>
    %53 = arith.addf %50, %52 : vector<16x768xf32>
    %c0_34 = arith.constant 0 : index
    %c0_35 = arith.constant 0 : index
    %54 = vector.load %arg12[%c0_34, %c0_35] : memref<16x768xf32, #tpu.memory_space<vmem>>, vector<16x768xf32>
    tpu.vector_store %arg12[%c0_34, %c0_35], %53 {strides = array<i32>} : memref<16x768xf32, #tpu.memory_space<vmem>>, vector<16x768xf32>,
    return
  }
  func.func @transform_0(%arg0: i32) -> (i32, i32) {
    %c0_i32 = arith.constant 0 : i32
    %c0_i32_0 = arith.constant 0 : i32
    return %arg0, %c0_i32 : i32, i32
  }
  func.func @transform_1(%arg0: i32) -> (i32, i32) {
    %c0_i32 = arith.constant 0 : i32
    %c0_i32_0 = arith.constant 0 : i32
    return %arg0, %c0_i32 : i32, i32
  }
  func.func @transform_2(%arg0: i32) -> (i32, i32) {
    %c0_i32 = arith.constant 0 : i32
    %c0_i32_0 = arith.constant 0 : i32
    %c0_i32_1 = arith.constant 0 : i32
    return %c0_i32, %c0_i32_0 : i32, i32
  }
  func.func @transform_3(%arg0: i32) -> (i32, i32) {
    %c0_i32 = arith.constant 0 : i32
    %c0_i32_0 = arith.constant 0 : i32
    %c0_i32_1 = arith.constant 0 : i32
    return %c0_i32, %c0_i32_0 : i32, i32
  }
  func.func @transform_4(%arg0: i32) -> (i32, i32) {
    %c0_i32 = arith.constant 0 : i32
    %c0_i32_0 = arith.constant 0 : i32
    %c0_i32_1 = arith.constant 0 : i32
    return %c0_i32, %c0_i32_0 : i32, i32
  }
  func.func @transform_5(%arg0: i32) -> (i32, i32) {
    %c0_i32 = arith.constant 0 : i32
    %c0_i32_0 = arith.constant 0 : i32
    %c0_i32_1 = arith.constant 0 : i32
    return %c0_i32, %c0_i32_0 : i32, i32
  }
  func.func @transform_6(%arg0: i32) -> (i32, i32) {
    %c0_i32 = arith.constant 0 : i32
    %c0_i32_0 = arith.constant 0 : i32
    %c0_i32_1 = arith.constant 0 : i32
    return %c0_i32, %c0_i32_0 : i32, i32
  }
  func.func @transform_7(%arg0: i32) -> (i32, i32) {
    %c0_i32 = arith.constant 0 : i32
    %c0_i32_0 = arith.constant 0 : i32
    %c0_i32_1 = arith.constant 0 : i32
    return %c0_i32, %c0_i32_0 : i32, i32
  }
  func.func @transform_8(%arg0: i32) -> (i32, i32) {
    %c0_i32 = arith.constant 0 : i32
    %c0_i32_0 = arith.constant 0 : i32
    %c0_i32_1 = arith.constant 0 : i32
    return %c0_i32, %c0_i32_0 : i32, i32
  }
  func.func @transform_9(%arg0: i32) -> (i32, i32) {
    %c0_i32 = arith.constant 0 : i32
    %c0_i32_0 = arith.constant 0 : i32
    %c0_i32_1 = arith.constant 0 : i32
    return %c0_i32, %c0_i32_0 : i32, i32
  }
  func.func @transform_10(%arg0: i32) -> (i32, i32) {
    %c0_i32 = arith.constant 0 : i32
    %c0_i32_0 = arith.constant 0 : i32
    %c0_i32_1 = arith.constant 0 : i32
    return %c0_i32, %c0_i32_0 : i32, i32
  }
  func.func @transform_11(%arg0: i32) -> (i32, i32) {
    %c0_i32 = arith.constant 0 : i32
    %c0_i32_0 = arith.constant 0 : i32
    return %arg0, %c0_i32 : i32, i32
  }
}

</mosaic_0001>

<bundles_post_ra>
// kernel: learned_embedding_forward.1
= control target key start
LH: loop header
LB: loop body
LE: loop exit
PB: predicated region body
PF: predicated region fallthrough
CT: control target
= control target key end

     0   :  { %16 = vsyncpa [#allocation3], 0  ;;  %s10545_s0 = inlined_call_operand.hbm [shape: f32[16,768], index: 0, kind: input, shape index: {}]   ;;  %s10546_s1 = inlined_call_operand.hbm [shape: f32[16,768], index: 1, kind: input, shape index: {}]   ;;  %s10547_s2 = inlined_call_operand.hbm [shape: bf16[768,512], index: 2, kind: input, shape index: {}]   ;;  %s10548_s3 = inlined_call_operand.hbm [shape: bf16[768,512], index: 3, kind: input, shape index: {}]   ;;  %s10549_s4 = inlined_call_operand.hbm [shape: f32[1,512], index: 4, kind: input, shape index: {}]   ;;  %s10550_s5 = inlined_call_operand.hbm [shape: bf16[512,768], index: 5, kind: input, shape index: {}]   ;;  %s10551_s6 = inlined_call_operand.vmem [shape: f32[1,768], index: 6, kind: input, shape index: {}]   ;;  %s10552_s7 = inlined_call_operand.hbm [shape: bf16[768,512], index: 7, kind: input, shape index: {}]   ;;  %s10553_s8 = inlined_call_operand.vmem [shape: f32[1,512], index: 8, kind: input, shape index: {}]   ;;  %s10554_s9 = inlined_call_operand.hbm [shape: bf16[512,768], index: 9, kind: input, shape index: {}]   ;;  %s10555_s10 = inlined_call_operand.vmem [shape: f32[1,768], index: 10, kind: input, shape index: {}]   ;;  %s10556_s11 = inlined_call_operand.hbm [shape: f32[16,768], index: 11, kind: output, shape index: {}]  }
   0x1   :  { %17 = vsyncpa [#allocation6], 0 }
   0x2   :  { %18 = vsyncpa [#allocation9], 0 }
   0x3   :  { %19 = vsyncpa [#allocation12], 0 }
   0x4   :  { %20 = vsyncpa [#allocation15], 0 }
   0x5   :  { %21 = vsyncpa [#allocation4], 0  ;;  %s10198_s17 = smov [#allocation5]  }
   0x6   :  { %s39_s18 = sshll.u32 %s10198_s17, 4  ;;  %s40_s18 = int_to_ptr.vmem [resolvable:$true] %s39_s18 }
   0x7   :  { %s10014_s19 = scalar_lea.vmem %s40_s18, 1536  ;;  %p10019_p1 = scmp.lt.s32.totalorder %s40_s18, %s40_s18 }
   0x8   :  { %p10015_p0 = scmp.ne.s32.totalorder %s40_s18, %s10014_s19  ;;  %p10020_p2 = scmp.lt.s32.totalorder %s10014_s19, %s10014_s19 }
   0xa   :  { %p10021_p3 = por %p10020_p2, %p10019_p1 }
   0xc   :  { %p10022_p4 = pnand %p10021_p3, %p10015_p0 }
   0xe   :  { %10025 = shalt.err (!%p10022_p4)
}
   0xf   :  { %s10199_s20 = smov 768   ;;  %s10200_s21 = smov 48  }
  0x10   :  { %45 = dma.hbm_to_vmem [thread:$0]  %s10546_s1, 1536, %s40_s18, [#allocation6], %s10199_s20, %s10199_s20, %s10200_s21  }
  0x11   :  { %s10201_s24 = smov [#allocation8]   ;;  %s10202_s26 = smov [#allocation11]  }
  0x12   :  { %s63_s25 = sshll.u32 %s10201_s24, 4  ;;  %s85_s27 = sshll.u32 %s10202_s26, 4  ;;  %s64_s25 = int_to_ptr.vmem [resolvable:$true] %s63_s25  ;;  %s86_s27 = int_to_ptr.vmem [resolvable:$true] %s85_s27 }
  0x13   :  { %s10034_s28 = scalar_lea.vmem %s64_s25, 24576  ;;  %p10039_p6 = scmp.lt.s32.totalorder %s64_s25, %s64_s25 }
  0x14   :  { %p10035_p5 = scmp.ne.s32.totalorder %s64_s25, %s10034_s28  ;;  %p10040_p7 = scmp.lt.s32.totalorder %s10034_s28, %s10034_s28 }
  0x16   :  { %p10041_p8 = por %p10040_p7, %p10039_p6 }
  0x18   :  { %p10042_p9 = pnand %p10041_p8, %p10035_p5 }
  0x1a   :  { %10045 = shalt.err (!%p10042_p9)
}
  0x1b   :  { %s10203_s29 = smov 256   ;;  %s10204_s30 = smov 16  }
  0x1c   :  { %69 = dma.hbm_to_vmem [thread:$0]  %s10548_s3, 24576, %s64_s25, [#allocation9], %s10203_s29, %s10203_s29, %s10204_s30  }
  0x1d   :  { %s10054_s1 = scalar_lea.vmem %s86_s27, 24576  ;;  %p10059_p11 = scmp.lt.s32.totalorder %s86_s27, %s86_s27 }
  0x1e   :  { %p10055_p10 = scmp.ne.s32.totalorder %s86_s27, %s10054_s1  ;;  %p10060_p12 = scmp.lt.s32.totalorder %s10054_s1, %s10054_s1 }
  0x20   :  { %p10061_p13 = por %p10060_p12, %p10059_p11 }
  0x22   :  { %p10062_p0 = pnand %p10061_p13, %p10055_p10 }
  0x24   :  { %10065 = shalt.err (!%p10062_p0)
}
  0x25   :  { %s10205_s14 = smov 384   ;;  %s10206_s15 = smov 24  }
  0x26   :  { %91 = dma.hbm_to_vmem [thread:$0]  %s10550_s5, 24576, %s86_s27, [#allocation12], %s10205_s14, %s10205_s14, %s10206_s15  }
  0x27   :  { %s10207_s18 = smov [#allocation2]   ;;  %s10208_s3 = smov [#allocation7]  }
  0x28   :  { %s27_s19 = sshll.u32 %s10207_s18, 4  ;;  %s51_s22 = sshll.u32 %s10208_s3, 4  ;;  %s28_s19 = int_to_ptr.vmem [resolvable:$true] %s27_s19  ;;  %s52_s22 = int_to_ptr.vmem [resolvable:$true] %s51_s22 }
  0x29   :  { %s10074_s23 = scalar_lea.vmem %s28_s19, 1536  ;;  %p10079_p2 = scmp.lt.s32.totalorder %s28_s19, %s28_s19 }
  0x2a   :  { %p10075_p1 = scmp.ne.s32.totalorder %s28_s19, %s10074_s23  ;;  %p10080_p3 = scmp.lt.s32.totalorder %s10074_s23, %s10074_s23 }
  0x2c   :  { %p10081_p4 = por %p10080_p3, %p10079_p2 }
  0x2e   :  { %p10082_p5 = pnand %p10081_p4, %p10075_p1 }
  0x30   :  { %10085 = shalt.err (!%p10082_p5)
}
  0x31   :  { %33 = dma.hbm_to_vmem [thread:$0]  %s10545_s0, 1536, %s28_s19, [#allocation3], %s10199_s20, %s10199_s20, %s10200_s21  }
  0x32   :  { %s10094_s5 = scalar_lea.vmem %s52_s22, 24576  ;;  %p10099_p7 = scmp.lt.s32.totalorder %s52_s22, %s52_s22 }
  0x33   :  { %p10095_p6 = scmp.ne.s32.totalorder %s52_s22, %s10094_s5  ;;  %p10100_p8 = scmp.lt.s32.totalorder %s10094_s5, %s10094_s5 }
  0x35   :  { %p10101_p9 = por %p10100_p8, %p10099_p7 }
  0x37   :  { %p10102_p10 = pnand %p10101_p9, %p10095_p6 }
  0x39   :  { %10105 = shalt.err (!%p10102_p10)
}
  0x3a   :  { %57 = dma.hbm_to_vmem [thread:$0]  %s10547_s2, 24576, %s52_s22, [#allocation6], %s10203_s29, %s10203_s29, %s10204_s30  }
  0x3b   :  { %s10209_s28 = smov [#allocation10]   ;;  %s10210_s13 = smov [#allocation13]  }
  0x3c   :  { %s76_s12 = sshll.u32 %s10209_s28, 4  ;;  %s99_s0 = sshll.u32 %s10210_s13, 4  ;;  %s77_s12 = int_to_ptr.vmem [resolvable:$true] %s76_s12  ;;  %s100_s0 = int_to_ptr.vmem [resolvable:$true] %s99_s0 }
  0x3d   :  { %s10114_s1 = scalar_lea.vmem %s77_s12, 64  ;;  %p10119_p12 = scmp.lt.s32.totalorder %s77_s12, %s77_s12 }
  0x3e   :  { %p10115_p11 = scmp.ne.s32.totalorder %s77_s12, %s10114_s1  ;;  %p10120_p13 = scmp.lt.s32.totalorder %s10114_s1, %s10114_s1 }
  0x40   :  { %p10121_p0 = por %p10120_p13, %p10119_p12 }
  0x42   :  { %p10122_p1 = pnand %p10121_p0, %p10115_p11 }
  0x44   :  { %10125 = shalt.err (!%p10122_p1)
}
  0x45   :  { %79 = dma.hbm_to_vmem [thread:$0]  %s10549_s4, 64, %s77_s12, [#allocation9]  }
  0x46   :  { %s10134_s18 = scalar_lea.vmem %s100_s0, 24576  ;;  %p10139_p3 = scmp.lt.s32.totalorder %s100_s0, %s100_s0 }
  0x47   :  { %p10135_p2 = scmp.ne.s32.totalorder %s100_s0, %s10134_s18  ;;  %p10140_p4 = scmp.lt.s32.totalorder %s10134_s18, %s10134_s18 }
  0x49   :  { %p10141_p5 = por %p10140_p4, %p10139_p3 }
  0x4b   :  { %p10142_p6 = pnand %p10141_p5, %p10135_p2 }
  0x4d   :  { %10145 = shalt.err (!%p10142_p6)
}
  0x4e   :  { %105 = dma.hbm_to_vmem [thread:$0]  %s10552_s7, 24576, %s100_s0, [#allocation12], %s10203_s29, %s10203_s29, %s10204_s30  }
  0x4f   :  { %s10211_s3 = smov [#allocation14]  }
  0x50   :  { %s113_s22 = sshll.u32 %s10211_s3, 4  ;;  %s114_s22 = int_to_ptr.vmem [resolvable:$true] %s113_s22 }
  0x51   :  { %s10154_s23 = scalar_lea.vmem %s114_s22, 24576  ;;  %p10159_p8 = scmp.lt.s32.totalorder %s114_s22, %s114_s22 }
  0x52   :  { %p10155_p7 = scmp.ne.s32.totalorder %s114_s22, %s10154_s23  ;;  %p10160_p9 = scmp.lt.s32.totalorder %s10154_s23, %s10154_s23 }
  0x54   :  { %p10161_p10 = por %p10160_p9, %p10159_p8 }
  0x56   :  { %p10162_p11 = pnand %p10161_p10, %p10155_p7 }
  0x58   :  { %10165 = shalt.err (!%p10162_p11)
}
  0x59   :  { %119 = dma.hbm_to_vmem [thread:$0]  %s10554_s9, 24576, %s114_s22, [#allocation15], %s10205_s14, %s10205_s14, %s10206_s15  }
  0x5a   :  { %10186 = dma.done.wait [#allocation3], 1536  }
  0x5b   :  { %10187 = vsyncadd [#allocation3], 4294965760 }
  0x5c   :  { %10188 = dma.done.wait [#allocation6], 26112  }
  0x5d   :  { %10189 = vsyncadd [#allocation6], 4294941184 }
  0x5e   :  { %10190 = dma.done.wait [#allocation9], 24640  }
  0x5f   :  { %10191 = vsyncadd [#allocation9], 4294942656 }
  0x60   :  { %10192 = dma.done.wait [#allocation12], 49152  }
  0x61   :  { %10193 = vsyncadd [#allocation12], 4294918144 }
  0x62   :  { %10194 = dma.done.wait [#allocation15], 24576  }
  0x63   :  { %10195 = vsyncadd [#allocation15], 4294942720  ;;  %v8510_v0 = vld [vmem:[#allocation8 + $0xe4] ss:$16 sps:$4 sm:$0xff]   ;;  %v8514_v2 = vld [vmem:[#allocation8 + $0xe0] ss:$16 sps:$4 sm:$0xff]  }
  0x64   :  { %v8512_v1 = vld [vmem:[#allocation8 + $0x2e4] ss:$16 sps:$4 sm:$0xff]   ;;  %1526 = vmatprep.subr.bf16.mxu0 %v8510_v0  ;;  %v8515_v3 = vld [vmem:[#allocation8 + $0x2e0] ss:$16 sps:$4 sm:$0xff]   ;;  %v165_v46 = vld [vmem:[#allocation5 + $0x8] sm:$0xff] }
  0x65   :  { %1569 = vmatprep.subr.bf16.mxu1 %v8512_v1  ;;  %v8516_v4 = vld [vmem:[#allocation8 + $0xc4] ss:$16 sps:$4 sm:$0xff]   ;;  %1527 = vmatpush1.bf16.msra.mxu0 %v8514_v2  ;;  %v8520_v6 = vld [vmem:[#allocation8 + $0xc0] ss:$16 sps:$4 sm:$0xff]   ;;  %v171_v47 = vld [vmem:[#allocation5 + $0x38] sm:$0xff] }
  0x66   :  { %1570 = vmatpush1.bf16.msra.mxu1 %v8515_v3  ;;  %v8518_v5 = vld [vmem:[#allocation8 + $0x2c4] ss:$16 sps:$4 sm:$0xff]   ;;  %1528 = vmatprep.subr.bf16.mxu0 %v8516_v4  ;;  %v8521_v7 = vld [vmem:[#allocation8 + $0x2c0] ss:$16 sps:$4 sm:$0xff]   ;;  %v167_v48 = vld [vmem:[#allocation5 + $0x18] sm:$0xff]  ;;  %v177_v53 = vpack.c.bf16 %v171_v47, %v165_v46 }
  0x67   :  { %1571 = vmatprep.subr.bf16.mxu1 %v8518_v5  ;;  %v8522_v8 = vld [vmem:[#allocation8 + $0xa4] ss:$16 sps:$4 sm:$0xff]   ;;  %v8526_v10 = vld [vmem:[#allocation8 + $0xa0] ss:$16 sps:$4 sm:$0xff]   ;;  %v173_v49 = vld [vmem:[#allocation5 + $0x48] sm:$0xff] }
  0x68   :  { %v8524_v9 = vld [vmem:[#allocation8 + $0x2a4] ss:$16 sps:$4 sm:$0xff]   ;;  %v8527_v11 = vld [vmem:[#allocation8 + $0x2a0] ss:$16 sps:$4 sm:$0xff]   ;;  %v10318_v54 = vpack.c.bf16 %v173_v49, %v167_v48  ;;  %1558 = vmatprep.mubr.bf16.mxu0 %v177_v53  ;;  %v8651_v46 = vld [vmem:[#allocation8 + $0x8] ss:$16 sps:$4 sm:$0xff]  }
  0x69   :  { %1529 = vmatpush1.bf16.msra.mxu0 %v8520_v6  ;;  %v8528_v12 = vld [vmem:[#allocation8 + $0x84] ss:$16 sps:$4 sm:$0xff]   ;;  %v8532_v14 = vld [vmem:[#allocation8 + $0x80] ss:$16 sps:$4 sm:$0xff]   ;;  %v8659_v48 = vld [vmem:[#allocation8 + $0x1ec] ss:$16 sps:$4 sm:$0xff]  }
  0x6a   :  { %1572 = vmatpush1.bf16.msra.mxu1 %v8521_v7  ;;  %1530 = vmatprep.subr.bf16.mxu0 %v8522_v8  ;;  %v8530_v13 = vld [vmem:[#allocation8 + $0x284] ss:$16 sps:$4 sm:$0xff]   ;;  %v8533_v15 = vld [vmem:[#allocation8 + $0x280] ss:$16 sps:$4 sm:$0xff]  }
  0x6b   :  { %1573 = vmatprep.subr.bf16.mxu1 %v8524_v9  ;;  %v8534_v16 = vld [vmem:[#allocation8 + $0x64] ss:$16 sps:$4 sm:$0xff]   ;;  %v8538_v18 = vld [vmem:[#allocation8 + $0x60] ss:$16 sps:$4 sm:$0xff]   ;;  %1601 = vmatprep.mubr.bf16.mxu1 %v10318_v54 }
  0x6c   :  { %v8536_v17 = vld [vmem:[#allocation8 + $0x264] ss:$16 sps:$4 sm:$0xff]   ;;  %v8539_v19 = vld [vmem:[#allocation8 + $0x260] ss:$16 sps:$4 sm:$0xff]  }
  0x6d   :  { %1531 = vmatpush1.bf16.msra.mxu0 %v8526_v10  ;;  %v8540_v20 = vld [vmem:[#allocation8 + $0x44] ss:$16 sps:$4 sm:$0xff]   ;;  %v8544_v22 = vld [vmem:[#allocation8 + $0x40] ss:$16 sps:$4 sm:$0xff]  }
  0x6e   :  { %1574 = vmatpush1.bf16.msra.mxu1 %v8527_v11  ;;  %1532 = vmatprep.subr.bf16.mxu0 %v8528_v12  ;;  %v8542_v21 = vld [vmem:[#allocation8 + $0x244] ss:$16 sps:$4 sm:$0xff]   ;;  %v8545_v23 = vld [vmem:[#allocation8 + $0x240] ss:$16 sps:$4 sm:$0xff]   ;;  %v8611_v11 = vld [vmem:[#allocation8 + $0xec] ss:$16 sps:$4 sm:$0xff]  }
  0x6f   :  { %1575 = vmatprep.subr.bf16.mxu1 %v8530_v13  ;;  %v8546_v24 = vld [vmem:[#allocation8 + $0x24] ss:$16 sps:$4 sm:$0xff]   ;;  %v8550_v26 = vld [vmem:[#allocation8 + $0x20] ss:$16 sps:$4 sm:$0xff]  }
  0x70   :  { %v8548_v25 = vld [vmem:[#allocation8 + $0x224] ss:$16 sps:$4 sm:$0xff]   ;;  %v8551_v27 = vld [vmem:[#allocation8 + $0x220] ss:$16 sps:$4 sm:$0xff]  }
  0x71   :  { %1533 = vmatpush1.bf16.msra.mxu0 %v8532_v14  ;;  %v8552_v28 = vld [vmem:[#allocation8 + $0x4] ss:$16 sps:$4 sm:$0xff]   ;;  %v8556_v30 = vld [vmem:[#allocation8] ss:$16 sps:$4 sm:$0xff]  }
  0x72   :  { %1576 = vmatpush1.bf16.msra.mxu1 %v8533_v15  ;;  %1534 = vmatprep.subr.bf16.mxu0 %v8534_v16  ;;  %v8554_v29 = vld [vmem:[#allocation8 + $0x204] ss:$16 sps:$4 sm:$0xff]   ;;  %v8557_v31 = vld [vmem:[#allocation8 + $0x200] ss:$16 sps:$4 sm:$0xff]   ;;  %v8609_v15 = vld [vmem:[#allocation8 + $0xe8] ss:$16 sps:$4 sm:$0xff]  }
  0x73   :  { %1577 = vmatprep.subr.bf16.mxu1 %v8536_v17  ;;  %v8558_v32 = vld [vmem:[#allocation8 + $0x1e4] ss:$16 sps:$4 sm:$0xff]   ;;  %v8562_v34 = vld [vmem:[#allocation8 + $0x1e0] ss:$16 sps:$4 sm:$0xff]   ;;  %v8617_v17 = vld [vmem:[#allocation8 + $0xcc] ss:$16 sps:$4 sm:$0xff]  }
  0x74   :  { %v8560_v33 = vld [vmem:[#allocation8 + $0x3e4] ss:$16 sps:$4 sm:$0xff]   ;;  %v8563_v35 = vld [vmem:[#allocation8 + $0x3e0] ss:$16 sps:$4 sm:$0xff]  }
  0x75   :  { %1535 = vmatpush1.bf16.msra.mxu0 %v8538_v18  ;;  %v8564_v36 = vld [vmem:[#allocation8 + $0x1c4] ss:$16 sps:$4 sm:$0xff]   ;;  %v8568_v38 = vld [vmem:[#allocation8 + $0x1c0] ss:$16 sps:$4 sm:$0xff]  }
  0x76   :  { %1578 = vmatpush1.bf16.msra.mxu1 %v8539_v19  ;;  %1536 = vmatprep.subr.bf16.mxu0 %v8540_v20  ;;  %v8566_v37 = vld [vmem:[#allocation8 + $0x3c4] ss:$16 sps:$4 sm:$0xff]   ;;  %v8569_v39 = vld [vmem:[#allocation8 + $0x3c0] ss:$16 sps:$4 sm:$0xff]   ;;  %v8615_v19 = vld [vmem:[#allocation8 + $0xc8] ss:$16 sps:$4 sm:$0xff]  }
  0x77   :  { %1579 = vmatprep.subr.bf16.mxu1 %v8542_v21  ;;  %v8570_v40 = vld [vmem:[#allocation8 + $0x1a4] ss:$16 sps:$4 sm:$0xff]   ;;  %v8574_v42 = vld [vmem:[#allocation8 + $0x1a0] ss:$16 sps:$4 sm:$0xff]   ;;  %v8623_v21 = vld [vmem:[#allocation8 + $0xac] ss:$16 sps:$4 sm:$0xff]  }
  0x78   :  { %v8572_v41 = vld [vmem:[#allocation8 + $0x3a4] ss:$16 sps:$4 sm:$0xff]   ;;  %v8575_v43 = vld [vmem:[#allocation8 + $0x3a0] ss:$16 sps:$4 sm:$0xff]  }
  0x79   :  { %1537 = vmatpush1.bf16.msra.mxu0 %v8544_v22  ;;  %v8576_v44 = vld [vmem:[#allocation8 + $0x184] ss:$16 sps:$4 sm:$0xff]   ;;  %v8580_v50 = vld [vmem:[#allocation8 + $0x180] ss:$16 sps:$4 sm:$0xff]  }
  0x7a   :  { %1580 = vmatpush1.bf16.msra.mxu1 %v8545_v23  ;;  %1538 = vmatprep.subr.bf16.mxu0 %v8546_v24  ;;  %v8578_v45 = vld [vmem:[#allocation8 + $0x384] ss:$16 sps:$4 sm:$0xff]   ;;  %v8581_v51 = vld [vmem:[#allocation8 + $0x380] ss:$16 sps:$4 sm:$0xff]   ;;  %v8621_v23 = vld [vmem:[#allocation8 + $0xa8] ss:$16 sps:$4 sm:$0xff]  }
  0x7b   :  { %1581 = vmatprep.subr.bf16.mxu1 %v8548_v25  ;;  %v8582_v52 = vld [vmem:[#allocation8 + $0x164] ss:$16 sps:$4 sm:$0xff]   ;;  %v8586_v56 = vld [vmem:[#allocation8 + $0x160] ss:$16 sps:$4 sm:$0xff]   ;;  %v8629_v25 = vld [vmem:[#allocation8 + $0x8c] ss:$16 sps:$4 sm:$0xff]  }
  0x7c   :  { %v8584_v55 = vld [vmem:[#allocation8 + $0x364] ss:$16 sps:$4 sm:$0xff]   ;;  %v8587_v57 = vld [vmem:[#allocation8 + $0x360] ss:$16 sps:$4 sm:$0xff]  }
  0x7d   :  { %1539 = vmatpush1.bf16.msra.mxu0 %v8550_v26  ;;  %v8588_v58 = vld [vmem:[#allocation8 + $0x144] ss:$16 sps:$4 sm:$0xff]   ;;  %v8592_v60 = vld [vmem:[#allocation8 + $0x140] ss:$16 sps:$4 sm:$0xff]  }
  0x7e   :  { %1582 = vmatpush1.bf16.msra.mxu1 %v8551_v27  ;;  %1540 = vmatprep.subr.bf16.mxu0 %v8552_v28  ;;  %v8590_v59 = vld [vmem:[#allocation8 + $0x344] ss:$16 sps:$4 sm:$0xff]   ;;  %v8593_v61 = vld [vmem:[#allocation8 + $0x340] ss:$16 sps:$4 sm:$0xff]   ;;  %v8627_v27 = vld [vmem:[#allocation8 + $0x88] ss:$16 sps:$4 sm:$0xff]  }
  0x7f   :  { %1583 = vmatprep.subr.bf16.mxu1 %v8554_v29  ;;  %v8594_v62 = vld [vmem:[#allocation8 + $0x124] ss:$16 sps:$4 sm:$0xff]   ;;  %v8598_v0 = vld [vmem:[#allocation8 + $0x120] ss:$16 sps:$4 sm:$0xff]   ;;  %v8635_v29 = vld [vmem:[#allocation8 + $0x6c] ss:$16 sps:$4 sm:$0xff]  }
  0x80   :  { %v8596_v63 = vld [vmem:[#allocation8 + $0x324] ss:$16 sps:$4 sm:$0xff]   ;;  %v8599_v1 = vld [vmem:[#allocation8 + $0x320] ss:$16 sps:$4 sm:$0xff]  }
  0x81   :  { %1541 = vmatpush1.bf16.msra.mxu0 %v8556_v30  ;;  %v8600_v2 = vld [vmem:[#allocation8 + $0x104] ss:$16 sps:$4 sm:$0xff]   ;;  %v8604_v4 = vld [vmem:[#allocation8 + $0x100] ss:$16 sps:$4 sm:$0xff]  }
  0x82   :  { %1584 = vmatpush1.bf16.msra.mxu1 %v8557_v31  ;;  %1542 = vmatprep.subr.bf16.mxu0 %v8558_v32  ;;  %v8602_v3 = vld [vmem:[#allocation8 + $0x304] ss:$16 sps:$4 sm:$0xff]   ;;  %v8605_v5 = vld [vmem:[#allocation8 + $0x300] ss:$16 sps:$4 sm:$0xff]   ;;  %v8633_v31 = vld [vmem:[#allocation8 + $0x68] ss:$16 sps:$4 sm:$0xff]  }
  0x83   :  { %1585 = vmatprep.subr.bf16.mxu1 %v8560_v33  ;;  %v164_v6 = vld [vmem:[#allocation5] sm:$0xff]  ;;  %v170_v7 = vld [vmem:[#allocation5 + $0x30] sm:$0xff]  ;;  %v8641_v33 = vld [vmem:[#allocation8 + $0x4c] ss:$16 sps:$4 sm:$0xff]  }
  0x84   :  { %v166_v8 = vld [vmem:[#allocation5 + $0x10] sm:$0xff]  ;;  %v172_v9 = vld [vmem:[#allocation5 + $0x40] sm:$0xff]  ;;  %v10321_v12 = vpack.c.bf16 %v170_v7, %v164_v6  ;;  %v8687_v7 = vld [vmem:[#allocation8 + $0x148] ss:$16 sps:$4 sm:$0xff]  }
  0x85   :  { %1543 = vmatpush2.bf16.msra.mxu0 %v8562_v34  ;;  %v8608_v10 = vld [vmem:[#allocation8 + $0x4e4] ss:$16 sps:$4 sm:$0xff]   ;;  %v10323_v13 = vpack.c.bf16 %v172_v9, %v166_v8  ;;  %v8606_v14 = vld [vmem:[#allocation8 + $0x4e0] ss:$16 sps:$4 sm:$0xff]   ;;  %v8695_v9 = vld [vmem:[#allocation8 + $0x12c] ss:$16 sps:$4 sm:$0xff]  }
  0x86   :  { %1586 = vmatpush2.bf16.msra.mxu1 %v8563_v35  ;;  %1544 = vmatprep.subr.bf16.mxu0 %v8564_v36  ;;  %v8614_v16 = vld [vmem:[#allocation8 + $0x4c4] ss:$16 sps:$4 sm:$0xff]   ;;  %v8612_v18 = vld [vmem:[#allocation8 + $0x4c0] ss:$16 sps:$4 sm:$0xff]   ;;  %v8639_v35 = vld [vmem:[#allocation8 + $0x48] ss:$16 sps:$4 sm:$0xff]  }
  0x87   :  { %1587 = vmatprep.subr.bf16.mxu1 %v8566_v37  ;;  %v8620_v20 = vld [vmem:[#allocation8 + $0x4a4] ss:$16 sps:$4 sm:$0xff]   ;;  %v8618_v22 = vld [vmem:[#allocation8 + $0x4a0] ss:$16 sps:$4 sm:$0xff]   ;;  %v8647_v37 = vld [vmem:[#allocation8 + $0x2c] ss:$16 sps:$4 sm:$0xff]  }
  0x88   :  { %v8626_v24 = vld [vmem:[#allocation8 + $0x484] ss:$16 sps:$4 sm:$0xff]   ;;  %v8624_v26 = vld [vmem:[#allocation8 + $0x480] ss:$16 sps:$4 sm:$0xff]  }
  0x89   :  { %1545 = vmatpush2.bf16.msra.mxu0 %v8568_v38  ;;  %v8632_v28 = vld [vmem:[#allocation8 + $0x464] ss:$16 sps:$4 sm:$0xff]   ;;  %v8630_v30 = vld [vmem:[#allocation8 + $0x460] ss:$16 sps:$4 sm:$0xff]  }
  0x8a   :  { %1588 = vmatpush2.bf16.msra.mxu1 %v8569_v39  ;;  %1546 = vmatprep.subr.bf16.mxu0 %v8570_v40  ;;  %v8638_v32 = vld [vmem:[#allocation8 + $0x444] ss:$16 sps:$4 sm:$0xff]   ;;  %v8636_v34 = vld [vmem:[#allocation8 + $0x440] ss:$16 sps:$4 sm:$0xff]   ;;  %v8645_v39 = vld [vmem:[#allocation8 + $0x28] ss:$16 sps:$4 sm:$0xff]  }
  0x8b   :  { %1589 = vmatprep.subr.bf16.mxu1 %v8572_v41  ;;  %v8644_v36 = vld [vmem:[#allocation8 + $0x424] ss:$16 sps:$4 sm:$0xff]   ;;  %v8642_v38 = vld [vmem:[#allocation8 + $0x420] ss:$16 sps:$4 sm:$0xff]   ;;  %v169_v41 = vld [vmem:[#allocation5 + $0x28] sm:$0xff] }
  0x8c   :  { %v8650_v40 = vld [vmem:[#allocation8 + $0x404] ss:$16 sps:$4 sm:$0xff]   ;;  %v8654_v49 = vld [vmem:[#allocation8 + $0x5e0] ss:$16 sps:$4 sm:$0xff]  }
  0x8d   :  { %1547 = vmatpush2.bf16.msra.mxu0 %v8574_v42  ;;  %v175_v42 = vld [vmem:[#allocation5 + $0x58] sm:$0xff]  ;;  %v8656_v47 = vld [vmem:[#allocation8 + $0x5e4] ss:$16 sps:$4 sm:$0xff]   ;;  %v8684_v6 = vld [vmem:[#allocation8 + $0x540] ss:$16 sps:$4 sm:$0xff]  }
  0x8e   :  { %1590 = vmatpush2.bf16.msra.mxu1 %v8575_v43  ;;  %1548 = vmatprep.subr.bf16.mxu0 %v8576_v44  ;;  %v8653_v43 = vld [vmem:[#allocation8 + $0xc] ss:$16 sps:$4 sm:$0xff]   ;;  %v10327_v44 = vpack.c.bf16 %v175_v42, %v169_v41  ;;  %v8692_v8 = vld [vmem:[#allocation8 + $0x524] ss:$16 sps:$4 sm:$0xff]   ;;  %v8732_v41 = vld [vmem:[#allocation8 + $0x248] ss:$16 sps:$4 sm:$0xff]  }
  0x8f   :  { %1591 = vmatprep.subr.bf16.mxu1 %v8578_v45  ;;  %v8648_v45 = vld [vmem:[#allocation8 + $0x400] ss:$16 sps:$4 sm:$0xff]   ;;  %v8735_v42 = vld [vmem:[#allocation8 + $0x448] ss:$16 sps:$4 sm:$0xff]  }
  0x91   :  { %1549 = vmatpush2.bf16.msra.mxu0 %v8580_v50  ;;  %v8657_v50 = vld [vmem:[#allocation8 + $0x1e8] ss:$16 sps:$4 sm:$0xff]  }
  0x92   :  { %1592 = vmatpush2.bf16.msra.mxu1 %v8581_v51  ;;  %1550 = vmatprep.subr.bf16.mxu0 %v8582_v52  ;;  %v8662_v51 = vld [vmem:[#allocation8 + $0x5c4] ss:$16 sps:$4 sm:$0xff]   ;;  %v8665_v52 = vld [vmem:[#allocation8 + $0x1cc] ss:$16 sps:$4 sm:$0xff]  }
  0x93   :  { %1593 = vmatprep.subr.bf16.mxu1 %v8584_v55  ;;  %v8663_v55 = vld [vmem:[#allocation8 + $0x1c8] ss:$16 sps:$4 sm:$0xff]  }
  0x95   :  { %1551 = vmatpush2.bf16.msra.mxu0 %v8586_v56  ;;  %v8668_v56 = vld [vmem:[#allocation8 + $0x5a4] ss:$16 sps:$4 sm:$0xff]  }
  0x96   :  { %1594 = vmatpush2.bf16.msra.mxu1 %v8587_v57  ;;  %1552 = vmatprep.subr.bf16.mxu0 %v8588_v58  ;;  %v8671_v57 = vld [vmem:[#allocation8 + $0x1ac] ss:$16 sps:$4 sm:$0xff]   ;;  %v8666_v58 = vld [vmem:[#allocation8 + $0x5a0] ss:$16 sps:$4 sm:$0xff]  }
  0x97   :  { %1595 = vmatprep.subr.bf16.mxu1 %v8590_v59  ;;  %v8669_v59 = vld [vmem:[#allocation8 + $0x1a8] ss:$16 sps:$4 sm:$0xff]  }
  0x99   :  { %1553 = vmatpush2.bf16.msra.mxu0 %v8592_v60  ;;  %v8674_v60 = vld [vmem:[#allocation8 + $0x584] ss:$16 sps:$4 sm:$0xff]  }
  0x9a   :  { %1596 = vmatpush2.bf16.msra.mxu1 %v8593_v61  ;;  %1554 = vmatprep.subr.bf16.mxu0 %v8594_v62  ;;  %v8677_v61 = vld [vmem:[#allocation8 + $0x18c] ss:$16 sps:$4 sm:$0xff]   ;;  %v8672_v62 = vld [vmem:[#allocation8 + $0x580] ss:$16 sps:$4 sm:$0xff]  }
  0x9b   :  { %1597 = vmatprep.subr.bf16.mxu1 %v8596_v63  ;;  %v8675_v63 = vld [vmem:[#allocation8 + $0x188] ss:$16 sps:$4 sm:$0xff]  }
  0x9d   :  { %1555 = vmatpush2.bf16.msra.mxu0 %v8598_v0  ;;  %v8680_v0 = vld [vmem:[#allocation8 + $0x564] ss:$16 sps:$4 sm:$0xff]  }
  0x9e   :  { %1598 = vmatpush2.bf16.msra.mxu1 %v8599_v1  ;;  %1556 = vmatprep.subr.bf16.mxu0 %v8600_v2  ;;  %v8683_v1 = vld [vmem:[#allocation8 + $0x16c] ss:$16 sps:$4 sm:$0xff]   ;;  %v8678_v2 = vld [vmem:[#allocation8 + $0x560] ss:$16 sps:$4 sm:$0xff]  }
  0x9f   :  { %1599 = vmatprep.subr.bf16.mxu1 %v8602_v3  ;;  %v8681_v3 = vld [vmem:[#allocation8 + $0x168] ss:$16 sps:$4 sm:$0xff]  }
  0xa1   :  { %1557 = vmatpush2.bf16.msra.mxu0 %v8604_v4  ;;  %v8686_v4 = vld [vmem:[#allocation8 + $0x544] ss:$16 sps:$4 sm:$0xff]  }
  0xa2   :  { %1600 = vmatpush2.bf16.msra.mxu1 %v8605_v5  ;;  %1612 = vmatprep.subr.bf16.mxu0 %v8608_v10  ;;  %v8689_v5 = vld [vmem:[#allocation8 + $0x14c] ss:$16 sps:$4 sm:$0xff]   ;;  %v8690_v10 = vld [vmem:[#allocation8 + $0x520] ss:$16 sps:$4 sm:$0xff]  }
  0xa3   :  { %1655 = vmatprep.subr.bf16.mxu1 %v8611_v11  ;;  %v8693_v11 = vld [vmem:[#allocation8 + $0x128] ss:$16 sps:$4 sm:$0xff]  }
  0xa4   :  { %1559 = vmatmul.mubr.bf16.vlgmr.msra.gmra.mxu0 %v10321_v12 }
  0xa5   :  { %1602 = vmatmul.mubr.bf16.vlgmr.msra.gmra.mxu1 %v10323_v13  ;;  %1613 = vmatpush1.bf16.msra.mxu0 %v8606_v14  ;;  %v8698_v14 = vld [vmem:[#allocation8 + $0x504] ss:$16 sps:$4 sm:$0xff]  }
  0xa6   :  { %1656 = vmatpush1.bf16.msra.mxu1 %v8609_v15  ;;  %1614 = vmatprep.subr.bf16.mxu0 %v8614_v16  ;;  %v8701_v15 = vld [vmem:[#allocation8 + $0x10c] ss:$16 sps:$4 sm:$0xff]   ;;  %v8696_v16 = vld [vmem:[#allocation8 + $0x500] ss:$16 sps:$4 sm:$0xff]  }
  0xa7   :  { %1657 = vmatprep.subr.bf16.mxu1 %v8617_v17  ;;  %1687 = vmatprep.mubr.bf16.mxu1 %v177_v53  ;;  %v8660_v53 = vld [vmem:[#allocation8 + $0x5c0] ss:$16 sps:$4 sm:$0xff]   ;;  %v8699_v17 = vld [vmem:[#allocation8 + $0x108] ss:$16 sps:$4 sm:$0xff]  }
  0xa8   :  { %1644 = vmatprep.mubr.bf16.mxu0 %v10327_v44 }
  0xa9   :  { %1615 = vmatpush1.bf16.msra.mxu0 %v8612_v18  ;;  %v168_v18 = vld [vmem:[#allocation5 + $0x20] sm:$0xff] }
  0xaa   :  { %1658 = vmatpush1.bf16.msra.mxu1 %v8615_v19  ;;  %1616 = vmatprep.subr.bf16.mxu0 %v8620_v20  ;;  %v174_v19 = vld [vmem:[#allocation5 + $0x50] sm:$0xff]  ;;  %v8704_v20 = vld [vmem:[#allocation8 + $0x2ec] ss:$16 sps:$4 sm:$0xff]  }
  0xab   :  { %1659 = vmatprep.subr.bf16.mxu1 %v8623_v21  ;;  %v8707_v21 = vld [vmem:[#allocation8 + $0x4ec] ss:$16 sps:$4 sm:$0xff]  }
  0xad   :  { %1617 = vmatpush1.bf16.msra.mxu0 %v8618_v22  ;;  %v10330_v22 = vpack.c.bf16 %v174_v19, %v168_v18  ;;  %v8794_v18 = vld [vmem:[#allocation8 + $0x30c] ss:$16 sps:$4 sm:$0xff]  }
  0xae   :  { %1660 = vmatpush1.bf16.msra.mxu1 %v8621_v23  ;;  %1618 = vmatprep.subr.bf16.mxu0 %v8626_v24  ;;  %v8702_v23 = vld [vmem:[#allocation8 + $0x2e8] ss:$16 sps:$4 sm:$0xff]   ;;  %v8797_v19 = vld [vmem:[#allocation8 + $0x50c] ss:$16 sps:$4 sm:$0xff]  }
  0xaf   :  { %1661 = vmatprep.subr.bf16.mxu1 %v8629_v25  ;;  %v8705_v24 = vld [vmem:[#allocation8 + $0x4e8] ss:$16 sps:$4 sm:$0xff]   ;;  %v8710_v25 = vld [vmem:[#allocation8 + $0x2cc] ss:$16 sps:$4 sm:$0xff]  }
  0xb1   :  { %1619 = vmatpush1.bf16.msra.mxu0 %v8624_v26  ;;  %v8713_v26 = vld [vmem:[#allocation8 + $0x4cc] ss:$16 sps:$4 sm:$0xff]  }
  0xb2   :  { %1662 = vmatpush1.bf16.msra.mxu1 %v8627_v27  ;;  %1620 = vmatprep.subr.bf16.mxu0 %v8632_v28  ;;  %v8708_v27 = vld [vmem:[#allocation8 + $0x2c8] ss:$16 sps:$4 sm:$0xff]  }
  0xb3   :  { %1663 = vmatprep.subr.bf16.mxu1 %v8635_v29  ;;  %v8711_v28 = vld [vmem:[#allocation8 + $0x4c8] ss:$16 sps:$4 sm:$0xff]   ;;  %v8716_v29 = vld [vmem:[#allocation8 + $0x2ac] ss:$16 sps:$4 sm:$0xff]  }
  0xb5   :  { %1621 = vmatpush1.bf16.msra.mxu0 %v8630_v30  ;;  %v8719_v30 = vld [vmem:[#allocation8 + $0x4ac] ss:$16 sps:$4 sm:$0xff]  }
  0xb6   :  { %1664 = vmatpush1.bf16.msra.mxu1 %v8633_v31  ;;  %1622 = vmatprep.subr.bf16.mxu0 %v8638_v32  ;;  %v8714_v31 = vld [vmem:[#allocation8 + $0x2a8] ss:$16 sps:$4 sm:$0xff]  }
  0xb7   :  { %1665 = vmatprep.subr.bf16.mxu1 %v8641_v33  ;;  %v8717_v32 = vld [vmem:[#allocation8 + $0x4a8] ss:$16 sps:$4 sm:$0xff]   ;;  %v8722_v33 = vld [vmem:[#allocation8 + $0x28c] ss:$16 sps:$4 sm:$0xff]  }
  0xb9   :  { %1623 = vmatpush1.bf16.msra.mxu0 %v8636_v34  ;;  %v8720_v34 = vld [vmem:[#allocation8 + $0x288] ss:$16 sps:$4 sm:$0xff]  }
  0xba   :  { %1666 = vmatpush1.bf16.msra.mxu1 %v8639_v35  ;;  %1624 = vmatprep.subr.bf16.mxu0 %v8644_v36  ;;  %v8723_v35 = vld [vmem:[#allocation8 + $0x488] ss:$16 sps:$4 sm:$0xff]   ;;  %v8728_v36 = vld [vmem:[#allocation8 + $0x26c] ss:$16 sps:$4 sm:$0xff]  }
  0xbb   :  { %1667 = vmatprep.subr.bf16.mxu1 %v8647_v37  ;;  %v8731_v37 = vld [vmem:[#allocation8 + $0x46c] ss:$16 sps:$4 sm:$0xff]  }
  0xbd   :  { %1625 = vmatpush1.bf16.msra.mxu0 %v8642_v38  ;;  %v8726_v38 = vld [vmem:[#allocation8 + $0x268] ss:$16 sps:$4 sm:$0xff]  }
  0xbe   :  { %1668 = vmatpush1.bf16.msra.mxu1 %v8645_v39  ;;  %1626 = vmatprep.subr.bf16.mxu0 %v8650_v40  ;;  %v8734_v39 = vld [vmem:[#allocation8 + $0x24c] ss:$16 sps:$4 sm:$0xff]  }
  0xbf   :  { %1669 = vmatprep.subr.bf16.mxu1 %v8653_v43  ;;  %v8737_v40 = vld [vmem:[#allocation8 + $0x44c] ss:$16 sps:$4 sm:$0xff]  }
  0xc0   :  { %v8740_v43 = vld [vmem:[#allocation8 + $0x22c] ss:$16 sps:$4 sm:$0xff]  }
  0xc1   :  { %1627 = vmatpush1.bf16.msra.mxu0 %v8648_v45  ;;  %v8738_v45 = vld [vmem:[#allocation8 + $0x228] ss:$16 sps:$4 sm:$0xff]  }
  0xc2   :  { %1670 = vmatpush1.bf16.msra.mxu1 %v8651_v46  ;;  %1628 = vmatprep.subr.bf16.mxu0 %v8656_v47  ;;  %v8741_v46 = vld [vmem:[#allocation8 + $0x428] ss:$16 sps:$4 sm:$0xff]   ;;  %v8746_v47 = vld [vmem:[#allocation8 + $0x20c] ss:$16 sps:$4 sm:$0xff]  }
  0xc3   :  { %1671 = vmatprep.subr.bf16.mxu1 %v8659_v48  ;;  %v8749_v48 = vld [vmem:[#allocation8 + $0x40c] ss:$16 sps:$4 sm:$0xff]  }
  0xc5   :  { %1629 = vmatpush2.bf16.msra.mxu0 %v8654_v49  ;;  %v8744_v49 = vld [vmem:[#allocation8 + $0x208] ss:$16 sps:$4 sm:$0xff]  }
  0xc6   :  { %1672 = vmatpush2.bf16.msra.mxu1 %v8657_v50  ;;  %1630 = vmatprep.subr.bf16.mxu0 %v8662_v51  ;;  %v8747_v50 = vld [vmem:[#allocation8 + $0x408] ss:$16 sps:$4 sm:$0xff]   ;;  %v8752_v51 = vld [vmem:[#allocation8 + $0x3ec] ss:$16 sps:$4 sm:$0xff]  }
  0xc7   :  { %1673 = vmatprep.subr.bf16.mxu1 %v8665_v52  ;;  %v8755_v52 = vld [vmem:[#allocation8 + $0x5ec] ss:$16 sps:$4 sm:$0xff]  }
  0xc9   :  { %1631 = vmatpush2.bf16.msra.mxu0 %v8660_v53  ;;  %v8750_v53 = vld [vmem:[#allocation8 + $0x3e8] ss:$16 sps:$4 sm:$0xff]  }
  0xca   :  { %1674 = vmatpush2.bf16.msra.mxu1 %v8663_v55  ;;  %1632 = vmatprep.subr.bf16.mxu0 %v8668_v56  ;;  %v8753_v55 = vld [vmem:[#allocation8 + $0x5e8] ss:$16 sps:$4 sm:$0xff]   ;;  %v8758_v56 = vld [vmem:[#allocation8 + $0x3cc] ss:$16 sps:$4 sm:$0xff]  }
  0xcb   :  { %1675 = vmatprep.subr.bf16.mxu1 %v8671_v57  ;;  %v8761_v57 = vld [vmem:[#allocation8 + $0x5cc] ss:$16 sps:$4 sm:$0xff]  }
  0xcd   :  { %1633 = vmatpush2.bf16.msra.mxu0 %v8666_v58  ;;  %v8756_v58 = vld [vmem:[#allocation8 + $0x3c8] ss:$16 sps:$4 sm:$0xff]  }
  0xce   :  { %1676 = vmatpush2.bf16.msra.mxu1 %v8669_v59  ;;  %1634 = vmatprep.subr.bf16.mxu0 %v8674_v60  ;;  %v8759_v59 = vld [vmem:[#allocation8 + $0x5c8] ss:$16 sps:$4 sm:$0xff]   ;;  %v8764_v60 = vld [vmem:[#allocation8 + $0x3ac] ss:$16 sps:$4 sm:$0xff]  }
  0xcf   :  { %1677 = vmatprep.subr.bf16.mxu1 %v8677_v61  ;;  %v8767_v61 = vld [vmem:[#allocation8 + $0x5ac] ss:$16 sps:$4 sm:$0xff]  }
  0xd1   :  { %1635 = vmatpush2.bf16.msra.mxu0 %v8672_v62  ;;  %v8762_v62 = vld [vmem:[#allocation8 + $0x3a8] ss:$16 sps:$4 sm:$0xff]  }
  0xd2   :  { %1678 = vmatpush2.bf16.msra.mxu1 %v8675_v63  ;;  %1636 = vmatprep.subr.bf16.mxu0 %v8680_v0  ;;  %v8765_v63 = vld [vmem:[#allocation8 + $0x5a8] ss:$16 sps:$4 sm:$0xff]   ;;  %v8770_v0 = vld [vmem:[#allocation8 + $0x38c] ss:$16 sps:$4 sm:$0xff]  }
  0xd3   :  { %1679 = vmatprep.subr.bf16.mxu1 %v8683_v1  ;;  %v8773_v1 = vld [vmem:[#allocation8 + $0x58c] ss:$16 sps:$4 sm:$0xff]  }
  0xd5   :  { %1637 = vmatpush2.bf16.msra.mxu0 %v8678_v2  ;;  %v8768_v2 = vld [vmem:[#allocation8 + $0x388] ss:$16 sps:$4 sm:$0xff]  }
  0xd6   :  { %1680 = vmatpush2.bf16.msra.mxu1 %v8681_v3  ;;  %1638 = vmatprep.subr.bf16.mxu0 %v8686_v4  ;;  %v8771_v3 = vld [vmem:[#allocation8 + $0x588] ss:$16 sps:$4 sm:$0xff]   ;;  %v8776_v4 = vld [vmem:[#allocation8 + $0x36c] ss:$16 sps:$4 sm:$0xff]  }
  0xd7   :  { %1681 = vmatprep.subr.bf16.mxu1 %v8689_v5  ;;  %v8779_v5 = vld [vmem:[#allocation8 + $0x56c] ss:$16 sps:$4 sm:$0xff]  }
  0xd9   :  { %1639 = vmatpush2.bf16.msra.mxu0 %v8684_v6  ;;  %v8774_v6 = vld [vmem:[#allocation8 + $0x368] ss:$16 sps:$4 sm:$0xff]  }
  0xda   :  { %1682 = vmatpush2.bf16.msra.mxu1 %v8687_v7  ;;  %1640 = vmatprep.subr.bf16.mxu0 %v8692_v8  ;;  %v8777_v7 = vld [vmem:[#allocation8 + $0x568] ss:$16 sps:$4 sm:$0xff]   ;;  %v8782_v8 = vld [vmem:[#allocation8 + $0x34c] ss:$16 sps:$4 sm:$0xff]  }
  0xdb   :  { %1683 = vmatprep.subr.bf16.mxu1 %v8695_v9  ;;  %v8785_v9 = vld [vmem:[#allocation8 + $0x54c] ss:$16 sps:$4 sm:$0xff]  }
  0xdd   :  { %1641 = vmatpush2.bf16.msra.mxu0 %v8690_v10  ;;  %v8780_v10 = vld [vmem:[#allocation8 + $0x348] ss:$16 sps:$4 sm:$0xff]  }
  0xde   :  { %1684 = vmatpush2.bf16.msra.mxu1 %v8693_v11  ;;  %1642 = vmatprep.subr.bf16.mxu0 %v8698_v14  ;;  %v8783_v11 = vld [vmem:[#allocation8 + $0x548] ss:$16 sps:$4 sm:$0xff]   ;;  %v8788_v14 = vld [vmem:[#allocation8 + $0x32c] ss:$16 sps:$4 sm:$0xff]  }
  0xdf   :  { %1685 = vmatprep.subr.bf16.mxu1 %v8701_v15  ;;  %v8791_v15 = vld [vmem:[#allocation8 + $0x52c] ss:$16 sps:$4 sm:$0xff]  }
  0xe1   :  { %1643 = vmatpush2.bf16.msra.mxu0 %v8696_v16  ;;  %v8786_v16 = vld [vmem:[#allocation8 + $0x328] ss:$16 sps:$4 sm:$0xff]  }
  0xe2   :  { %1686 = vmatpush2.bf16.msra.mxu1 %v8699_v17  ;;  %1698 = vmatprep.subr.bf16.mxu0 %v8704_v20  ;;  %v8789_v17 = vld [vmem:[#allocation8 + $0x528] ss:$16 sps:$4 sm:$0xff]  }
  0xe3   :  { %1741 = vmatprep.subr.bf16.mxu1 %v8707_v21  ;;  %v8792_v20 = vld [vmem:[#allocation8 + $0x308] ss:$16 sps:$4 sm:$0xff]  }
  0xe4   :  { %1645 = vmatmul.mubr.bf16.vlgmr.msra.gmra.mxu0 %v10330_v22  ;;  %v8795_v21 = vld [vmem:[#allocation8 + $0x508] ss:$16 sps:$4 sm:$0xff]  }
  0xe5   :  { %1688 = vmatmul.mubr.bf16.vlgmr.msra.gmra.mxu1 %v10321_v12  ;;  %1699 = vmatpush1.bf16.msra.mxu0 %v8702_v23  ;;  %v8725_v12 = vld [vmem:[#allocation8 + $0x48c] ss:$16 sps:$4 sm:$0xff]   ;;  %v8800_v23 = vld [vmem:[#allocation7 + $0xe4] ss:$16 sps:$4 sm:$0xff]  }
  0xe6   :  { %1742 = vmatpush1.bf16.msra.mxu1 %v8705_v24  ;;  %1700 = vmatprep.subr.bf16.mxu0 %v8710_v25  ;;  %v8803_v24 = vld [vmem:[#allocation7 + $0x2e4] ss:$16 sps:$4 sm:$0xff]   ;;  %v8798_v25 = vld [vmem:[#allocation7 + $0xe0] ss:$16 sps:$4 sm:$0xff]  }
  0xe7   :  { %1743 = vmatprep.subr.bf16.mxu1 %v8713_v26  ;;  %1730 = vmatprep.mubr.bf16.mxu0 %v10318_v54  ;;  %v8729_v54 = vld [vmem:[#allocation8 + $0x468] ss:$16 sps:$4 sm:$0xff]   ;;  %v8801_v26 = vld [vmem:[#allocation7 + $0x2e0] ss:$16 sps:$4 sm:$0xff]  }
  0xe8   :  { %1773 = vmatprep.mubr.bf16.mxu1 %v10327_v44  ;;  %v8743_v44 = vld [vmem:[#allocation8 + $0x42c] ss:$16 sps:$4 sm:$0xff]  }
  0xe9   :  { %1701 = vmatpush1.bf16.msra.mxu0 %v8708_v27  ;;  %v147_v27 = vld [vmem:[#allocation2 + $0x8] sm:$0xff] }
  0xea   :  { %1744 = vmatpush1.bf16.msra.mxu1 %v8711_v28  ;;  %1702 = vmatprep.subr.bf16.mxu0 %v8716_v29  ;;  %v153_v28 = vld [vmem:[#allocation2 + $0x38] sm:$0xff] }
  0xeb   :  { %1745 = vmatprep.subr.bf16.mxu1 %v8719_v30  ;;  %v149_v29 = vld [vmem:[#allocation2 + $0x18] sm:$0xff]  ;;  %v155_v30 = vld [vmem:[#allocation2 + $0x48] sm:$0xff] }
  0xed   :  { %1703 = vmatpush1.bf16.msra.mxu0 %v8714_v31  ;;  %v8806_v31 = vld [vmem:[#allocation7 + $0xc4] ss:$16 sps:$4 sm:$0xff]  }
  0xee   :  { %1746 = vmatpush1.bf16.msra.mxu1 %v8717_v32  ;;  %1704 = vmatprep.subr.bf16.mxu0 %v8722_v33  ;;  %v8809_v32 = vld [vmem:[#allocation7 + $0x2c4] ss:$16 sps:$4 sm:$0xff]   ;;  %v10336_v33 = vpack.c.bf16 %v153_v28, %v147_v27  ;;  %v8888_v27 = vld [vmem:[#allocation7 + $0x100] ss:$16 sps:$4 sm:$0xff]  }
  0xef   :  { %1747 = vmatprep.subr.bf16.mxu1 %v8725_v12  ;;  %v10338_v12 = vpack.c.bf16 %v155_v30, %v149_v29  ;;  %v8891_v28 = vld [vmem:[#allocation7 + $0x300] ss:$16 sps:$4 sm:$0xff]  }
  0xf0   :  { %v146_v29 = vld [vmem:[#allocation2] sm:$0xff]  ;;  %v152_v30 = vld [vmem:[#allocation2 + $0x30] sm:$0xff] }
  0xf1   :  { %1705 = vmatpush1.bf16.msra.mxu0 %v8720_v34  ;;  %v8804_v34 = vld [vmem:[#allocation7 + $0xc0] ss:$16 sps:$4 sm:$0xff]  }
  0xf2   :  { %1748 = vmatpush1.bf16.msra.mxu1 %v8723_v35  ;;  %1706 = vmatprep.subr.bf16.mxu0 %v8728_v36  ;;  %v8807_v35 = vld [vmem:[#allocation7 + $0x2c0] ss:$16 sps:$4 sm:$0xff]   ;;  %v8812_v36 = vld [vmem:[#allocation7 + $0xa4] ss:$16 sps:$4 sm:$0xff]  }
  0xf3   :  { %1749 = vmatprep.subr.bf16.mxu1 %v8731_v37  ;;  %v8815_v37 = vld [vmem:[#allocation7 + $0x2a4] ss:$16 sps:$4 sm:$0xff]  }
  0xf5   :  { %1707 = vmatpush1.bf16.msra.mxu0 %v8726_v38  ;;  %v8810_v38 = vld [vmem:[#allocation7 + $0xa0] ss:$16 sps:$4 sm:$0xff]  }
  0xf6   :  { %1750 = vmatpush1.bf16.msra.mxu1 %v8729_v54  ;;  %1708 = vmatprep.subr.bf16.mxu0 %v8734_v39  ;;  %v8813_v54 = vld [vmem:[#allocation7 + $0x2a0] ss:$16 sps:$4 sm:$0xff]   ;;  %v8818_v39 = vld [vmem:[#allocation7 + $0x84] ss:$16 sps:$4 sm:$0xff]  }
  0xf7   :  { %1751 = vmatprep.subr.bf16.mxu1 %v8737_v40  ;;  %v8819_v40 = vld [vmem:[#allocation7 + $0x280] ss:$16 sps:$4 sm:$0xff]  }
  0xf9   :  { %1709 = vmatpush1.bf16.msra.mxu0 %v8732_v41  ;;  %v8824_v41 = vld [vmem:[#allocation7 + $0x64] ss:$16 sps:$4 sm:$0xff]  }
  0xfa   :  { %1752 = vmatpush1.bf16.msra.mxu1 %v8735_v42  ;;  %1710 = vmatprep.subr.bf16.mxu0 %v8740_v43  ;;  %v8827_v42 = vld [vmem:[#allocation7 + $0x264] ss:$16 sps:$4 sm:$0xff]   ;;  %v8822_v43 = vld [vmem:[#allocation7 + $0x60] ss:$16 sps:$4 sm:$0xff]  }
  0xfb   :  { %1753 = vmatprep.subr.bf16.mxu1 %v8743_v44  ;;  %v8825_v44 = vld [vmem:[#allocation7 + $0x260] ss:$16 sps:$4 sm:$0xff]  }
  0xfd   :  { %1711 = vmatpush1.bf16.msra.mxu0 %v8738_v45  ;;  %v8830_v45 = vld [vmem:[#allocation7 + $0x44] ss:$16 sps:$4 sm:$0xff]  }
  0xfe   :  { %1754 = vmatpush1.bf16.msra.mxu1 %v8741_v46  ;;  %1712 = vmatprep.subr.bf16.mxu0 %v8746_v47  ;;  %v8833_v46 = vld [vmem:[#allocation7 + $0x244] ss:$16 sps:$4 sm:$0xff]   ;;  %v8828_v47 = vld [vmem:[#allocation7 + $0x40] ss:$16 sps:$4 sm:$0xff]  }
  0xff   :  { %1755 = vmatprep.subr.bf16.mxu1 %v8749_v48  ;;  %v8831_v48 = vld [vmem:[#allocation7 + $0x240] ss:$16 sps:$4 sm:$0xff]  }
 0x101   :  { %1713 = vmatpush1.bf16.msra.mxu0 %v8744_v49  ;;  %v8836_v49 = vld [vmem:[#allocation7 + $0x24] ss:$16 sps:$4 sm:$0xff]  }
 0x102   :  { %1756 = vmatpush1.bf16.msra.mxu1 %v8747_v50  ;;  %1714 = vmatprep.subr.bf16.mxu0 %v8752_v51  ;;  %v8839_v50 = vld [vmem:[#allocation7 + $0x224] ss:$16 sps:$4 sm:$0xff]   ;;  %v8834_v51 = vld [vmem:[#allocation7 + $0x20] ss:$16 sps:$4 sm:$0xff]  }
 0x103   :  { %1757 = vmatprep.subr.bf16.mxu1 %v8755_v52  ;;  %v8837_v52 = vld [vmem:[#allocation7 + $0x220] ss:$16 sps:$4 sm:$0xff]  }
 0x105   :  { %1715 = vmatpush2.bf16.msra.mxu0 %v8750_v53  ;;  %v8842_v53 = vld [vmem:[#allocation7 + $0x4] ss:$16 sps:$4 sm:$0xff]  }
 0x106   :  { %1758 = vmatpush2.bf16.msra.mxu1 %v8753_v55  ;;  %1716 = vmatprep.subr.bf16.mxu0 %v8758_v56  ;;  %v8845_v55 = vld [vmem:[#allocation7 + $0x204] ss:$16 sps:$4 sm:$0xff]   ;;  %v8840_v56 = vld [vmem:[#allocation7] ss:$16 sps:$4 sm:$0xff]  }
 0x107   :  { %1759 = vmatprep.subr.bf16.mxu1 %v8761_v57  ;;  %v8843_v57 = vld [vmem:[#allocation7 + $0x200] ss:$16 sps:$4 sm:$0xff]  }
 0x109   :  { %1717 = vmatpush2.bf16.msra.mxu0 %v8756_v58  ;;  %v8848_v58 = vld [vmem:[#allocation7 + $0x1e4] ss:$16 sps:$4 sm:$0xff]  }
 0x10a   :  { %1760 = vmatpush2.bf16.msra.mxu1 %v8759_v59  ;;  %1718 = vmatprep.subr.bf16.mxu0 %v8764_v60  ;;  %v8851_v59 = vld [vmem:[#allocation7 + $0x3e4] ss:$16 sps:$4 sm:$0xff]   ;;  %v8846_v60 = vld [vmem:[#allocation7 + $0x1e0] ss:$16 sps:$4 sm:$0xff]  }
 0x10b   :  { %1761 = vmatprep.subr.bf16.mxu1 %v8767_v61  ;;  %v8849_v61 = vld [vmem:[#allocation7 + $0x3e0] ss:$16 sps:$4 sm:$0xff]  }
 0x10d   :  { %1719 = vmatpush2.bf16.msra.mxu0 %v8762_v62  ;;  %v8854_v62 = vld [vmem:[#allocation7 + $0x1c4] ss:$16 sps:$4 sm:$0xff]  }
 0x10e   :  { %1762 = vmatpush2.bf16.msra.mxu1 %v8765_v63  ;;  %1720 = vmatprep.subr.bf16.mxu0 %v8770_v0  ;;  %v8857_v63 = vld [vmem:[#allocation7 + $0x3c4] ss:$16 sps:$4 sm:$0xff]   ;;  %v8852_v0 = vld [vmem:[#allocation7 + $0x1c0] ss:$16 sps:$4 sm:$0xff]  }
 0x10f   :  { %1763 = vmatprep.subr.bf16.mxu1 %v8773_v1  ;;  %v8855_v1 = vld [vmem:[#allocation7 + $0x3c0] ss:$16 sps:$4 sm:$0xff]  }
 0x111   :  { %1721 = vmatpush2.bf16.msra.mxu0 %v8768_v2  ;;  %v8860_v2 = vld [vmem:[#allocation7 + $0x1a4] ss:$16 sps:$4 sm:$0xff]  }
 0x112   :  { %1764 = vmatpush2.bf16.msra.mxu1 %v8771_v3  ;;  %1722 = vmatprep.subr.bf16.mxu0 %v8776_v4  ;;  %v8863_v3 = vld [vmem:[#allocation7 + $0x3a4] ss:$16 sps:$4 sm:$0xff]   ;;  %v8858_v4 = vld [vmem:[#allocation7 + $0x1a0] ss:$16 sps:$4 sm:$0xff]  }
 0x113   :  { %1765 = vmatprep.subr.bf16.mxu1 %v8779_v5  ;;  %v8861_v5 = vld [vmem:[#allocation7 + $0x3a0] ss:$16 sps:$4 sm:$0xff]  }
 0x115   :  { %1723 = vmatpush2.bf16.msra.mxu0 %v8774_v6  ;;  %v8866_v6 = vld [vmem:[#allocation7 + $0x184] ss:$16 sps:$4 sm:$0xff]  }
 0x116   :  { %1766 = vmatpush2.bf16.msra.mxu1 %v8777_v7  ;;  %1724 = vmatprep.subr.bf16.mxu0 %v8782_v8  ;;  %v8869_v7 = vld [vmem:[#allocation7 + $0x384] ss:$16 sps:$4 sm:$0xff]   ;;  %v8864_v8 = vld [vmem:[#allocation7 + $0x180] ss:$16 sps:$4 sm:$0xff]  }
 0x117   :  { %1767 = vmatprep.subr.bf16.mxu1 %v8785_v9  ;;  %v8867_v9 = vld [vmem:[#allocation7 + $0x380] ss:$16 sps:$4 sm:$0xff]  }
 0x119   :  { %1725 = vmatpush2.bf16.msra.mxu0 %v8780_v10  ;;  %v8872_v10 = vld [vmem:[#allocation7 + $0x164] ss:$16 sps:$4 sm:$0xff]  }
 0x11a   :  { %1768 = vmatpush2.bf16.msra.mxu1 %v8783_v11  ;;  %1726 = vmatprep.subr.bf16.mxu0 %v8788_v14  ;;  %v8875_v11 = vld [vmem:[#allocation7 + $0x364] ss:$16 sps:$4 sm:$0xff]   ;;  %v8870_v14 = vld [vmem:[#allocation7 + $0x160] ss:$16 sps:$4 sm:$0xff]  }
 0x11b   :  { %1769 = vmatprep.subr.bf16.mxu1 %v8791_v15  ;;  %v8873_v15 = vld [vmem:[#allocation7 + $0x360] ss:$16 sps:$4 sm:$0xff]  }
 0x11d   :  { %1727 = vmatpush2.bf16.msra.mxu0 %v8786_v16  ;;  %v8878_v16 = vld [vmem:[#allocation7 + $0x144] ss:$16 sps:$4 sm:$0xff]  }
 0x11e   :  { %1770 = vmatpush2.bf16.msra.mxu1 %v8789_v17  ;;  %1728 = vmatprep.subr.bf16.mxu0 %v8794_v18  ;;  %v8881_v17 = vld [vmem:[#allocation7 + $0x344] ss:$16 sps:$4 sm:$0xff]   ;;  %v8876_v18 = vld [vmem:[#allocation7 + $0x140] ss:$16 sps:$4 sm:$0xff]  }
 0x11f   :  { %1771 = vmatprep.subr.bf16.mxu1 %v8797_v19  ;;  %v8879_v19 = vld [vmem:[#allocation7 + $0x340] ss:$16 sps:$4 sm:$0xff]  }
 0x121   :  { %1729 = vmatpush2.bf16.msra.mxu0 %v8792_v20  ;;  %v8884_v20 = vld [vmem:[#allocation7 + $0x124] ss:$16 sps:$4 sm:$0xff]  }
 0x122   :  { %1772 = vmatpush2.bf16.msra.mxu1 %v8795_v21  ;;  %2744 = vmatprep.subr.bf16.mxu0 %v8800_v23  ;;  %v8887_v21 = vld [vmem:[#allocation7 + $0x324] ss:$16 sps:$4 sm:$0xff]   ;;  %v8882_v23 = vld [vmem:[#allocation7 + $0x120] ss:$16 sps:$4 sm:$0xff]  }
 0x123   :  { %2787 = vmatprep.subr.bf16.mxu1 %v8803_v24  ;;  %v8885_v24 = vld [vmem:[#allocation7 + $0x320] ss:$16 sps:$4 sm:$0xff]  }
 0x124   :  { %1731 = vmatmul.mubr.bf16.vlgmr.msra.gmra.mxu0 %v10323_v13  ;;  %v8821_v13 = vld [vmem:[#allocation7 + $0x284] ss:$16 sps:$4 sm:$0xff]  }
 0x125   :  { %1774 = vmatmul.mubr.bf16.vlgmr.msra.gmra.mxu1 %v10330_v22  ;;  %2745 = vmatpush1.bf16.msra.mxu0 %v8798_v25  ;;  %v8816_v22 = vld [vmem:[#allocation7 + $0x80] ss:$16 sps:$4 sm:$0xff]   ;;  %v8890_v25 = vld [vmem:[#allocation7 + $0x104] ss:$16 sps:$4 sm:$0xff]  }
 0x126   :  { %2788 = vmatpush1.bf16.msra.mxu1 %v8801_v26  ;;  %2746 = vmatprep.subr.bf16.mxu0 %v8806_v31  ;;  %v8893_v26 = vld [vmem:[#allocation7 + $0x304] ss:$16 sps:$4 sm:$0xff]  }
 0x127   :  { %2789 = vmatprep.subr.bf16.mxu1 %v8809_v32  ;;  %2776 = vmatprep.mubr.bf16.mxu0 %v10336_v33  ;;  %v148_v31 = vld [vmem:[#allocation2 + $0x10] sm:$0xff]  ;;  %v154_v32 = vld [vmem:[#allocation2 + $0x40] sm:$0xff] }
 0x128   :  { %2819 = vmatprep.mubr.bf16.mxu1 %v10338_v12 }
 0x129   :  { %2747 = vmatpush1.bf16.msra.mxu0 %v8804_v34  ;;  %v8896_v34 = vld [vmem:[#allocation7 + $0x4e4] ss:$16 sps:$4 sm:$0xff]  }
 0x12a   :  { %2790 = vmatpush1.bf16.msra.mxu1 %v8807_v35  ;;  %2748 = vmatprep.subr.bf16.mxu0 %v8812_v36  ;;  %v8899_v35 = vld [vmem:[#allocation7 + $0xec] ss:$16 sps:$4 sm:$0xff]   ;;  %v8894_v36 = vld [vmem:[#allocation7 + $0x4e0] ss:$16 sps:$4 sm:$0xff]  }
 0x12b   :  { %2791 = vmatprep.subr.bf16.mxu1 %v8815_v37  ;;  %v8897_v37 = vld [vmem:[#allocation7 + $0xe8] ss:$16 sps:$4 sm:$0xff]  }
 0x12d   :  { %2749 = vmatpush1.bf16.msra.mxu0 %v8810_v38  ;;  %v10344_v38 = vpack.c.bf16 %v152_v30, %v146_v29  ;;  %v8972_v29 = vld [vmem:[#allocation7 + $0x540] ss:$16 sps:$4 sm:$0xff]   ;;  %v8975_v30 = vld [vmem:[#allocation7 + $0x148] ss:$16 sps:$4 sm:$0xff]  }
 0x12e   :  { %2792 = vmatpush1.bf16.msra.mxu1 %v8813_v54  ;;  %2750 = vmatprep.subr.bf16.mxu0 %v8818_v39  ;;  %v10346_v54 = vpack.c.bf16 %v154_v32, %v148_v31  ;;  %v151_v39 = vld [vmem:[#allocation2 + $0x28] sm:$0xff]  ;;  %v8980_v31 = vld [vmem:[#allocation7 + $0x524] ss:$16 sps:$4 sm:$0xff]  }
 0x12f   :  { %2793 = vmatprep.subr.bf16.mxu1 %v8821_v13  ;;  %v157_v13 = vld [vmem:[#allocation2 + $0x58] sm:$0xff] }
 0x130   :  { %v8983_v32 = vld [vmem:[#allocation7 + $0x12c] ss:$16 sps:$4 sm:$0xff]  }
 0x131   :  { %2751 = vmatpush1.bf16.msra.mxu0 %v8816_v22  ;;  %v8902_v22 = vld [vmem:[#allocation7 + $0x4c4] ss:$16 sps:$4 sm:$0xff]  }
 0x132   :  { %2794 = vmatpush1.bf16.msra.mxu1 %v8819_v40  ;;  %2752 = vmatprep.subr.bf16.mxu0 %v8824_v41  ;;  %v8905_v40 = vld [vmem:[#allocation7 + $0xcc] ss:$16 sps:$4 sm:$0xff]   ;;  %v10348_v41 = vpack.c.bf16 %v157_v13, %v151_v39  ;;  %v8984_v39 = vld [vmem:[#allocation7 + $0x500] ss:$16 sps:$4 sm:$0xff]   ;;  %v8987_v13 = vld [vmem:[#allocation7 + $0x108] ss:$16 sps:$4 sm:$0xff]  }
 0x133   :  { %2795 = vmatprep.subr.bf16.mxu1 %v8827_v42  ;;  %v8900_v42 = vld [vmem:[#allocation7 + $0x4c0] ss:$16 sps:$4 sm:$0xff]  }
 0x135   :  { %2753 = vmatpush1.bf16.msra.mxu0 %v8822_v43  ;;  %v8903_v43 = vld [vmem:[#allocation7 + $0xc8] ss:$16 sps:$4 sm:$0xff]  }
 0x136   :  { %2796 = vmatpush1.bf16.msra.mxu1 %v8825_v44  ;;  %2754 = vmatprep.subr.bf16.mxu0 %v8830_v45  ;;  %v8908_v44 = vld [vmem:[#allocation7 + $0x4a4] ss:$16 sps:$4 sm:$0xff]   ;;  %v8911_v45 = vld [vmem:[#allocation7 + $0xac] ss:$16 sps:$4 sm:$0xff]  }
 0x137   :  { %2797 = vmatprep.subr.bf16.mxu1 %v8833_v46  ;;  %v8906_v46 = vld [vmem:[#allocation7 + $0x4a0] ss:$16 sps:$4 sm:$0xff]  }
 0x139   :  { %2755 = vmatpush1.bf16.msra.mxu0 %v8828_v47  ;;  %v8909_v47 = vld [vmem:[#allocation7 + $0xa8] ss:$16 sps:$4 sm:$0xff]  }
 0x13a   :  { %2798 = vmatpush1.bf16.msra.mxu1 %v8831_v48  ;;  %2756 = vmatprep.subr.bf16.mxu0 %v8836_v49  ;;  %v8914_v48 = vld [vmem:[#allocation7 + $0x484] ss:$16 sps:$4 sm:$0xff]   ;;  %v8917_v49 = vld [vmem:[#allocation7 + $0x8c] ss:$16 sps:$4 sm:$0xff]  }
 0x13b   :  { %2799 = vmatprep.subr.bf16.mxu1 %v8839_v50  ;;  %v8912_v50 = vld [vmem:[#allocation7 + $0x480] ss:$16 sps:$4 sm:$0xff]  }
 0x13d   :  { %2757 = vmatpush1.bf16.msra.mxu0 %v8834_v51  ;;  %v8915_v51 = vld [vmem:[#allocation7 + $0x88] ss:$16 sps:$4 sm:$0xff]  }
 0x13e   :  { %2800 = vmatpush1.bf16.msra.mxu1 %v8837_v52  ;;  %2758 = vmatprep.subr.bf16.mxu0 %v8842_v53  ;;  %v8920_v52 = vld [vmem:[#allocation7 + $0x464] ss:$16 sps:$4 sm:$0xff]   ;;  %v8923_v53 = vld [vmem:[#allocation7 + $0x6c] ss:$16 sps:$4 sm:$0xff]  }
 0x13f   :  { %2801 = vmatprep.subr.bf16.mxu1 %v8845_v55  ;;  %v8918_v55 = vld [vmem:[#allocation7 + $0x460] ss:$16 sps:$4 sm:$0xff]  }
 0x141   :  { %2759 = vmatpush1.bf16.msra.mxu0 %v8840_v56  ;;  %v8921_v56 = vld [vmem:[#allocation7 + $0x68] ss:$16 sps:$4 sm:$0xff]  }
 0x142   :  { %2802 = vmatpush1.bf16.msra.mxu1 %v8843_v57  ;;  %2760 = vmatprep.subr.bf16.mxu0 %v8848_v58  ;;  %v8926_v57 = vld [vmem:[#allocation7 + $0x444] ss:$16 sps:$4 sm:$0xff]   ;;  %v8929_v58 = vld [vmem:[#allocation7 + $0x4c] ss:$16 sps:$4 sm:$0xff]  }
 0x143   :  { %2803 = vmatprep.subr.bf16.mxu1 %v8851_v59  ;;  %v8927_v59 = vld [vmem:[#allocation7 + $0x48] ss:$16 sps:$4 sm:$0xff]  }
 0x145   :  { %2761 = vmatpush2.bf16.msra.mxu0 %v8846_v60  ;;  %v8932_v60 = vld [vmem:[#allocation7 + $0x424] ss:$16 sps:$4 sm:$0xff]  }
 0x146   :  { %2804 = vmatpush2.bf16.msra.mxu1 %v8849_v61  ;;  %2762 = vmatprep.subr.bf16.mxu0 %v8854_v62  ;;  %v8935_v61 = vld [vmem:[#allocation7 + $0x2c] ss:$16 sps:$4 sm:$0xff]   ;;  %v8930_v62 = vld [vmem:[#allocation7 + $0x420] ss:$16 sps:$4 sm:$0xff]  }
 0x147   :  { %2805 = vmatprep.subr.bf16.mxu1 %v8857_v63  ;;  %v8933_v63 = vld [vmem:[#allocation7 + $0x28] ss:$16 sps:$4 sm:$0xff]  }
 0x149   :  { %2763 = vmatpush2.bf16.msra.mxu0 %v8852_v0  ;;  %v8938_v0 = vld [vmem:[#allocation7 + $0x404] ss:$16 sps:$4 sm:$0xff]  }
 0x14a   :  { %2806 = vmatpush2.bf16.msra.mxu1 %v8855_v1  ;;  %2764 = vmatprep.subr.bf16.mxu0 %v8860_v2  ;;  %v8941_v1 = vld [vmem:[#allocation7 + $0xc] ss:$16 sps:$4 sm:$0xff]   ;;  %v8936_v2 = vld [vmem:[#allocation7 + $0x400] ss:$16 sps:$4 sm:$0xff]  }
 0x14b   :  { %2807 = vmatprep.subr.bf16.mxu1 %v8863_v3  ;;  %v8939_v3 = vld [vmem:[#allocation7 + $0x8] ss:$16 sps:$4 sm:$0xff]  }
 0x14d   :  { %2765 = vmatpush2.bf16.msra.mxu0 %v8858_v4  ;;  %v8944_v4 = vld [vmem:[#allocation7 + $0x5e4] ss:$16 sps:$4 sm:$0xff]  }
 0x14e   :  { %2808 = vmatpush2.bf16.msra.mxu1 %v8861_v5  ;;  %2766 = vmatprep.subr.bf16.mxu0 %v8866_v6  ;;  %v8947_v5 = vld [vmem:[#allocation7 + $0x1ec] ss:$16 sps:$4 sm:$0xff]   ;;  %v8942_v6 = vld [vmem:[#allocation7 + $0x5e0] ss:$16 sps:$4 sm:$0xff]  }
 0x14f   :  { %2809 = vmatprep.subr.bf16.mxu1 %v8869_v7  ;;  %v8945_v7 = vld [vmem:[#allocation7 + $0x1e8] ss:$16 sps:$4 sm:$0xff]  }
 0x151   :  { %2767 = vmatpush2.bf16.msra.mxu0 %v8864_v8  ;;  %v8950_v8 = vld [vmem:[#allocation7 + $0x5c4] ss:$16 sps:$4 sm:$0xff]  }
 0x152   :  { %2810 = vmatpush2.bf16.msra.mxu1 %v8867_v9  ;;  %2768 = vmatprep.subr.bf16.mxu0 %v8872_v10  ;;  %v8953_v9 = vld [vmem:[#allocation7 + $0x1cc] ss:$16 sps:$4 sm:$0xff]   ;;  %v8948_v10 = vld [vmem:[#allocation7 + $0x5c0] ss:$16 sps:$4 sm:$0xff]  }
 0x153   :  { %2811 = vmatprep.subr.bf16.mxu1 %v8875_v11  ;;  %v8951_v11 = vld [vmem:[#allocation7 + $0x1c8] ss:$16 sps:$4 sm:$0xff]  }
 0x155   :  { %2769 = vmatpush2.bf16.msra.mxu0 %v8870_v14  ;;  %v8956_v14 = vld [vmem:[#allocation7 + $0x5a4] ss:$16 sps:$4 sm:$0xff]  }
 0x156   :  { %2812 = vmatpush2.bf16.msra.mxu1 %v8873_v15  ;;  %2770 = vmatprep.subr.bf16.mxu0 %v8878_v16  ;;  %v8959_v15 = vld [vmem:[#allocation7 + $0x1ac] ss:$16 sps:$4 sm:$0xff]   ;;  %v8954_v16 = vld [vmem:[#allocation7 + $0x5a0] ss:$16 sps:$4 sm:$0xff]  }
 0x157   :  { %2813 = vmatprep.subr.bf16.mxu1 %v8881_v17  ;;  %v8957_v17 = vld [vmem:[#allocation7 + $0x1a8] ss:$16 sps:$4 sm:$0xff]  }
 0x159   :  { %2771 = vmatpush2.bf16.msra.mxu0 %v8876_v18  ;;  %v8962_v18 = vld [vmem:[#allocation7 + $0x584] ss:$16 sps:$4 sm:$0xff]  }
 0x15a   :  { %2814 = vmatpush2.bf16.msra.mxu1 %v8879_v19  ;;  %2772 = vmatprep.subr.bf16.mxu0 %v8884_v20  ;;  %v8965_v19 = vld [vmem:[#allocation7 + $0x18c] ss:$16 sps:$4 sm:$0xff]   ;;  %v8960_v20 = vld [vmem:[#allocation7 + $0x580] ss:$16 sps:$4 sm:$0xff]  }
 0x15b   :  { %2815 = vmatprep.subr.bf16.mxu1 %v8887_v21  ;;  %v8963_v21 = vld [vmem:[#allocation7 + $0x188] ss:$16 sps:$4 sm:$0xff]  }
 0x15d   :  { %2773 = vmatpush2.bf16.msra.mxu0 %v8882_v23  ;;  %v8968_v23 = vld [vmem:[#allocation7 + $0x564] ss:$16 sps:$4 sm:$0xff]  }
 0x15e   :  { %2816 = vmatpush2.bf16.msra.mxu1 %v8885_v24  ;;  %2774 = vmatprep.subr.bf16.mxu0 %v8890_v25  ;;  %v8971_v24 = vld [vmem:[#allocation7 + $0x16c] ss:$16 sps:$4 sm:$0xff]   ;;  %v8966_v25 = vld [vmem:[#allocation7 + $0x560] ss:$16 sps:$4 sm:$0xff]  }
 0x15f   :  { %2817 = vmatprep.subr.bf16.mxu1 %v8893_v26  ;;  %v8969_v26 = vld [vmem:[#allocation7 + $0x168] ss:$16 sps:$4 sm:$0xff]  }
 0x161   :  { %2775 = vmatpush2.bf16.msra.mxu0 %v8888_v27  ;;  %v8974_v27 = vld [vmem:[#allocation7 + $0x544] ss:$16 sps:$4 sm:$0xff]  }
 0x162   :  { %2818 = vmatpush2.bf16.msra.mxu1 %v8891_v28  ;;  %2830 = vmatprep.subr.bf16.mxu0 %v8896_v34  ;;  %v8977_v28 = vld [vmem:[#allocation7 + $0x14c] ss:$16 sps:$4 sm:$0xff]   ;;  %v8978_v34 = vld [vmem:[#allocation7 + $0x520] ss:$16 sps:$4 sm:$0xff]  }
 0x163   :  { %2873 = vmatprep.subr.bf16.mxu1 %v8899_v35  ;;  %v8981_v35 = vld [vmem:[#allocation7 + $0x128] ss:$16 sps:$4 sm:$0xff]  }
 0x164   :  { %2777 = vmatmul.mubr.bf16.vlgmr.msra.gmra.mxu0 %v10344_v38 }
 0x165   :  { %2820 = vmatmul.mubr.bf16.vlgmr.msra.gmra.mxu1 %v10346_v54  ;;  %2831 = vmatpush1.bf16.msra.mxu0 %v8894_v36  ;;  %v8986_v36 = vld [vmem:[#allocation7 + $0x504] ss:$16 sps:$4 sm:$0xff]  }
 0x166   :  { %2874 = vmatpush1.bf16.msra.mxu1 %v8897_v37  ;;  %2832 = vmatprep.subr.bf16.mxu0 %v8902_v22  ;;  %v8989_v37 = vld [vmem:[#allocation7 + $0x10c] ss:$16 sps:$4 sm:$0xff]   ;;  %v150_v22 = vld [vmem:[#allocation2 + $0x20] sm:$0xff] }
 0x167   :  { %2875 = vmatprep.subr.bf16.mxu1 %v8905_v40  ;;  %2862 = vmatprep.mubr.bf16.mxu0 %v10348_v41  ;;  %v156_v40 = vld [vmem:[#allocation2 + $0x50] sm:$0xff] }
 0x168   :  { %2905 = vmatprep.mubr.bf16.mxu1 %v10336_v33  ;;  %v8924_v33 = vld [vmem:[#allocation7 + $0x440] ss:$16 sps:$4 sm:$0xff]  }
 0x169   :  { %2833 = vmatpush1.bf16.msra.mxu0 %v8900_v42  ;;  %v8992_v42 = vld [vmem:[#allocation7 + $0x2ec] ss:$16 sps:$4 sm:$0xff]  }
 0x16a   :  { %2876 = vmatpush1.bf16.msra.mxu1 %v8903_v43  ;;  %2834 = vmatprep.subr.bf16.mxu0 %v8908_v44  ;;  %v8995_v43 = vld [vmem:[#allocation7 + $0x4ec] ss:$16 sps:$4 sm:$0xff]   ;;  %v8990_v44 = vld [vmem:[#allocation7 + $0x2e8] ss:$16 sps:$4 sm:$0xff]  }
 0x16b   :  { %2877 = vmatprep.subr.bf16.mxu1 %v8911_v45  ;;  %v8993_v45 = vld [vmem:[#allocation7 + $0x4e8] ss:$16 sps:$4 sm:$0xff]  }
 0x16d   :  { %2835 = vmatpush1.bf16.msra.mxu0 %v8906_v46  ;;  %v10354_v46 = vpack.c.bf16 %v156_v40, %v150_v22  ;;  %v9068_v22 = vld [vmem:[#allocation7 + $0x348] ss:$16 sps:$4 sm:$0xff]  }
 0x16e   :  { %2878 = vmatpush1.bf16.msra.mxu1 %v8909_v47  ;;  %2836 = vmatprep.subr.bf16.mxu0 %v8914_v48  ;;  %v8998_v47 = vld [vmem:[#allocation7 + $0x2cc] ss:$16 sps:$4 sm:$0xff]   ;;  %v9071_v40 = vld [vmem:[#allocation7 + $0x548] ss:$16 sps:$4 sm:$0xff]  }
 0x16f   :  { %2879 = vmatprep.subr.bf16.mxu1 %v8917_v49  ;;  %v9001_v48 = vld [vmem:[#allocation7 + $0x4cc] ss:$16 sps:$4 sm:$0xff]   ;;  %v8996_v49 = vld [vmem:[#allocation7 + $0x2c8] ss:$16 sps:$4 sm:$0xff]  }
 0x171   :  { %2837 = vmatpush1.bf16.msra.mxu0 %v8912_v50  ;;  %v8999_v50 = vld [vmem:[#allocation7 + $0x4c8] ss:$16 sps:$4 sm:$0xff]  }
 0x172   :  { %2880 = vmatpush1.bf16.msra.mxu1 %v8915_v51  ;;  %2838 = vmatprep.subr.bf16.mxu0 %v8920_v52  ;;  %v9004_v51 = vld [vmem:[#allocation7 + $0x2ac] ss:$16 sps:$4 sm:$0xff]  }
 0x173   :  { %2881 = vmatprep.subr.bf16.mxu1 %v8923_v53  ;;  %v9007_v52 = vld [vmem:[#allocation7 + $0x4ac] ss:$16 sps:$4 sm:$0xff]   ;;  %v9002_v53 = vld [vmem:[#allocation7 + $0x2a8] ss:$16 sps:$4 sm:$0xff]  }
 0x175   :  { %2839 = vmatpush1.bf16.msra.mxu0 %v8918_v55  ;;  %v9005_v55 = vld [vmem:[#allocation7 + $0x4a8] ss:$16 sps:$4 sm:$0xff]  }
 0x176   :  { %2882 = vmatpush1.bf16.msra.mxu1 %v8921_v56  ;;  %2840 = vmatprep.subr.bf16.mxu0 %v8926_v57  ;;  %v9010_v56 = vld [vmem:[#allocation7 + $0x28c] ss:$16 sps:$4 sm:$0xff]  }
 0x177   :  { %2883 = vmatprep.subr.bf16.mxu1 %v8929_v58  ;;  %v9013_v57 = vld [vmem:[#allocation7 + $0x48c] ss:$16 sps:$4 sm:$0xff]   ;;  %v9011_v58 = vld [vmem:[#allocation7 + $0x488] ss:$16 sps:$4 sm:$0xff]  }
 0x179   :  { %2841 = vmatpush1.bf16.msra.mxu0 %v8924_v33  ;;  %v9016_v33 = vld [vmem:[#allocation7 + $0x26c] ss:$16 sps:$4 sm:$0xff]  }
 0x17a   :  { %2884 = vmatpush1.bf16.msra.mxu1 %v8927_v59  ;;  %2842 = vmatprep.subr.bf16.mxu0 %v8932_v60  ;;  %v9019_v59 = vld [vmem:[#allocation7 + $0x46c] ss:$16 sps:$4 sm:$0xff]   ;;  %v9014_v60 = vld [vmem:[#allocation7 + $0x268] ss:$16 sps:$4 sm:$0xff]  }
 0x17b   :  { %2885 = vmatprep.subr.bf16.mxu1 %v8935_v61  ;;  %v9022_v61 = vld [vmem:[#allocation7 + $0x24c] ss:$16 sps:$4 sm:$0xff]  }
 0x17d   :  { %2843 = vmatpush1.bf16.msra.mxu0 %v8930_v62  ;;  %v9020_v62 = vld [vmem:[#allocation7 + $0x248] ss:$16 sps:$4 sm:$0xff]  }
 0x17e   :  { %2886 = vmatpush1.bf16.msra.mxu1 %v8933_v63  ;;  %2844 = vmatprep.subr.bf16.mxu0 %v8938_v0  ;;  %v9023_v63 = vld [vmem:[#allocation7 + $0x448] ss:$16 sps:$4 sm:$0xff]   ;;  %v9028_v0 = vld [vmem:[#allocation7 + $0x22c] ss:$16 sps:$4 sm:$0xff]  }
 0x17f   :  { %2887 = vmatprep.subr.bf16.mxu1 %v8941_v1  ;;  %v9031_v1 = vld [vmem:[#allocation7 + $0x42c] ss:$16 sps:$4 sm:$0xff]  }
 0x181   :  { %2845 = vmatpush1.bf16.msra.mxu0 %v8936_v2  ;;  %v9026_v2 = vld [vmem:[#allocation7 + $0x228] ss:$16 sps:$4 sm:$0xff]  }
 0x182   :  { %2888 = vmatpush1.bf16.msra.mxu1 %v8939_v3  ;;  %2846 = vmatprep.subr.bf16.mxu0 %v8944_v4  ;;  %v9029_v3 = vld [vmem:[#allocation7 + $0x428] ss:$16 sps:$4 sm:$0xff]   ;;  %v9034_v4 = vld [vmem:[#allocation7 + $0x20c] ss:$16 sps:$4 sm:$0xff]  }
 0x183   :  { %2889 = vmatprep.subr.bf16.mxu1 %v8947_v5  ;;  %v9037_v5 = vld [vmem:[#allocation7 + $0x40c] ss:$16 sps:$4 sm:$0xff]  }
 0x185   :  { %2847 = vmatpush2.bf16.msra.mxu0 %v8942_v6  ;;  %v9032_v6 = vld [vmem:[#allocation7 + $0x208] ss:$16 sps:$4 sm:$0xff]  }
 0x186   :  { %2890 = vmatpush2.bf16.msra.mxu1 %v8945_v7  ;;  %2848 = vmatprep.subr.bf16.mxu0 %v8950_v8  ;;  %v9035_v7 = vld [vmem:[#allocation7 + $0x408] ss:$16 sps:$4 sm:$0xff]   ;;  %v9040_v8 = vld [vmem:[#allocation7 + $0x3ec] ss:$16 sps:$4 sm:$0xff]  }
 0x187   :  { %2891 = vmatprep.subr.bf16.mxu1 %v8953_v9  ;;  %v9043_v9 = vld [vmem:[#allocation7 + $0x5ec] ss:$16 sps:$4 sm:$0xff]  }
 0x189   :  { %2849 = vmatpush2.bf16.msra.mxu0 %v8948_v10  ;;  %v9038_v10 = vld [vmem:[#allocation7 + $0x3e8] ss:$16 sps:$4 sm:$0xff]  }
 0x18a   :  { %2892 = vmatpush2.bf16.msra.mxu1 %v8951_v11  ;;  %2850 = vmatprep.subr.bf16.mxu0 %v8956_v14  ;;  %v9041_v11 = vld [vmem:[#allocation7 + $0x5e8] ss:$16 sps:$4 sm:$0xff]   ;;  %v9046_v14 = vld [vmem:[#allocation7 + $0x3cc] ss:$16 sps:$4 sm:$0xff]  }
 0x18b   :  { %2893 = vmatprep.subr.bf16.mxu1 %v8959_v15  ;;  %v9049_v15 = vld [vmem:[#allocation7 + $0x5cc] ss:$16 sps:$4 sm:$0xff]  }
 0x18d   :  { %2851 = vmatpush2.bf16.msra.mxu0 %v8954_v16  ;;  %v9044_v16 = vld [vmem:[#allocation7 + $0x3c8] ss:$16 sps:$4 sm:$0xff]  }
 0x18e   :  { %2894 = vmatpush2.bf16.msra.mxu1 %v8957_v17  ;;  %2852 = vmatprep.subr.bf16.mxu0 %v8962_v18  ;;  %v9047_v17 = vld [vmem:[#allocation7 + $0x5c8] ss:$16 sps:$4 sm:$0xff]   ;;  %v9052_v18 = vld [vmem:[#allocation7 + $0x3ac] ss:$16 sps:$4 sm:$0xff]  }
 0x18f   :  { %2895 = vmatprep.subr.bf16.mxu1 %v8965_v19  ;;  %v9055_v19 = vld [vmem:[#allocation7 + $0x5ac] ss:$16 sps:$4 sm:$0xff]  }
 0x191   :  { %2853 = vmatpush2.bf16.msra.mxu0 %v8960_v20  ;;  %v9050_v20 = vld [vmem:[#allocation7 + $0x3a8] ss:$16 sps:$4 sm:$0xff]  }
 0x192   :  { %2896 = vmatpush2.bf16.msra.mxu1 %v8963_v21  ;;  %2854 = vmatprep.subr.bf16.mxu0 %v8968_v23  ;;  %v9053_v21 = vld [vmem:[#allocation7 + $0x5a8] ss:$16 sps:$4 sm:$0xff]   ;;  %v10360_v23 = vpop.f32.mrf.mxu0 }
 0x193   :  { %2897 = vmatprep.subr.bf16.mxu1 %v8971_v24  ;;  %v10362_v24 = vpop.f32.mrf.mxu1 }
 0x195   :  { %2855 = vmatpush2.bf16.msra.mxu0 %v8966_v25  ;;  %v9058_v25 = vld [vmem:[#allocation7 + $0x38c] ss:$16 sps:$4 sm:$0xff]  }
 0x196   :  { %2898 = vmatpush2.bf16.msra.mxu1 %v8969_v26  ;;  %2856 = vmatprep.subr.bf16.mxu0 %v8974_v27  ;;  %v9061_v26 = vld [vmem:[#allocation7 + $0x58c] ss:$16 sps:$4 sm:$0xff]   ;;  %v9056_v27 = vld [vmem:[#allocation7 + $0x388] ss:$16 sps:$4 sm:$0xff]  }
 0x197   :  { %2899 = vmatprep.subr.bf16.mxu1 %v8977_v28  ;;  %v9059_v28 = vld [vmem:[#allocation7 + $0x588] ss:$16 sps:$4 sm:$0xff]  }
 0x199   :  { %2857 = vmatpush2.bf16.msra.mxu0 %v8972_v29  ;;  %v10364_v29 = vpop.f32.mrf.mxu0 }
 0x19a   :  { %2900 = vmatpush2.bf16.msra.mxu1 %v8975_v30  ;;  %2858 = vmatprep.subr.bf16.mxu0 %v8980_v31  ;;  %v10366_v30 = vpop.f32.mrf.mxu1  ;;  %v9064_v31 = vld [vmem:[#allocation7 + $0x36c] ss:$16 sps:$4 sm:$0xff]  }
 0x19b   :  { %2901 = vmatprep.subr.bf16.mxu1 %v8983_v32  ;;  %v9067_v32 = vld [vmem:[#allocation7 + $0x56c] ss:$16 sps:$4 sm:$0xff]  }
 0x19d   :  { %2859 = vmatpush2.bf16.msra.mxu0 %v8978_v34  ;;  %v9062_v34 = vld [vmem:[#allocation7 + $0x368] ss:$16 sps:$4 sm:$0xff]  }
 0x19e   :  { %2902 = vmatpush2.bf16.msra.mxu1 %v8981_v35  ;;  %2860 = vmatprep.subr.bf16.mxu0 %v8986_v36  ;;  %v9065_v35 = vld [vmem:[#allocation7 + $0x568] ss:$16 sps:$4 sm:$0xff]   ;;  %v10368_v36 = vpop.f32.mrf.mxu0 }
 0x19f   :  { %2903 = vmatprep.subr.bf16.mxu1 %v8989_v37  ;;  %v10370_v37 = vpop.f32.mrf.mxu1 }
 0x1a1   :  { %2861 = vmatpush2.bf16.msra.mxu0 %v8984_v39  ;;  %v9070_v39 = vld [vmem:[#allocation7 + $0x34c] ss:$16 sps:$4 sm:$0xff]  }
 0x1a2   :  { %2904 = vmatpush2.bf16.msra.mxu1 %v8987_v13  ;;  %2916 = vmatprep.subr.bf16.mxu0 %v8992_v42  ;;  %v9073_v13 = vld [vmem:[#allocation7 + $0x54c] ss:$16 sps:$4 sm:$0xff]   ;;  %v10372_v42 = vpop.f32.mrf.mxu0 }
 0x1a3   :  { %2959 = vmatprep.subr.bf16.mxu1 %v8995_v43  ;;  %v10374_v43 = vpop.f32.mrf.mxu1 }
 0x1a4   :  { %2863 = vmatmul.mubr.bf16.vlgmr.msra.gmra.mxu0 %v10354_v46 }
 0x1a5   :  { %2906 = vmatmul.mubr.bf16.vlgmr.msra.gmra.mxu1 %v10344_v38  ;;  %2917 = vmatpush1.bf16.msra.mxu0 %v8990_v44  ;;  %v9008_v38 = vld [vmem:[#allocation7 + $0x288] ss:$16 sps:$4 sm:$0xff]   ;;  %v9076_v44 = vld [vmem:[#allocation7 + $0x32c] ss:$16 sps:$4 sm:$0xff]  }
 0x1a6   :  { %2960 = vmatpush1.bf16.msra.mxu1 %v8993_v45  ;;  %2918 = vmatprep.subr.bf16.mxu0 %v8998_v47  ;;  %v9079_v45 = vld [vmem:[#allocation7 + $0x52c] ss:$16 sps:$4 sm:$0xff]   ;;  %v10376_v47 = vpop.f32.mrf.mxu0 }
 0x1a7   :  { %2961 = vmatprep.subr.bf16.mxu1 %v9001_v48  ;;  %2948 = vmatprep.mubr.bf16.mxu0 %v10338_v12  ;;  %v9017_v12 = vld [vmem:[#allocation7 + $0x468] ss:$16 sps:$4 sm:$0xff]   ;;  %v1689_v48 = vpop.f32.mrf.mxu1 }
 0x1a8   :  { %2991 = vmatprep.mubr.bf16.mxu1 %v10348_v41  ;;  %v9025_v41 = vld [vmem:[#allocation7 + $0x44c] ss:$16 sps:$4 sm:$0xff]  }
 0x1a9   :  { %2919 = vmatpush1.bf16.msra.mxu0 %v8996_v49  ;;  %v9074_v49 = vld [vmem:[#allocation7 + $0x328] ss:$16 sps:$4 sm:$0xff]  }
 0x1aa   :  { %2962 = vmatpush1.bf16.msra.mxu1 %v8999_v50  ;;  %2920 = vmatprep.subr.bf16.mxu0 %v9004_v51  ;;  %v9077_v50 = vld [vmem:[#allocation7 + $0x528] ss:$16 sps:$4 sm:$0xff]   ;;  %v9082_v51 = vld [vmem:[#allocation7 + $0x30c] ss:$16 sps:$4 sm:$0xff]  }
 0x1ab   :  { %2963 = vmatprep.subr.bf16.mxu1 %v9007_v52  ;;  %v9085_v52 = vld [vmem:[#allocation7 + $0x50c] ss:$16 sps:$4 sm:$0xff]  }
 0x1ad   :  { %2921 = vmatpush1.bf16.msra.mxu0 %v9002_v53  ;;  %v10378_v53 = vpop.f32.mrf.mxu0 }
 0x1ae   :  { %2964 = vmatpush1.bf16.msra.mxu1 %v9005_v55  ;;  %2922 = vmatprep.subr.bf16.mxu0 %v9010_v56  ;;  %v1691_v55 = vpop.f32.mrf.mxu1  ;;  %v9080_v56 = vld [vmem:[#allocation7 + $0x308] ss:$16 sps:$4 sm:$0xff]  }
 0x1af   :  { %2965 = vmatprep.subr.bf16.mxu1 %v9013_v57  ;;  %v9083_v57 = vld [vmem:[#allocation7 + $0x508] ss:$16 sps:$4 sm:$0xff]  }
 0x1b1   :  { %2923 = vmatpush1.bf16.msra.mxu0 %v9008_v38  ;;  %v9088_v38 = vld [vmem:[#allocation11 + $0x154] ss:$24 sps:$4 sm:$0xff]  }
 0x1b2   :  { %2966 = vmatpush1.bf16.msra.mxu1 %v9011_v58  ;;  %2924 = vmatprep.subr.bf16.mxu0 %v9016_v33  ;;  %v10380_v58 = vpop.f32.mrf.mxu0  ;;  %v1693_v33 = vpop.f32.mrf.mxu1 }
 0x1b3   :  { %2967 = vmatprep.subr.bf16.mxu1 %v9019_v59  ;;  %v9086_v59 = vld [vmem:[#allocation11 + $0x150] ss:$24 sps:$4 sm:$0xff]  }
 0x1b5   :  { %2925 = vmatpush1.bf16.msra.mxu0 %v9014_v60  ;;  %v9091_v60 = vld [vmem:[#allocation11 + $0x124] ss:$24 sps:$4 sm:$0xff]  }
 0x1b6   :  { %2968 = vmatpush1.bf16.msra.mxu1 %v9017_v12  ;;  %2926 = vmatprep.subr.bf16.mxu0 %v9022_v61  ;;  %v10382_v12 = vpop.f32.mrf.mxu0  ;;  %v1695_v61 = vpop.f32.mrf.mxu1 }
 0x1b7   :  { %2969 = vmatprep.subr.bf16.mxu1 %v9025_v41 }
 0x1b9   :  { %2927 = vmatpush1.bf16.msra.mxu0 %v9020_v62 }
 0x1ba   :  { %2970 = vmatpush1.bf16.msra.mxu1 %v9023_v63  ;;  %2928 = vmatprep.subr.bf16.mxu0 %v9028_v0  ;;  %v9089_v63 = vld [vmem:[#allocation11 + $0x120] ss:$24 sps:$4 sm:$0xff]   ;;  %v9094_v0 = vld [vmem:[#allocation11 + $0xf4] ss:$24 sps:$4 sm:$0xff]  }
 0x1bb   :  { %2971 = vmatprep.subr.bf16.mxu1 %v9031_v1 }
 0x1bd   :  { %2929 = vmatpush1.bf16.msra.mxu0 %v9026_v2 }
 0x1be   :  { %2972 = vmatpush1.bf16.msra.mxu1 %v9029_v3  ;;  %2930 = vmatprep.subr.bf16.mxu0 %v9034_v4 }
 0x1bf   :  { %2973 = vmatprep.subr.bf16.mxu1 %v9037_v5 }
 0x1c1   :  { %2931 = vmatpush1.bf16.msra.mxu0 %v9032_v6 }
 0x1c2   :  { %2974 = vmatpush1.bf16.msra.mxu1 %v9035_v7  ;;  %2932 = vmatprep.subr.bf16.mxu0 %v9040_v8  ;;  %v9092_v8 = vld [vmem:[#allocation11 + $0xf0] ss:$24 sps:$4 sm:$0xff]  }
 0x1c3   :  { %2975 = vmatprep.subr.bf16.mxu1 %v9043_v9 }
 0x1c5   :  { %2933 = vmatpush2.bf16.msra.mxu0 %v9038_v10 }
 0x1c6   :  { %2976 = vmatpush2.bf16.msra.mxu1 %v9041_v11  ;;  %2934 = vmatprep.subr.bf16.mxu0 %v9046_v14 }
 0x1c7   :  { %2977 = vmatprep.subr.bf16.mxu1 %v9049_v15 }
 0x1c9   :  { %2935 = vmatpush2.bf16.msra.mxu0 %v9044_v16  ;;  %v9095_v16 = vld [vmem:[#allocation11 + $0xc0] ss:$24 sps:$4 sm:$0xff]  }
 0x1ca   :  { %2978 = vmatpush2.bf16.msra.mxu1 %v9047_v17  ;;  %2936 = vmatprep.subr.bf16.mxu0 %v9052_v18  ;;  %v9100_v18 = vld [vmem:[#allocation11 + $0x94] ss:$24 sps:$4 sm:$0xff]  }
 0x1cb   :  { %2979 = vmatprep.subr.bf16.mxu1 %v9055_v19  ;;  %v9098_v19 = vld [vmem:[#allocation11 + $0x90] ss:$24 sps:$4 sm:$0xff]  }
 0x1cd   :  { %2937 = vmatpush2.bf16.msra.mxu0 %v9050_v20  ;;  %v9103_v20 = vld [vmem:[#allocation11 + $0x64] ss:$24 sps:$4 sm:$0xff]  }
 0x1ce   :  { %2980 = vmatpush2.bf16.msra.mxu1 %v9053_v21  ;;  %2938 = vmatprep.subr.bf16.mxu0 %v9058_v25  ;;  %v9101_v21 = vld [vmem:[#allocation11 + $0x60] ss:$24 sps:$4 sm:$0xff]   ;;  %v9106_v25 = vld [vmem:[#allocation11 + $0x34] ss:$24 sps:$4 sm:$0xff]  }
 0x1cf   :  { %2981 = vmatprep.subr.bf16.mxu1 %v9061_v26  ;;  %v9104_v26 = vld [vmem:[#allocation11 + $0x30] ss:$24 sps:$4 sm:$0xff]  }
 0x1d1   :  { %2939 = vmatpush2.bf16.msra.mxu0 %v9056_v27  ;;  %v9109_v27 = vld [vmem:[#allocation11 + $0x4] ss:$24 sps:$4 sm:$0xff]  }
 0x1d2   :  { %2982 = vmatpush2.bf16.msra.mxu1 %v9059_v28  ;;  %2940 = vmatprep.subr.bf16.mxu0 %v9064_v31  ;;  %v9107_v28 = vld [vmem:[#allocation11] ss:$24 sps:$4 sm:$0xff]   ;;  %v9112_v31 = vld [vmem:[#allocation11 + $0x2d4] ss:$24 sps:$4 sm:$0xff]  }
 0x1d3   :  { %2983 = vmatprep.subr.bf16.mxu1 %v9067_v32  ;;  %v9110_v32 = vld [vmem:[#allocation11 + $0x2d0] ss:$24 sps:$4 sm:$0xff]  }
 0x1d5   :  { %2941 = vmatpush2.bf16.msra.mxu0 %v9062_v34  ;;  %v9115_v34 = vld [vmem:[#allocation11 + $0x2a4] ss:$24 sps:$4 sm:$0xff]  }
 0x1d6   :  { %2984 = vmatpush2.bf16.msra.mxu1 %v9065_v35  ;;  %2942 = vmatprep.subr.bf16.mxu0 %v9070_v39  ;;  %v9113_v35 = vld [vmem:[#allocation11 + $0x2a0] ss:$24 sps:$4 sm:$0xff]   ;;  %v9118_v39 = vld [vmem:[#allocation11 + $0x274] ss:$24 sps:$4 sm:$0xff]  }
 0x1d7   :  { %2985 = vmatprep.subr.bf16.mxu1 %v9073_v13  ;;  %v9139_v13 = vld [vmem:[#allocation11 + $0x454] ss:$24 sps:$4 sm:$0xff]  }
 0x1d9   :  { %2943 = vmatpush2.bf16.msra.mxu0 %v9068_v22  ;;  %v9116_v22 = vld [vmem:[#allocation11 + $0x270] ss:$24 sps:$4 sm:$0xff]  }
 0x1da   :  { %2986 = vmatpush2.bf16.msra.mxu1 %v9071_v40  ;;  %2944 = vmatprep.subr.bf16.mxu0 %v9076_v44  ;;  %v9121_v40 = vld [vmem:[#allocation11 + $0x244] ss:$24 sps:$4 sm:$0xff]   ;;  %v9137_v44 = vld [vmem:[#allocation11 + $0x450] ss:$24 sps:$4 sm:$0xff]  }
 0x1db   :  { %2987 = vmatprep.subr.bf16.mxu1 %v9079_v45  ;;  %v9145_v45 = vld [vmem:[#allocation11 + $0x424] ss:$24 sps:$4 sm:$0xff]  }
 0x1dd   :  { %2945 = vmatpush2.bf16.msra.mxu0 %v9074_v49  ;;  %v9124_v49 = vld [vmem:[#allocation11 + $0x214] ss:$24 sps:$4 sm:$0xff]  }
 0x1de   :  { %2988 = vmatpush2.bf16.msra.mxu1 %v9077_v50  ;;  %2946 = vmatprep.subr.bf16.mxu0 %v9082_v51  ;;  %v9143_v50 = vld [vmem:[#allocation11 + $0x420] ss:$24 sps:$4 sm:$0xff]   ;;  %v9151_v51 = vld [vmem:[#allocation11 + $0x3f4] ss:$24 sps:$4 sm:$0xff]  }
 0x1df   :  { %2989 = vmatprep.subr.bf16.mxu1 %v9085_v52  ;;  %v9122_v52 = vld [vmem:[#allocation11 + $0x210] ss:$24 sps:$4 sm:$0xff]  }
 0x1e1   :  { %2947 = vmatpush2.bf16.msra.mxu0 %v9080_v56  ;;  %v9149_v56 = vld [vmem:[#allocation11 + $0x3f0] ss:$24 sps:$4 sm:$0xff]  }
 0x1e2   :  { %2990 = vmatpush2.bf16.msra.mxu1 %v9083_v57  ;;  %4260 = vmatprep.subr.bf16.mxu0 %v9088_v38  ;;  %v9157_v57 = vld [vmem:[#allocation11 + $0x3c4] ss:$24 sps:$4 sm:$0xff]   ;;  %v9125_v38 = vld [vmem:[#allocation11 + $0x1e0] ss:$24 sps:$4 sm:$0xff]  }
 0x1e3   :  { %4303 = vmatprep.subr.bf16.mxu1 %v9139_v13  ;;  %v1604_v13 = vadd.f32 %v10362_v24, %v10360_v23 }
 0x1e4   :  { %v1732_v41 = vpop.f32.mrf.mxu0  ;;  %2949 = vmatmul.mubr.bf16.vlgmr.msra.gmra.mxu0 %v10346_v54  ;;  %v9097_v54 = vld [vmem:[#allocation11 + $0xc4] ss:$24 sps:$4 sm:$0xff]  }
 0x1e5   :  { %v1775_v62 = vpop.f32.mrf.mxu1  ;;  %2992 = vmatmul.mubr.bf16.vlgmr.msra.gmra.mxu1 %v10354_v46  ;;  %v1733_v1 = vadd.f32 %v1732_v41, %v1689_v48  ;;  %4261 = vmatpush1.bf16.msra.mxu0 %v9086_v59  ;;  %v9119_v48 = vld [vmem:[#allocation11 + $0x240] ss:$24 sps:$4 sm:$0xff]   ;;  %v9133_v41 = vld [vmem:[#allocation11 + $0x184] ss:$24 sps:$4 sm:$0xff]  }
 0x1e6   :  { %v1734_v2 = vpop.f32.mrf.mxu0  ;;  %4262 = vmatprep.subr.bf16.mxu0 %v9091_v60  ;;  %4304 = vmatpush1.bf16.msra.mxu1 %v9137_v44  ;;  %v9155_v59 = vld [vmem:[#allocation11 + $0x3c0] ss:$24 sps:$4 sm:$0xff]   ;;  %v9163_v60 = vld [vmem:[#allocation11 + $0x394] ss:$24 sps:$4 sm:$0xff]   ;;  %v1647_v44 = vadd.f32 %v10376_v47, %v1604_v13 }
 0x1e7   :  { %v1777_v3 = vpop.f32.mrf.mxu1  ;;  %v10386_v4 = vadd.f32 %v1775_v62, %v1733_v1  ;;  %v1735_v5 = vadd.f32 %v1734_v2, %v1691_v55  ;;  %4305 = vmatprep.subr.bf16.mxu1 %v9145_v45  ;;  %v9127_v55 = vld [vmem:[#allocation11 + $0x1e4] ss:$24 sps:$4 sm:$0xff]   ;;  %v9161_v62 = vld [vmem:[#allocation11 + $0x390] ss:$24 sps:$4 sm:$0xff]   ;;  %v9167_v2 = vld [vmem:[#allocation11 + $0x360] ss:$24 sps:$4 sm:$0xff]  }
 0x1e8   :  { %v1736_v6 = vpop.f32.mrf.mxu0  ;;  %v9136_v1 = vld [vmem:[#allocation11 + $0x15c] ss:$24 sps:$4 sm:$0xff]  }
 0x1e9   :  { %v1779_v7 = vpop.f32.mrf.mxu1  ;;  %v10388_v9 = vadd.f32 %v1777_v3, %v1735_v5  ;;  %v1737_v10 = vadd.f32 %v1736_v6, %v1693_v33  ;;  %4263 = vmatpush1.bf16.msra.mxu0 %v9089_v63  ;;  %v9130_v33 = vld [vmem:[#allocation11 + $0x1b4] ss:$24 sps:$4 sm:$0xff]   ;;  %v9169_v63 = vld [vmem:[#allocation11 + $0x364] ss:$24 sps:$4 sm:$0xff]   ;;  %v9173_v5 = vld [vmem:[#allocation11 + $0x330] ss:$24 sps:$4 sm:$0xff]  }
 0x1ea   :  { %v1738_v11 = vpop.f32.mrf.mxu0  ;;  %4264 = vmatprep.subr.bf16.mxu0 %v9094_v0  ;;  %4306 = vmatpush1.bf16.msra.mxu1 %v9143_v50  ;;  %v9131_v0 = vld [vmem:[#allocation11 + $0x180] ss:$24 sps:$4 sm:$0xff]   ;;  %v9175_v3 = vld [vmem:[#allocation11 + $0x334] ss:$24 sps:$4 sm:$0xff]   ;;  %v9181_v6 = vld [vmem:[#allocation11 + $0x304] ss:$24 sps:$4 sm:$0xff]  }
 0x1eb   :  { %v10390_v46 = vadd.f32 %v1779_v7, %v1737_v10  ;;  %v1739_v14 = vadd.f32 %v1738_v11, %v1695_v61  ;;  %v1781_v15 = vpop.f32.mrf.mxu1  ;;  %4307 = vmatprep.subr.bf16.mxu1 %v9151_v51  ;;  %v9128_v61 = vld [vmem:[#allocation11 + $0x1b0] ss:$24 sps:$4 sm:$0xff]   ;;  %v9179_v7 = vld [vmem:[#allocation11 + $0x300] ss:$24 sps:$4 sm:$0xff]  }
 0x1ec   :  { %v9185_v10 = vld [vmem:[#allocation11 + $0x5d0] ss:$24 sps:$4 sm:$0xff]   ;;  %v9191_v11 = vld [vmem:[#allocation11 + $0x5a0] ss:$24 sps:$4 sm:$0xff]  }
 0x1ed   :  { %v10392_v17 = vadd.f32 %v1781_v15, %v1739_v14  ;;  %4265 = vmatpush1.bf16.msra.mxu0 %v9092_v8  ;;  %v9187_v8 = vld [vmem:[#allocation11 + $0x5d4] ss:$24 sps:$4 sm:$0xff]   ;;  %v9197_v15 = vld [vmem:[#allocation11 + $0x570] ss:$24 sps:$4 sm:$0xff]  }
 0x1ee   :  { %4266 = vmatprep.subr.bf16.mxu0 %v9097_v54  ;;  %4308 = vmatpush1.bf16.msra.mxu1 %v9149_v56  ;;  %v9193_v54 = vld [vmem:[#allocation11 + $0x5a4] ss:$24 sps:$4 sm:$0xff]   ;;  %v9199_v14 = vld [vmem:[#allocation11 + $0x574] ss:$24 sps:$4 sm:$0xff]  }
 0x1ef   :  { %4309 = vmatprep.subr.bf16.mxu1 %v9157_v57 }
 0x1f1   :  { %4267 = vmatpush1.bf16.msra.mxu0 %v9095_v16  ;;  %v9205_v16 = vld [vmem:[#allocation11 + $0x544] ss:$24 sps:$4 sm:$0xff]  }
 0x1f2   :  { %4268 = vmatprep.subr.bf16.mxu0 %v9100_v18  ;;  %4310 = vmatpush1.bf16.msra.mxu1 %v9155_v59  ;;  %v9203_v18 = vld [vmem:[#allocation11 + $0x540] ss:$24 sps:$4 sm:$0xff]  }
 0x1f3   :  { %4311 = vmatprep.subr.bf16.mxu1 %v9163_v60 }
 0x1f5   :  { %4269 = vmatpush1.bf16.msra.mxu0 %v9098_v19  ;;  %v9211_v19 = vld [vmem:[#allocation11 + $0x514] ss:$24 sps:$4 sm:$0xff]  }
 0x1f6   :  { %4270 = vmatprep.subr.bf16.mxu0 %v9103_v20  ;;  %4312 = vmatpush1.bf16.msra.mxu1 %v9161_v62  ;;  %v9209_v20 = vld [vmem:[#allocation11 + $0x510] ss:$24 sps:$4 sm:$0xff]  }
 0x1f7   :  { %4313 = vmatprep.subr.bf16.mxu1 %v9169_v63 }
 0x1f9   :  { %4271 = vmatpush1.bf16.msra.mxu0 %v9101_v21  ;;  %v9217_v21 = vld [vmem:[#allocation11 + $0x4e4] ss:$24 sps:$4 sm:$0xff]  }
 0x1fa   :  { %4272 = vmatprep.subr.bf16.mxu0 %v9106_v25  ;;  %4314 = vmatpush1.bf16.msra.mxu1 %v9167_v2  ;;  %v9215_v25 = vld [vmem:[#allocation11 + $0x4e0] ss:$24 sps:$4 sm:$0xff]  }
 0x1fb   :  { %4315 = vmatprep.subr.bf16.mxu1 %v9175_v3 }
 0x1fd   :  { %4273 = vmatpush1.bf16.msra.mxu0 %v9104_v26  ;;  %v9223_v26 = vld [vmem:[#allocation11 + $0x4b4] ss:$24 sps:$4 sm:$0xff]  }
 0x1fe   :  { %4274 = vmatprep.subr.bf16.mxu0 %v9109_v27  ;;  %4316 = vmatpush1.bf16.msra.mxu1 %v9173_v5  ;;  %v9221_v27 = vld [vmem:[#allocation11 + $0x4b0] ss:$24 sps:$4 sm:$0xff]  }
 0x1ff   :  { %4317 = vmatprep.subr.bf16.mxu1 %v9181_v6 }
 0x201   :  { %4275 = vmatpush1.bf16.msra.mxu0 %v9107_v28  ;;  %v9229_v28 = vld [vmem:[#allocation11 + $0x484] ss:$24 sps:$4 sm:$0xff]  }
 0x202   :  { %4276 = vmatprep.subr.bf16.mxu0 %v9112_v31  ;;  %4318 = vmatpush1.bf16.msra.mxu1 %v9179_v7  ;;  %v9227_v31 = vld [vmem:[#allocation11 + $0x480] ss:$24 sps:$4 sm:$0xff]  }
 0x203   :  { %4319 = vmatprep.subr.bf16.mxu1 %v9187_v8 }
 0x205   :  { %4277 = vmatpush2.bf16.msra.mxu0 %v9110_v32  ;;  %v9235_v32 = vld [vmem:[#allocation11 + $0x45c] ss:$24 sps:$4 sm:$0xff]  }
 0x206   :  { %4278 = vmatprep.subr.bf16.mxu0 %v9115_v34  ;;  %4320 = vmatpush2.bf16.msra.mxu1 %v9185_v10 }
 0x207   :  { %4321 = vmatprep.subr.bf16.mxu1 %v9193_v54 }
 0x209   :  { %4279 = vmatpush2.bf16.msra.mxu0 %v9113_v35  ;;  %v3004_v35 = vlaneseq }
 0x20a   :  { %4280 = vmatprep.subr.bf16.mxu0 %v9118_v39  ;;  %4322 = vmatpush2.bf16.msra.mxu1 %v9191_v11 }
 0x20b   :  { %4323 = vmatprep.subr.bf16.mxu1 %v9199_v14 }
 0x20d   :  { %4281 = vmatpush2.bf16.msra.mxu0 %v9116_v22  ;;  %v10396_v22 = vshrl.u32 %v3004_v35, 7 }
 0x20e   :  { %4282 = vmatprep.subr.bf16.mxu0 %v9121_v40  ;;  %4324 = vmatpush2.bf16.msra.mxu1 %v9197_v15  ;;  %v1606_v40 = vadd.f32 %v10366_v30, %v10364_v29  ;;  %v1610_v30 = vadd.f32 %v10374_v43, %v10372_v42 }
 0x20f   :  { %4325 = vmatprep.subr.bf16.mxu1 %v9205_v16  ;;  %v10411_v29 = vsub.s32 1, %v10396_v22 }
 0x210   :  { %v1649_v50 = vadd.f32 %v10378_v53, %v1606_v40  ;;  %v1653_v57 = vadd.f32 %v10382_v12, %v1610_v30  ;;  %v9134_v40 = vld [vmem:[#allocation11 + $0x158] ss:$24 sps:$4 sm:$0xff]   ;;  %v9166_v30 = vld [vmem:[#allocation11 + $0x6c] ss:$24 sps:$4 sm:$0xff]  }
 0x211   :  { %4283 = vmatpush2.bf16.msra.mxu0 %v9119_v48 }
 0x212   :  { %4284 = vmatprep.subr.bf16.mxu0 %v9124_v49  ;;  %4326 = vmatpush2.bf16.msra.mxu1 %v9203_v18  ;;  %v1608_v49 = vadd.f32 %v10370_v37, %v10368_v36 }
 0x213   :  { %4327 = vmatprep.subr.bf16.mxu1 %v9211_v19 }
 0x214   :  { %v1651_v23 = vadd.f32 %v10380_v58, %v1608_v49  ;;  %v9148_v49 = vld [vmem:[#allocation11 + $0xfc] ss:$24 sps:$4 sm:$0xff]  }
 0x215   :  { %4285 = vmatpush2.bf16.msra.mxu0 %v9122_v52  ;;  %v10405_v52 = vsub.s32 0, %v10396_v22 }
 0x216   :  { %4286 = vmatprep.subr.bf16.mxu0 %v9127_v55  ;;  %4328 = vmatpush2.bf16.msra.mxu1 %v9209_v20  ;;  %v10407_v55 = vld [vmem:[#allocation10] sm:$0xf] }
 0x217   :  { %4329 = vmatprep.subr.bf16.mxu1 %v9217_v21  ;;  %v3007_v53 = vrot.slane %v10407_v55, %v10405_v52  ;;  %v3011_v60 = vrot.slane %v10407_v55, %v10411_v29 }
 0x219   :  { %4287 = vmatpush2.bf16.msra.mxu0 %v9125_v38 }
 0x21a   :  { %4288 = vmatprep.subr.bf16.mxu0 %v9130_v33  ;;  %4330 = vmatpush2.bf16.msra.mxu1 %v9215_v25 }
 0x21b   :  { %4331 = vmatprep.subr.bf16.mxu1 %v9223_v26 }
 0x21d   :  { %4289 = vmatpush2.bf16.msra.mxu0 %v9128_v61 }
 0x21e   :  { %4290 = vmatprep.subr.bf16.mxu0 %v9133_v41  ;;  %4332 = vmatpush2.bf16.msra.mxu1 %v9221_v27 }
 0x21f   :  { %4333 = vmatprep.subr.bf16.mxu1 %v9229_v28 }
 0x221   :  { %4291 = vmatpush2.bf16.msra.mxu0 %v9131_v0 }
 0x222   :  { %4346 = vmatprep.subr.bf16.mxu0 %v9136_v1  ;;  %4334 = vmatpush2.bf16.msra.mxu1 %v9227_v31 }
 0x223   :  { %4389 = vmatprep.subr.bf16.mxu1 %v9235_v32 }
 0x224   :  { %v2778_v34 = vpop.f32.mrf.mxu0 }
 0x225   :  { %v2821_v45 = vpop.f32.mrf.mxu1  ;;  %v2779_v51 = vadd.f32 %v2778_v34, %v1647_v44 }
 0x226   :  { %v2780_v39 = vpop.f32.mrf.mxu0 }
 0x227   :  { %v2781_v24 = vadd.f32 %v2780_v39, %v1649_v50  ;;  %v2823_v56 = vpop.f32.mrf.mxu1  ;;  %v2822_v36 = vadd.f32 %v2821_v45, %v2779_v51  ;;  %v9142_v45 = vld [vmem:[#allocation11 + $0x12c] ss:$24 sps:$4 sm:$0xff]   ;;  %v9146_v50 = vld [vmem:[#allocation11 + $0xf8] ss:$24 sps:$4 sm:$0xff]  }
 0x228   :  { %v2782_v48 = vpop.f32.mrf.mxu0  ;;  %v9154_v51 = vld [vmem:[#allocation11 + $0xcc] ss:$24 sps:$4 sm:$0xff]  }
 0x229   :  { %v2783_v37 = vadd.f32 %v2782_v48, %v1651_v23  ;;  %v2824_v33 = vadd.f32 %v2823_v56, %v2781_v24  ;;  %v2825_v59 = vpop.f32.mrf.mxu1  ;;  %v9140_v48 = vld [vmem:[#allocation11 + $0x128] ss:$24 sps:$4 sm:$0xff]   ;;  %v9160_v24 = vld [vmem:[#allocation11 + $0x9c] ss:$24 sps:$4 sm:$0xff]   ;;  %v9158_v56 = vld [vmem:[#allocation11 + $0x98] ss:$24 sps:$4 sm:$0xff]  }
 0x22a   :  { %v2784_v47 = vpop.f32.mrf.mxu0  ;;  %v9152_v23 = vld [vmem:[#allocation11 + $0xc8] ss:$24 sps:$4 sm:$0xff]  }
 0x22b   :  { %v2785_v61 = vadd.f32 %v2784_v47, %v1653_v57  ;;  %v2826_v62 = vadd.f32 %v2825_v59, %v2783_v37  ;;  %v2827_v0 = vpop.f32.mrf.mxu1  ;;  %v9172_v37 = vld [vmem:[#allocation11 + $0x3c] ss:$24 sps:$4 sm:$0xff]   ;;  %v9170_v57 = vld [vmem:[#allocation11 + $0x38] ss:$24 sps:$4 sm:$0xff]   ;;  %v9176_v59 = vld [vmem:[#allocation11 + $0x8] ss:$24 sps:$4 sm:$0xff]  }
 0x22d   :  { %v2828_v5 = vadd.f32 %v2827_v0, %v2785_v61 }
 0x264   :  { %v2864_v38 = vpop.f32.mrf.mxu0 }
 0x265   :  { %v2865_v58 = vadd.f32 %v2864_v38, %v2822_v36  ;;  %v2907_v47 = vpop.f32.mrf.mxu1  ;;  %v9164_v36 = vld [vmem:[#allocation11 + $0x68] ss:$24 sps:$4 sm:$0xff]   ;;  %v9178_v38 = vld [vmem:[#allocation11 + $0xc] ss:$24 sps:$4 sm:$0xff]  }
 0x266   :  { %v2866_v41 = vpop.f32.mrf.mxu0 }
 0x267   :  { %v3024_v63 = vadd.f32 %v3007_v53, %v2865_v58  ;;  %v2867_v42 = vadd.f32 %v2866_v41, %v2824_v33  ;;  %v10428_v58 = vsub.s32 2, %v10396_v22  ;;  %v2908_v41 = vadd.f32 %v2907_v47, %v10386_v4 }
 0x268   :  { %v2868_v43 = vpop.f32.mrf.mxu0 }
 0x269   :  { %v3040_v1 = vmul.f32 0.70710677, %v3024_v63  ;;  %v3025_v2 = vadd.f32 %v3011_v60, %v2867_v42  ;;  %v2869_v3 = vadd.f32 %v2868_v43, %v2826_v62  ;;  %v3032_v31 = vmul.f32 0.5, %v3024_v63  ;;  %v9182_v43 = vld [vmem:[#allocation11 + $0x2d8] ss:$24 sps:$4 sm:$0xff]  }
 0x26a   :  { %v2870_v6 = vpop.f32.mrf.mxu0  ;;  %v10432_v62 = vsub.s32 3, %v10396_v22 }
 0x26b   :  { %v3041_v12 = vmul.f32 0.70710677, %v3025_v2  ;;  %v3028_v7 = vadd.f32 %v3007_v53, %v2869_v3  ;;  %v2871_v8 = vadd.f32 %v2870_v6, %v2828_v5  ;;  %9950 = verf.f32 %v3040_v1  ;;  %v2909_v53 = vpop.f32.mrf.mxu1  ;;  %v9190_v3 = vld [vmem:[#allocation11 + $0x2ac] ss:$24 sps:$4 sm:$0xff]  }
 0x26c   :  { %v3033_v26 = vmul.f32 0.5, %v3025_v2  ;;  %v2910_v0 = vadd.f32 %v2909_v53, %v10388_v9  ;;  %v3015_v2 = vrot.slane %v10407_v55, %v10428_v58 }
 0x26d   :  { %v3044_v10 = vmul.f32 0.70710677, %v3028_v7  ;;  %9952 = verf.f32 %v3041_v12  ;;  %v3029_v54 = vadd.f32 %v3011_v60, %v2871_v8  ;;  %v3036_v25 = vmul.f32 0.5, %v3028_v7  ;;  %v2911_v33 = vpop.f32.mrf.mxu1  ;;  %v9184_v60 = vld [vmem:[#allocation11 + $0x2dc] ss:$24 sps:$4 sm:$0xff]  }
 0x26e   :  { %v2912_v12 = vadd.f32 %v2911_v33, %v10390_v46  ;;  %v3019_v8 = vrot.slane %v10407_v55, %v10432_v62 }
 0x26f   :  { %9954 = verf.f32 %v3044_v10  ;;  %v3045_v11 = vmul.f32 0.70710677, %v3029_v54  ;;  %v3037_v27 = vmul.f32 0.5, %v3029_v54  ;;  %v2913_v61 = vpop.f32.mrf.mxu1  ;;  %v9188_v54 = vld [vmem:[#allocation11 + $0x2a8] ss:$24 sps:$4 sm:$0xff]  }
 0x271   :  { %9956 = verf.f32 %v3045_v11 }
 0x278   :  { %v9951_v14 = vpop.eup %9950 }
 0x279   :  { %v3056_v21 = vadd.f32 1.0, %v9951_v14 }
 0x27a   :  { %v9953_v15 = vpop.eup %9952 }
 0x27b   :  { %v3057_v19 = vadd.f32 1.0, %v9953_v15  ;;  %v3064_v39 = vmul.f32 %v3056_v21, %v3032_v31  ;;  %v9202_v31 = vld [vmem:[#allocation11 + $0x24c] ss:$24 sps:$4 sm:$0xff]  }
 0x27c   :  { %v9955_v16 = vpop.eup %9954 }
 0x27d   :  { %v3060_v18 = vadd.f32 1.0, %v9955_v16  ;;  %v3065_v34 = vmul.f32 %v3057_v19, %v3033_v26  ;;  %v9196_v16 = vld [vmem:[#allocation11 + $0x27c] ss:$24 sps:$4 sm:$0xff]   ;;  %v9194_v26 = vld [vmem:[#allocation11 + $0x278] ss:$24 sps:$4 sm:$0xff]  }
 0x27e   :  { %v9957_v20 = vpop.eup %9956 }
 0x27f   :  { %v3061_v28 = vadd.f32 1.0, %v9957_v20  ;;  %v3068_v32 = vmul.f32 %v3060_v18, %v3036_v25  ;;  %v2914_v18 = vadd.f32 %v2913_v61, %v10392_v17  ;;  %v9208_v17 = vld [vmem:[#allocation11 + $0x21c] ss:$24 sps:$4 sm:$0xff]  }
 0x280   :  { %v9232_v61 = vld [vmem:[#allocation11 + $0x164] ss:$24 sps:$4 sm:$0xff]  }
 0x281   :  { %v3069_v35 = vmul.f32 %v3061_v28, %v3037_v27  ;;  %v10422_v44 = vpack.c.bf16 %v3068_v32, %v3064_v39  ;;  %v9200_v39 = vld [vmem:[#allocation11 + $0x248] ss:$24 sps:$4 sm:$0xff]  }
 0x283   :  { %v10420_v13 = vpack.c.bf16 %v3069_v35, %v3065_v34 }
 0x285   :  { %4292 = vmatprep.mubr.bf16.mxu0 %v10420_v13 }
 0x286   :  { %4293 = vmatmul.mubr.bf16.vlgmr.msra.gmra.mxu0 %v10422_v44 }
 0x287   :  { %4347 = vmatpush1.bf16.msra.mxu0 %v9134_v40  ;;  %4378 = vmatprep.mubr.bf16.mxu0 %v10420_v13 }
 0x288   :  { %4348 = vmatprep.subr.bf16.mxu0 %v9142_v45  ;;  %v9206_v45 = vld [vmem:[#allocation11 + $0x218] ss:$24 sps:$4 sm:$0xff]  }
 0x28b   :  { %4349 = vmatpush1.bf16.msra.mxu0 %v9140_v48  ;;  %v9214_v48 = vld [vmem:[#allocation11 + $0x1ec] ss:$24 sps:$4 sm:$0xff]  }
 0x28c   :  { %4350 = vmatprep.subr.bf16.mxu0 %v9148_v49  ;;  %v9212_v49 = vld [vmem:[#allocation11 + $0x1e8] ss:$24 sps:$4 sm:$0xff]  }
 0x28f   :  { %4351 = vmatpush1.bf16.msra.mxu0 %v9146_v50  ;;  %v9220_v50 = vld [vmem:[#allocation11 + $0x1bc] ss:$24 sps:$4 sm:$0xff]  }
 0x290   :  { %4352 = vmatprep.subr.bf16.mxu0 %v9154_v51 }
 0x293   :  { %4353 = vmatpush1.bf16.msra.mxu0 %v9152_v23  ;;  %v9218_v23 = vld [vmem:[#allocation11 + $0x1b8] ss:$24 sps:$4 sm:$0xff]  }
 0x294   :  { %4354 = vmatprep.subr.bf16.mxu0 %v9160_v24 }
 0x297   :  { %4355 = vmatpush1.bf16.msra.mxu0 %v9158_v56 }
 0x298   :  { %4356 = vmatprep.subr.bf16.mxu0 %v9166_v30  ;;  %v9226_v30 = vld [vmem:[#allocation11 + $0x18c] ss:$24 sps:$4 sm:$0xff]  }
 0x29b   :  { %4357 = vmatpush1.bf16.msra.mxu0 %v9164_v36 }
 0x29c   :  { %4358 = vmatprep.subr.bf16.mxu0 %v9172_v37 }
 0x29f   :  { %4359 = vmatpush1.bf16.msra.mxu0 %v9170_v57  ;;  %v9224_v57 = vld [vmem:[#allocation11 + $0x188] ss:$24 sps:$4 sm:$0xff]  }
 0x2a0   :  { %4360 = vmatprep.subr.bf16.mxu0 %v9178_v38 }
 0x2a3   :  { %4361 = vmatpush1.bf16.msra.mxu0 %v9176_v59 }
 0x2a4   :  { %v2950_v63 = vpop.f32.mrf.mxu0  ;;  %4362 = vmatprep.subr.bf16.mxu0 %v9184_v60 }
 0x2a5   :  { %v2993_v42 = vpop.f32.mrf.mxu1  ;;  %v2951_v1 = vadd.f32 %v2950_v63, %v2908_v41 }
 0x2a6   :  { %v2952_v5 = vpop.f32.mrf.mxu0 }
 0x2a7   :  { %v2995_v6 = vpop.f32.mrf.mxu1  ;;  %v2994_v4 = vadd.f32 %v2993_v42, %v2951_v1  ;;  %v2953_v7 = vadd.f32 %v2952_v5, %v2910_v0  ;;  %4363 = vmatpush2.bf16.msra.mxu0 %v9182_v43  ;;  %v9230_v0 = vld [vmem:[#allocation11 + $0x160] ss:$24 sps:$4 sm:$0xff]  }
 0x2a8   :  { %v2954_v10 = vpop.f32.mrf.mxu0  ;;  %4364 = vmatprep.subr.bf16.mxu0 %v9190_v3  ;;  %v9238_v3 = vld [vmem:[#allocation11 + $0x134] ss:$24 sps:$4 sm:$0xff]  }
 0x2a9   :  { %v3026_v11 = vadd.f32 %v3015_v2, %v2994_v4  ;;  %v2996_v9 = vadd.f32 %v2995_v6, %v2953_v7  ;;  %v2955_v14 = vadd.f32 %v2954_v10, %v2912_v12  ;;  %v2997_v15 = vpop.f32.mrf.mxu1  ;;  %v9233_v6 = vld [vmem:[#allocation11 + $0x458] ss:$24 sps:$4 sm:$0xff]   ;;  %v9241_v4 = vld [vmem:[#allocation11 + $0x42c] ss:$24 sps:$4 sm:$0xff]  }
 0x2aa   :  { %v2956_v19 = vpop.f32.mrf.mxu0  ;;  %v9236_v12 = vld [vmem:[#allocation11 + $0x130] ss:$24 sps:$4 sm:$0xff]   ;;  %v9244_v7 = vld [vmem:[#allocation11 + $0x104] ss:$24 sps:$4 sm:$0xff]   ;;  %v9242_v10 = vld [vmem:[#allocation11 + $0x100] ss:$24 sps:$4 sm:$0xff]  }
 0x2ab   :  { %v3042_v20 = vmul.f32 0.70710677, %v3026_v11  ;;  %v3027_v21 = vadd.f32 %v3019_v8, %v2996_v9  ;;  %v2998_v46 = vadd.f32 %v2997_v15, %v2955_v14  ;;  %v2957_v25 = vadd.f32 %v2956_v19, %v2914_v18  ;;  %4365 = vmatpush2.bf16.msra.mxu0 %v9188_v54  ;;  %v2999_v28 = vpop.f32.mrf.mxu1  ;;  %v9247_v54 = vld [vmem:[#allocation11 + $0x3fc] ss:$24 sps:$4 sm:$0xff]   ;;  %v9248_v9 = vld [vmem:[#allocation11 + $0xd0] ss:$24 sps:$4 sm:$0xff]  }
 0x2ac   :  { %4366 = vmatprep.subr.bf16.mxu0 %v9196_v16  ;;  %v3034_v36 = vmul.f32 0.5, %v3026_v11  ;;  %v9250_v11 = vld [vmem:[#allocation11 + $0xd4] ss:$24 sps:$4 sm:$0xff]   ;;  %v9256_v15 = vld [vmem:[#allocation11 + $0xa4] ss:$24 sps:$4 sm:$0xff]  }
 0x2ad   :  { %9958 = verf.f32 %v3042_v20  ;;  %v3043_v55 = vmul.f32 0.70710677, %v3027_v21  ;;  %v3030_v27 = vadd.f32 %v3015_v2, %v2998_v46  ;;  %v3000_v32 = vadd.f32 %v2999_v28, %v2957_v25  ;;  %v9253_v14 = vld [vmem:[#allocation11 + $0x3cc] ss:$24 sps:$4 sm:$0xff]   ;;  %v9251_v16 = vld [vmem:[#allocation11 + $0x3c8] ss:$24 sps:$4 sm:$0xff]  }
 0x2ae   :  { %v3035_v41 = vmul.f32 0.5, %v3027_v21  ;;  %v9254_v18 = vld [vmem:[#allocation11 + $0xa0] ss:$24 sps:$4 sm:$0xff]   ;;  %v9259_v19 = vld [vmem:[#allocation11 + $0x39c] ss:$24 sps:$4 sm:$0xff]  }
 0x2af   :  { %v3046_v34 = vmul.f32 0.70710677, %v3030_v27  ;;  %9960 = verf.f32 %v3043_v55  ;;  %v3031_v35 = vadd.f32 %v3019_v8, %v3000_v32  ;;  %4367 = vmatpush2.bf16.msra.mxu0 %v9194_v26  ;;  %v3038_v37 = vmul.f32 0.5, %v3030_v27  ;;  %v9239_v8 = vld [vmem:[#allocation11 + $0x428] ss:$24 sps:$4 sm:$0xff]  }
 0x2b0   :  { %4368 = vmatprep.subr.bf16.mxu0 %v9202_v31  ;;  %v9262_v20 = vld [vmem:[#allocation11 + $0x74] ss:$24 sps:$4 sm:$0xff]   ;;  %v9257_v21 = vld [vmem:[#allocation11 + $0x398] ss:$24 sps:$4 sm:$0xff]   ;;  %v9268_v26 = vld [vmem:[#allocation11 + $0x44] ss:$24 sps:$4 sm:$0xff]  }
 0x2b1   :  { %9962 = verf.f32 %v3046_v34  ;;  %v3047_v40 = vmul.f32 0.70710677, %v3031_v35  ;;  %v3039_v63 = vmul.f32 0.5, %v3031_v35  ;;  %v9260_v46 = vld [vmem:[#allocation11 + $0x70] ss:$24 sps:$4 sm:$0xff]  }
 0x2b2   :  { %v9265_v25 = vld [vmem:[#allocation11 + $0x36c] ss:$24 sps:$4 sm:$0xff]   ;;  %v9263_v55 = vld [vmem:[#allocation11 + $0x368] ss:$24 sps:$4 sm:$0xff]   ;;  %v9271_v28 = vld [vmem:[#allocation11 + $0x33c] ss:$24 sps:$4 sm:$0xff]  }
 0x2b3   :  { %9964 = verf.f32 %v3047_v40  ;;  %4369 = vmatpush2.bf16.msra.mxu0 %v9200_v39  ;;  %v9266_v27 = vld [vmem:[#allocation11 + $0x40] ss:$24 sps:$4 sm:$0xff]   ;;  %v9274_v31 = vld [vmem:[#allocation11 + $0x14] ss:$24 sps:$4 sm:$0xff]   ;;  %v9272_v34 = vld [vmem:[#allocation11 + $0x10] ss:$24 sps:$4 sm:$0xff]  }
 0x2b4   :  { %4370 = vmatprep.subr.bf16.mxu0 %v9208_v17  ;;  %v9269_v32 = vld [vmem:[#allocation11 + $0x338] ss:$24 sps:$4 sm:$0xff]   ;;  %v9277_v35 = vld [vmem:[#allocation11 + $0x30c] ss:$24 sps:$4 sm:$0xff]   ;;  %v9275_v17 = vld [vmem:[#allocation11 + $0x308] ss:$24 sps:$4 sm:$0xff]  }
 0x2b5   :  { %v9280_v39 = vld [vmem:[#allocation11 + $0x2e4] ss:$24 sps:$4 sm:$0xff]   ;;  %v9278_v40 = vld [vmem:[#allocation11 + $0x2e0] ss:$24 sps:$4 sm:$0xff]  }
 0x2b7   :  { %4371 = vmatpush2.bf16.msra.mxu0 %v9206_v45  ;;  %v9283_v45 = vld [vmem:[#allocation11 + $0x5dc] ss:$24 sps:$4 sm:$0xff]  }
 0x2b8   :  { %4372 = vmatprep.subr.bf16.mxu0 %v9214_v48  ;;  %v9286_v48 = vld [vmem:[#allocation11 + $0x2b4] ss:$24 sps:$4 sm:$0xff]  }
 0x2ba   :  { %v9959_v51 = vpop.eup %9958 }
 0x2bb   :  { %4373 = vmatpush2.bf16.msra.mxu0 %v9212_v49  ;;  %v3058_v56 = vadd.f32 1.0, %v9959_v51  ;;  %v9281_v49 = vld [vmem:[#allocation11 + $0x5d8] ss:$24 sps:$4 sm:$0xff]   ;;  %v9289_v51 = vld [vmem:[#allocation11 + $0x5ac] ss:$24 sps:$4 sm:$0xff]  }
 0x2bc   :  { %v9961_v24 = vpop.eup %9960  ;;  %4374 = vmatprep.subr.bf16.mxu0 %v9220_v50  ;;  %v9284_v50 = vld [vmem:[#allocation11 + $0x2b0] ss:$24 sps:$4 sm:$0xff]  }
 0x2bd   :  { %v3059_v38 = vadd.f32 1.0, %v9961_v24  ;;  %v3066_v59 = vmul.f32 %v3058_v56, %v3034_v36  ;;  %v9287_v24 = vld [vmem:[#allocation11 + $0x5a8] ss:$24 sps:$4 sm:$0xff]   ;;  %v9293_v36 = vld [vmem:[#allocation11 + $0x578] ss:$24 sps:$4 sm:$0xff]  }
 0x2be   :  { %v9963_v47 = vpop.eup %9962  ;;  %v9290_v56 = vld [vmem:[#allocation11 + $0x280] ss:$24 sps:$4 sm:$0xff]  }
 0x2bf   :  { %v3062_v53 = vadd.f32 1.0, %v9963_v47  ;;  %4375 = vmatpush2.bf16.msra.mxu0 %v9218_v23  ;;  %v3067_v1 = vmul.f32 %v3059_v38, %v3035_v41  ;;  %v9292_v23 = vld [vmem:[#allocation11 + $0x284] ss:$24 sps:$4 sm:$0xff]   ;;  %v9298_v47 = vld [vmem:[#allocation11 + $0x254] ss:$24 sps:$4 sm:$0xff]  }
 0x2c0   :  { %v9965_v33 = vpop.eup %9964  ;;  %4376 = vmatprep.subr.bf16.mxu0 %v9226_v30  ;;  %v9295_v30 = vld [vmem:[#allocation11 + $0x57c] ss:$24 sps:$4 sm:$0xff]   ;;  %v9299_v38 = vld [vmem:[#allocation11 + $0x548] ss:$24 sps:$4 sm:$0xff]  }
 0x2c1   :  { %v3070_v60 = vmul.f32 %v3062_v53, %v3038_v37  ;;  %v3063_v42 = vadd.f32 1.0, %v9965_v33  ;;  %v9296_v37 = vld [vmem:[#allocation11 + $0x250] ss:$24 sps:$4 sm:$0xff]   ;;  %v9301_v53 = vld [vmem:[#allocation11 + $0x54c] ss:$24 sps:$4 sm:$0xff]  }
 0x2c2   :  { %v9302_v33 = vld [vmem:[#allocation11 + $0x220] ss:$24 sps:$4 sm:$0xff]   ;;  %v9308_v41 = vld [vmem:[#allocation11 + $0x1f0] ss:$24 sps:$4 sm:$0xff]  }
 0x2c3   :  { %v10441_v43 = vpack.c.bf16 %v3070_v60, %v3066_v59  ;;  %4377 = vmatpush2.bf16.msra.mxu0 %v9224_v57  ;;  %v3071_v2 = vmul.f32 %v3063_v42, %v3039_v63  ;;  %v9304_v57 = vld [vmem:[#allocation11 + $0x224] ss:$24 sps:$4 sm:$0xff]   ;;  %v9310_v60 = vld [vmem:[#allocation11 + $0x1f4] ss:$24 sps:$4 sm:$0xff]  }
 0x2c4   :  { %4432 = vmatprep.subr.bf16.mxu0 %v9232_v61  ;;  %v9307_v59 = vld [vmem:[#allocation11 + $0x51c] ss:$24 sps:$4 sm:$0xff]   ;;  %v9305_v61 = vld [vmem:[#allocation11 + $0x518] ss:$24 sps:$4 sm:$0xff]   ;;  %v9313_v63 = vld [vmem:[#allocation11 + $0x4ec] ss:$24 sps:$4 sm:$0xff]  }
 0x2c5   :  { %v10443_v5 = vpack.c.bf16 %v3071_v2, %v3067_v1  ;;  %v9316_v42 = vld [vmem:[#allocation11 + $0x1c4] ss:$24 sps:$4 sm:$0xff]   ;;  %v9314_v1 = vld [vmem:[#allocation11 + $0x1c0] ss:$24 sps:$4 sm:$0xff]  }
 0x2c6   :  { %4379 = vmatmul.mubr.bf16.vlgmr.msra.gmra.mxu0 %v10422_v44  ;;  %v9319_v2 = vld [vmem:[#allocation11 + $0x4bc] ss:$24 sps:$4 sm:$0xff]  }
 0x2c7   :  { %4433 = vmatpush1.bf16.msra.mxu0 %v9230_v0  ;;  %4464 = vmatprep.mubr.bf16.mxu0 %v10420_v13  ;;  %v9245_v13 = vld [vmem:[#allocation11 + $0x3f8] ss:$24 sps:$4 sm:$0xff]   ;;  %v9311_v0 = vld [vmem:[#allocation11 + $0x4e8] ss:$24 sps:$4 sm:$0xff]  }
 0x2c8   :  { %4335 = vmatprep.mubr.bf16.mxu1 %v10443_v5  ;;  %4434 = vmatprep.subr.bf16.mxu0 %v9238_v3  ;;  %v9322_v3 = vld [vmem:[#allocation11 + $0x194] ss:$24 sps:$4 sm:$0xff]  }
 0x2c9   :  { %4336 = vmatmul.mubr.bf16.vlgmr.msra.gmra.mxu1 %v10441_v43 }
 0x2ca   :  { %4390 = vmatpush1.bf16.msra.mxu1 %v9233_v6  ;;  %4421 = vmatprep.mubr.bf16.mxu1 %v10443_v5  ;;  %v9317_v6 = vld [vmem:[#allocation11 + $0x4b8] ss:$24 sps:$4 sm:$0xff]  }
 0x2cb   :  { %4435 = vmatpush1.bf16.msra.mxu0 %v9236_v12  ;;  %4391 = vmatprep.subr.bf16.mxu1 %v9241_v4  ;;  %v9320_v12 = vld [vmem:[#allocation11 + $0x190] ss:$24 sps:$4 sm:$0xff]   ;;  %v9325_v4 = vld [vmem:[#allocation11 + $0x48c] ss:$24 sps:$4 sm:$0xff]  }
 0x2cc   :  { %4436 = vmatprep.subr.bf16.mxu0 %v9244_v7  ;;  %v9376_v7 = vld [vmem:[#allocation13 + $0xe4] ss:$16 sps:$4 sm:$0xff]  }
 0x2ce   :  { %4392 = vmatpush1.bf16.msra.mxu1 %v9239_v8  ;;  %v9323_v8 = vld [vmem:[#allocation11 + $0x488] ss:$24 sps:$4 sm:$0xff]  }
 0x2cf   :  { %4437 = vmatpush1.bf16.msra.mxu0 %v9242_v10  ;;  %4393 = vmatprep.subr.bf16.mxu1 %v9247_v54  ;;  %v9328_v10 = vld [vmem:[#allocation11 + $0x464] ss:$24 sps:$4 sm:$0xff]   ;;  %v9374_v54 = vld [vmem:[#allocation13 + $0xe0] ss:$16 sps:$4 sm:$0xff]  }
 0x2d0   :  { %4438 = vmatprep.subr.bf16.mxu0 %v9250_v11  ;;  %v9379_v11 = vld [vmem:[#allocation13 + $0xc4] ss:$16 sps:$4 sm:$0xff]  }
 0x2d2   :  { %4394 = vmatpush1.bf16.msra.mxu1 %v9245_v13  ;;  %v9326_v13 = vld [vmem:[#allocation11 + $0x460] ss:$24 sps:$4 sm:$0xff]  }
 0x2d3   :  { %4439 = vmatpush1.bf16.msra.mxu0 %v9248_v9  ;;  %4395 = vmatprep.subr.bf16.mxu1 %v9253_v14  ;;  %v9331_v9 = vld [vmem:[#allocation11 + $0x434] ss:$24 sps:$4 sm:$0xff]   ;;  %v9377_v14 = vld [vmem:[#allocation13 + $0xc0] ss:$16 sps:$4 sm:$0xff]  }
 0x2d4   :  { %4440 = vmatprep.subr.bf16.mxu0 %v9256_v15  ;;  %v9382_v15 = vld [vmem:[#allocation13 + $0xa4] ss:$16 sps:$4 sm:$0xff]  }
 0x2d6   :  { %4396 = vmatpush1.bf16.msra.mxu1 %v9251_v16  ;;  %v9329_v16 = vld [vmem:[#allocation11 + $0x430] ss:$24 sps:$4 sm:$0xff]  }
 0x2d7   :  { %4441 = vmatpush1.bf16.msra.mxu0 %v9254_v18  ;;  %4397 = vmatprep.subr.bf16.mxu1 %v9259_v19  ;;  %v9334_v18 = vld [vmem:[#allocation11 + $0x404] ss:$24 sps:$4 sm:$0xff]   ;;  %v9380_v19 = vld [vmem:[#allocation13 + $0xa0] ss:$16 sps:$4 sm:$0xff]  }
 0x2d8   :  { %4442 = vmatprep.subr.bf16.mxu0 %v9262_v20  ;;  %v9385_v20 = vld [vmem:[#allocation13 + $0x84] ss:$16 sps:$4 sm:$0xff]  }
 0x2da   :  { %4398 = vmatpush1.bf16.msra.mxu1 %v9257_v21  ;;  %v9337_v21 = vld [vmem:[#allocation11 + $0x3d4] ss:$24 sps:$4 sm:$0xff]  }
 0x2db   :  { %4443 = vmatpush1.bf16.msra.mxu0 %v9260_v46  ;;  %4399 = vmatprep.subr.bf16.mxu1 %v9265_v25  ;;  %v9383_v46 = vld [vmem:[#allocation13 + $0x80] ss:$16 sps:$4 sm:$0xff]   ;;  %v9388_v25 = vld [vmem:[#allocation13 + $0x64] ss:$16 sps:$4 sm:$0xff]  }
 0x2dc   :  { %4444 = vmatprep.subr.bf16.mxu0 %v9268_v26  ;;  %v9335_v26 = vld [vmem:[#allocation11 + $0x3d0] ss:$24 sps:$4 sm:$0xff]  }
 0x2de   :  { %4400 = vmatpush1.bf16.msra.mxu1 %v9263_v55  ;;  %v9340_v55 = vld [vmem:[#allocation11 + $0x3a4] ss:$24 sps:$4 sm:$0xff]  }
 0x2df   :  { %4445 = vmatpush1.bf16.msra.mxu0 %v9266_v27  ;;  %4401 = vmatprep.subr.bf16.mxu1 %v9271_v28  ;;  %v9391_v27 = vld [vmem:[#allocation13 + $0x44] ss:$16 sps:$4 sm:$0xff]   ;;  %v9338_v28 = vld [vmem:[#allocation11 + $0x3a0] ss:$24 sps:$4 sm:$0xff]  }
 0x2e0   :  { %4446 = vmatprep.subr.bf16.mxu0 %v9274_v31  ;;  %v9343_v31 = vld [vmem:[#allocation11 + $0x374] ss:$24 sps:$4 sm:$0xff]  }
 0x2e2   :  { %4402 = vmatpush1.bf16.msra.mxu1 %v9269_v32  ;;  %v9389_v32 = vld [vmem:[#allocation13 + $0x40] ss:$16 sps:$4 sm:$0xff]  }
 0x2e3   :  { %4447 = vmatpush1.bf16.msra.mxu0 %v9272_v34  ;;  %4403 = vmatprep.subr.bf16.mxu1 %v9277_v35  ;;  %v9394_v34 = vld [vmem:[#allocation13 + $0x24] ss:$16 sps:$4 sm:$0xff]   ;;  %v9341_v35 = vld [vmem:[#allocation11 + $0x370] ss:$24 sps:$4 sm:$0xff]  }
 0x2e4   :  { %4448 = vmatprep.subr.bf16.mxu0 %v9280_v39  ;;  %v9346_v39 = vld [vmem:[#allocation11 + $0x344] ss:$24 sps:$4 sm:$0xff]  }
 0x2e6   :  { %4404 = vmatpush1.bf16.msra.mxu1 %v9275_v17  ;;  %v9392_v17 = vld [vmem:[#allocation13 + $0x20] ss:$16 sps:$4 sm:$0xff]  }
 0x2e7   :  { %4449 = vmatpush2.bf16.msra.mxu0 %v9278_v40  ;;  %4405 = vmatprep.subr.bf16.mxu1 %v9283_v45  ;;  %v9397_v40 = vld [vmem:[#allocation13 + $0x4] ss:$16 sps:$4 sm:$0xff]   ;;  %v9344_v45 = vld [vmem:[#allocation11 + $0x340] ss:$24 sps:$4 sm:$0xff]  }
 0x2e8   :  { %4450 = vmatprep.subr.bf16.mxu0 %v9286_v48  ;;  %v9349_v48 = vld [vmem:[#allocation11 + $0x314] ss:$24 sps:$4 sm:$0xff]  }
 0x2ea   :  { %4406 = vmatpush2.bf16.msra.mxu1 %v9281_v49  ;;  %v9395_v49 = vld [vmem:[#allocation13] ss:$16 sps:$4 sm:$0xff]  }
 0x2eb   :  { %4451 = vmatpush2.bf16.msra.mxu0 %v9284_v50  ;;  %4407 = vmatprep.subr.bf16.mxu1 %v9289_v51  ;;  %v9400_v50 = vld [vmem:[#allocation13 + $0x1e4] ss:$16 sps:$4 sm:$0xff]   ;;  %v9347_v51 = vld [vmem:[#allocation11 + $0x310] ss:$24 sps:$4 sm:$0xff]  }
 0x2ec   :  { %4452 = vmatprep.subr.bf16.mxu0 %v9292_v23  ;;  %v9352_v23 = vld [vmem:[#allocation11 + $0x5e4] ss:$24 sps:$4 sm:$0xff]  }
 0x2ee   :  { %4408 = vmatpush2.bf16.msra.mxu1 %v9287_v24  ;;  %v9398_v24 = vld [vmem:[#allocation13 + $0x1e0] ss:$16 sps:$4 sm:$0xff]  }
 0x2ef   :  { %4453 = vmatpush2.bf16.msra.mxu0 %v9290_v56  ;;  %4409 = vmatprep.subr.bf16.mxu1 %v9295_v30  ;;  %v9403_v56 = vld [vmem:[#allocation13 + $0x1c4] ss:$16 sps:$4 sm:$0xff]   ;;  %v9350_v30 = vld [vmem:[#allocation11 + $0x5e0] ss:$24 sps:$4 sm:$0xff]  }
 0x2f0   :  { %4454 = vmatprep.subr.bf16.mxu0 %v9298_v47  ;;  %v9355_v47 = vld [vmem:[#allocation11 + $0x5b4] ss:$24 sps:$4 sm:$0xff]  }
 0x2f2   :  { %4410 = vmatpush2.bf16.msra.mxu1 %v9293_v36  ;;  %v9401_v36 = vld [vmem:[#allocation13 + $0x1c0] ss:$16 sps:$4 sm:$0xff]  }
 0x2f3   :  { %4455 = vmatpush2.bf16.msra.mxu0 %v9296_v37  ;;  %4411 = vmatprep.subr.bf16.mxu1 %v9301_v53  ;;  %v9406_v37 = vld [vmem:[#allocation13 + $0x1a4] ss:$16 sps:$4 sm:$0xff]   ;;  %v9353_v53 = vld [vmem:[#allocation11 + $0x5b0] ss:$24 sps:$4 sm:$0xff]  }
 0x2f4   :  { %4456 = vmatprep.subr.bf16.mxu0 %v9304_v57  ;;  %v9358_v57 = vld [vmem:[#allocation11 + $0x584] ss:$24 sps:$4 sm:$0xff]  }
 0x2f6   :  { %4412 = vmatpush2.bf16.msra.mxu1 %v9299_v38  ;;  %v9404_v38 = vld [vmem:[#allocation13 + $0x1a0] ss:$16 sps:$4 sm:$0xff]  }
 0x2f7   :  { %4457 = vmatpush2.bf16.msra.mxu0 %v9302_v33  ;;  %4413 = vmatprep.subr.bf16.mxu1 %v9307_v59  ;;  %v9409_v33 = vld [vmem:[#allocation13 + $0x184] ss:$16 sps:$4 sm:$0xff]   ;;  %v9356_v59 = vld [vmem:[#allocation11 + $0x580] ss:$24 sps:$4 sm:$0xff]  }
 0x2f8   :  { %4458 = vmatprep.subr.bf16.mxu0 %v9310_v60  ;;  %v9361_v60 = vld [vmem:[#allocation11 + $0x554] ss:$24 sps:$4 sm:$0xff]  }
 0x2fa   :  { %4414 = vmatpush2.bf16.msra.mxu1 %v9305_v61  ;;  %v9407_v61 = vld [vmem:[#allocation13 + $0x180] ss:$16 sps:$4 sm:$0xff]  }
 0x2fb   :  { %4459 = vmatpush2.bf16.msra.mxu0 %v9308_v41  ;;  %4415 = vmatprep.subr.bf16.mxu1 %v9313_v63  ;;  %v9412_v41 = vld [vmem:[#allocation13 + $0x164] ss:$16 sps:$4 sm:$0xff]   ;;  %v9359_v63 = vld [vmem:[#allocation11 + $0x550] ss:$24 sps:$4 sm:$0xff]  }
 0x2fc   :  { %4460 = vmatprep.subr.bf16.mxu0 %v9316_v42  ;;  %v9364_v42 = vld [vmem:[#allocation11 + $0x524] ss:$24 sps:$4 sm:$0xff]  }
 0x2fe   :  { %4416 = vmatpush2.bf16.msra.mxu1 %v9311_v0  ;;  %v9410_v0 = vld [vmem:[#allocation13 + $0x160] ss:$16 sps:$4 sm:$0xff]  }
 0x2ff   :  { %4461 = vmatpush2.bf16.msra.mxu0 %v9314_v1  ;;  %4417 = vmatprep.subr.bf16.mxu1 %v9319_v2  ;;  %v9415_v1 = vld [vmem:[#allocation13 + $0x144] ss:$16 sps:$4 sm:$0xff]   ;;  %v9362_v2 = vld [vmem:[#allocation11 + $0x520] ss:$24 sps:$4 sm:$0xff]  }
 0x300   :  { %4462 = vmatprep.subr.bf16.mxu0 %v9322_v3  ;;  %v9367_v3 = vld [vmem:[#allocation11 + $0x4f4] ss:$24 sps:$4 sm:$0xff]  }
 0x302   :  { %4418 = vmatpush2.bf16.msra.mxu1 %v9317_v6  ;;  %v9413_v6 = vld [vmem:[#allocation13 + $0x140] ss:$16 sps:$4 sm:$0xff]  }
 0x303   :  { %4463 = vmatpush2.bf16.msra.mxu0 %v9320_v12  ;;  %4419 = vmatprep.subr.bf16.mxu1 %v9325_v4  ;;  %v9418_v12 = vld [vmem:[#allocation13 + $0x124] ss:$16 sps:$4 sm:$0xff]   ;;  %v9365_v4 = vld [vmem:[#allocation11 + $0x4f0] ss:$24 sps:$4 sm:$0xff]  }
 0x304   :  { %5758 = vmatprep.subr.bf16.mxu0 %v9376_v7  ;;  %v9370_v7 = vld [vmem:[#allocation11 + $0x4c4] ss:$24 sps:$4 sm:$0xff]  }
 0x306   :  { %4420 = vmatpush2.bf16.msra.mxu1 %v9323_v8  ;;  %4465 = vmatmul.mubr.bf16.vlgmr.msra.gmra.mxu0 %v10422_v44  ;;  %v9332_v44 = vld [vmem:[#allocation11 + $0x400] ss:$24 sps:$4 sm:$0xff]  }
 0x307   :  { %4475 = vmatprep.subr.bf16.mxu1 %v9328_v10  ;;  %5759 = vmatpush1.bf16.msra.mxu0 %v9374_v54  ;;  %v9416_v8 = vld [vmem:[#allocation13 + $0x120] ss:$16 sps:$4 sm:$0xff]   ;;  %v9421_v10 = vld [vmem:[#allocation13 + $0x104] ss:$16 sps:$4 sm:$0xff]  }
 0x308   :  { %5760 = vmatprep.subr.bf16.mxu0 %v9379_v11  ;;  %v9368_v54 = vld [vmem:[#allocation11 + $0x4c0] ss:$24 sps:$4 sm:$0xff]   ;;  %v9373_v11 = vld [vmem:[#allocation11 + $0x494] ss:$24 sps:$4 sm:$0xff]  }
 0x309   :  { %4422 = vmatmul.mubr.bf16.vlgmr.msra.gmra.mxu1 %v10441_v43 }
 0x30a   :  { %4476 = vmatpush1.bf16.msra.mxu1 %v9326_v13  ;;  %4507 = vmatprep.mubr.bf16.mxu1 %v10443_v5  ;;  %v9386_v5 = vld [vmem:[#allocation13 + $0x60] ss:$16 sps:$4 sm:$0xff]  }
 0x30b   :  { %4477 = vmatprep.subr.bf16.mxu1 %v9331_v9  ;;  %5761 = vmatpush1.bf16.msra.mxu0 %v9377_v14  ;;  %v9419_v13 = vld [vmem:[#allocation13 + $0x100] ss:$16 sps:$4 sm:$0xff]   ;;  %v9424_v14 = vld [vmem:[#allocation13 + $0x2e4] ss:$16 sps:$4 sm:$0xff]  }
 0x30c   :  { %5762 = vmatprep.subr.bf16.mxu0 %v9382_v15  ;;  %v9371_v9 = vld [vmem:[#allocation11 + $0x490] ss:$24 sps:$4 sm:$0xff]  }
 0x30d   :  { %v9422_v15 = vld [vmem:[#allocation13 + $0x2e0] ss:$16 sps:$4 sm:$0xff]  }
 0x30e   :  { %4478 = vmatpush1.bf16.msra.mxu1 %v9329_v16  ;;  %v9427_v16 = vld [vmem:[#allocation13 + $0x2c4] ss:$16 sps:$4 sm:$0xff]  }
 0x30f   :  { %4479 = vmatprep.subr.bf16.mxu1 %v9334_v18  ;;  %5763 = vmatpush1.bf16.msra.mxu0 %v9380_v19  ;;  %v9425_v18 = vld [vmem:[#allocation13 + $0x2c0] ss:$16 sps:$4 sm:$0xff]   ;;  %v9430_v19 = vld [vmem:[#allocation13 + $0x2a4] ss:$16 sps:$4 sm:$0xff]  }
 0x310   :  { %5764 = vmatprep.subr.bf16.mxu0 %v9385_v20  ;;  %v9428_v20 = vld [vmem:[#allocation13 + $0x2a0] ss:$16 sps:$4 sm:$0xff]  }
 0x312   :  { %4480 = vmatpush1.bf16.msra.mxu1 %v9332_v44  ;;  %v9433_v44 = vld [vmem:[#allocation13 + $0x284] ss:$16 sps:$4 sm:$0xff]  }
 0x313   :  { %4481 = vmatprep.subr.bf16.mxu1 %v9337_v21  ;;  %5765 = vmatpush1.bf16.msra.mxu0 %v9383_v46  ;;  %v9431_v21 = vld [vmem:[#allocation13 + $0x280] ss:$16 sps:$4 sm:$0xff]   ;;  %v9436_v46 = vld [vmem:[#allocation13 + $0x264] ss:$16 sps:$4 sm:$0xff]  }
 0x314   :  { %5766 = vmatprep.subr.bf16.mxu0 %v9388_v25  ;;  %v9434_v25 = vld [vmem:[#allocation13 + $0x260] ss:$16 sps:$4 sm:$0xff]  }
 0x316   :  { %4482 = vmatpush1.bf16.msra.mxu1 %v9335_v26  ;;  %v9439_v26 = vld [vmem:[#allocation13 + $0x244] ss:$16 sps:$4 sm:$0xff]  }
 0x317   :  { %4483 = vmatprep.subr.bf16.mxu1 %v9340_v55  ;;  %5767 = vmatpush1.bf16.msra.mxu0 %v9386_v5  ;;  %v9437_v55 = vld [vmem:[#allocation13 + $0x240] ss:$16 sps:$4 sm:$0xff]  }
 0x318   :  { %5768 = vmatprep.subr.bf16.mxu0 %v9391_v27  ;;  %v9440_v5 = vld [vmem:[#allocation13 + $0x220] ss:$16 sps:$4 sm:$0xff]   ;;  %v9445_v27 = vld [vmem:[#allocation13 + $0x204] ss:$16 sps:$4 sm:$0xff]  }
 0x31a   :  { %4484 = vmatpush1.bf16.msra.mxu1 %v9338_v28  ;;  %v9443_v28 = vld [vmem:[#allocation13 + $0x200] ss:$16 sps:$4 sm:$0xff]  }
 0x31b   :  { %4485 = vmatprep.subr.bf16.mxu1 %v9343_v31  ;;  %5769 = vmatpush1.bf16.msra.mxu0 %v9389_v32  ;;  %v9448_v31 = vld [vmem:[#allocation13 + $0x3e4] ss:$16 sps:$4 sm:$0xff]   ;;  %v9446_v32 = vld [vmem:[#allocation13 + $0x3e0] ss:$16 sps:$4 sm:$0xff]  }
 0x31c   :  { %5770 = vmatprep.subr.bf16.mxu0 %v9394_v34  ;;  %v9472_v34 = vld [vmem:[#allocation13 + $0x4e4] ss:$16 sps:$4 sm:$0xff]  }
 0x31e   :  { %4486 = vmatpush1.bf16.msra.mxu1 %v9341_v35  ;;  %v9451_v35 = vld [vmem:[#allocation13 + $0x3c4] ss:$16 sps:$4 sm:$0xff]  }
 0x31f   :  { %4487 = vmatprep.subr.bf16.mxu1 %v9346_v39  ;;  %5771 = vmatpush1.bf16.msra.mxu0 %v9392_v17  ;;  %v9449_v39 = vld [vmem:[#allocation13 + $0x3c0] ss:$16 sps:$4 sm:$0xff]   ;;  %v9454_v17 = vld [vmem:[#allocation13 + $0x3a4] ss:$16 sps:$4 sm:$0xff]  }
 0x320   :  { %5772 = vmatprep.subr.bf16.mxu0 %v9397_v40  ;;  %v9452_v40 = vld [vmem:[#allocation13 + $0x3a0] ss:$16 sps:$4 sm:$0xff]  }
 0x322   :  { %4488 = vmatpush1.bf16.msra.mxu1 %v9344_v45  ;;  %v9457_v45 = vld [vmem:[#allocation13 + $0x384] ss:$16 sps:$4 sm:$0xff]  }
 0x323   :  { %4489 = vmatprep.subr.bf16.mxu1 %v9349_v48  ;;  %5773 = vmatpush1.bf16.msra.mxu0 %v9395_v49  ;;  %v9455_v48 = vld [vmem:[#allocation13 + $0x380] ss:$16 sps:$4 sm:$0xff]   ;;  %v9460_v49 = vld [vmem:[#allocation13 + $0x364] ss:$16 sps:$4 sm:$0xff]  }
 0x324   :  { %5774 = vmatprep.subr.bf16.mxu0 %v9400_v50  ;;  %v9458_v50 = vld [vmem:[#allocation13 + $0x360] ss:$16 sps:$4 sm:$0xff]  }
 0x326   :  { %4490 = vmatpush1.bf16.msra.mxu1 %v9347_v51  ;;  %v9463_v51 = vld [vmem:[#allocation13 + $0x344] ss:$16 sps:$4 sm:$0xff]  }
 0x327   :  { %4491 = vmatprep.subr.bf16.mxu1 %v9352_v23  ;;  %5775 = vmatpush2.bf16.msra.mxu0 %v9398_v24  ;;  %v9461_v23 = vld [vmem:[#allocation13 + $0x340] ss:$16 sps:$4 sm:$0xff]   ;;  %v9466_v24 = vld [vmem:[#allocation13 + $0x324] ss:$16 sps:$4 sm:$0xff]  }
 0x328   :  { %5776 = vmatprep.subr.bf16.mxu0 %v9403_v56  ;;  %v9464_v56 = vld [vmem:[#allocation13 + $0x320] ss:$16 sps:$4 sm:$0xff]  }
 0x32a   :  { %4492 = vmatpush2.bf16.msra.mxu1 %v9350_v30 }
 0x32b   :  { %4493 = vmatprep.subr.bf16.mxu1 %v9355_v47  ;;  %5777 = vmatpush2.bf16.msra.mxu0 %v9401_v36  ;;  %v9469_v47 = vld [vmem:[#allocation13 + $0x304] ss:$16 sps:$4 sm:$0xff]   ;;  %v10457_v36 = vld [vmem:[%s10551_s6] sm:$0x3f] }
 0x32c   :  { %5778 = vmatprep.subr.bf16.mxu0 %v9406_v37  ;;  %v9467_v37 = vld [vmem:[#allocation13 + $0x300] ss:$16 sps:$4 sm:$0xff]  }
 0x32e   :  { %4494 = vmatpush2.bf16.msra.mxu1 %v9353_v53 }
 0x32f   :  { %4495 = vmatprep.subr.bf16.mxu1 %v9358_v57  ;;  %5779 = vmatpush2.bf16.msra.mxu0 %v9404_v38  ;;  %v9475_v57 = vld [vmem:[#allocation13 + $0xec] ss:$16 sps:$4 sm:$0xff]   ;;  %v3273_v38 = vrot.slane %v10457_v36, %v10405_v52 }
 0x330   :  { %5780 = vmatprep.subr.bf16.mxu0 %v9409_v33  ;;  %v3277_v33 = vrot.slane %v10457_v36, %v10411_v29 }
 0x332   :  { %4496 = vmatpush2.bf16.msra.mxu1 %v9356_v59 }
 0x333   :  { %4497 = vmatprep.subr.bf16.mxu1 %v9361_v60  ;;  %5781 = vmatpush2.bf16.msra.mxu0 %v9407_v61 }
 0x334   :  { %5782 = vmatprep.subr.bf16.mxu0 %v9412_v41 }
 0x336   :  { %4498 = vmatpush2.bf16.msra.mxu1 %v9359_v63 }
 0x337   :  { %4499 = vmatprep.subr.bf16.mxu1 %v9364_v42  ;;  %5783 = vmatpush2.bf16.msra.mxu0 %v9410_v0 }
 0x338   :  { %5784 = vmatprep.subr.bf16.mxu0 %v9415_v1 }
 0x33a   :  { %4500 = vmatpush2.bf16.msra.mxu1 %v9362_v2 }
 0x33b   :  { %4501 = vmatprep.subr.bf16.mxu1 %v9367_v3  ;;  %5785 = vmatpush2.bf16.msra.mxu0 %v9413_v6 }
 0x33c   :  { %5786 = vmatprep.subr.bf16.mxu0 %v9418_v12 }
 0x33e   :  { %4502 = vmatpush2.bf16.msra.mxu1 %v9365_v4 }
 0x33f   :  { %4503 = vmatprep.subr.bf16.mxu1 %v9370_v7  ;;  %5787 = vmatpush2.bf16.msra.mxu0 %v9416_v8 }
 0x340   :  { %5788 = vmatprep.subr.bf16.mxu0 %v9421_v10 }
 0x342   :  { %4504 = vmatpush2.bf16.msra.mxu1 %v9368_v54 }
 0x343   :  { %4505 = vmatprep.subr.bf16.mxu1 %v9373_v11  ;;  %5789 = vmatpush2.bf16.msra.mxu0 %v9419_v13 }
 0x344   :  { %5844 = vmatprep.subr.bf16.mxu0 %v9472_v34  ;;  %v9476_v34 = vld [vmem:[#allocation13 + $0x4c0] ss:$16 sps:$4 sm:$0xff]  }
 0x346   :  { %4506 = vmatpush2.bf16.msra.mxu1 %v9371_v9  ;;  %v4294_v30 = vpop.f32.mrf.mxu0 }
 0x347   :  { %5801 = vmatprep.subr.bf16.mxu1 %v9424_v14  ;;  %v4295_v60 = vadd.f32 %v4294_v30, %v3273_v38  ;;  %v9512_v30 = vld [vmem:[#allocation13 + $0x400] ss:$16 sps:$4 sm:$0xff]  }
 0x348   :  { %v4296_v53 = vpop.f32.mrf.mxu0 }
 0x349   :  { %4508 = vmatmul.mubr.bf16.vlgmr.msra.gmra.mxu1 %v10441_v43  ;;  %v9442_v43 = vld [vmem:[#allocation13 + $0x224] ss:$16 sps:$4 sm:$0xff]   ;;  %v4297_v41 = vadd.f32 %v4296_v53, %v3277_v33  ;;  %v3281_v53 = vrot.slane %v10457_v36, %v10428_v58 }
 0x34a   :  { %5802 = vmatpush1.bf16.msra.mxu1 %v9422_v15  ;;  %v4298_v59 = vpop.f32.mrf.mxu0 }
 0x34b   :  { %5803 = vmatprep.subr.bf16.mxu1 %v9427_v16  ;;  %v4299_v1 = vadd.f32 %v4298_v59, %v3273_v38  ;;  %v9518_v38 = vld [vmem:[#allocation13 + $0x5e0] ss:$16 sps:$4 sm:$0xff]   ;;  %v9526_v59 = vld [vmem:[#allocation13 + $0x5c4] ss:$16 sps:$4 sm:$0xff]  }
 0x34c   :  { %v4300_v42 = vpop.f32.mrf.mxu0 }
 0x34d   :  { %v4301_v12 = vadd.f32 %v4300_v42, %v3277_v33  ;;  %v9524_v42 = vld [vmem:[#allocation13 + $0x5c0] ss:$16 sps:$4 sm:$0xff]  }
 0x34e   :  { %5804 = vmatpush1.bf16.msra.mxu1 %v9425_v18 }
 0x34f   :  { %5805 = vmatprep.subr.bf16.mxu1 %v9430_v19 }
 0x352   :  { %5806 = vmatpush1.bf16.msra.mxu1 %v9428_v20 }
 0x353   :  { %5807 = vmatprep.subr.bf16.mxu1 %v9433_v44 }
 0x356   :  { %5808 = vmatpush1.bf16.msra.mxu1 %v9431_v21 }
 0x357   :  { %5809 = vmatprep.subr.bf16.mxu1 %v9436_v46 }
 0x35a   :  { %5810 = vmatpush1.bf16.msra.mxu1 %v9434_v25 }
 0x35b   :  { %5811 = vmatprep.subr.bf16.mxu1 %v9439_v26 }
 0x35e   :  { %5812 = vmatpush1.bf16.msra.mxu1 %v9437_v55 }
 0x35f   :  { %5813 = vmatprep.subr.bf16.mxu1 %v9442_v43 }
 0x362   :  { %5814 = vmatpush1.bf16.msra.mxu1 %v9440_v5 }
 0x363   :  { %5815 = vmatprep.subr.bf16.mxu1 %v9445_v27 }
 0x366   :  { %5816 = vmatpush1.bf16.msra.mxu1 %v9443_v28  ;;  %v9470_v28 = vld [vmem:[#allocation13 + $0x4e0] ss:$16 sps:$4 sm:$0xff]  }
 0x367   :  { %5817 = vmatprep.subr.bf16.mxu1 %v9448_v31 }
 0x36a   :  { %5818 = vmatpush2.bf16.msra.mxu1 %v9446_v32  ;;  %v9478_v32 = vld [vmem:[#allocation13 + $0x4c4] ss:$16 sps:$4 sm:$0xff]  }
 0x36b   :  { %5819 = vmatprep.subr.bf16.mxu1 %v9451_v35  ;;  %v9484_v35 = vld [vmem:[#allocation13 + $0x4a4] ss:$16 sps:$4 sm:$0xff]  }
 0x36e   :  { %5820 = vmatpush2.bf16.msra.mxu1 %v9449_v39  ;;  %v9482_v39 = vld [vmem:[#allocation13 + $0x4a0] ss:$16 sps:$4 sm:$0xff]  }
 0x36f   :  { %5821 = vmatprep.subr.bf16.mxu1 %v9454_v17  ;;  %v9490_v17 = vld [vmem:[#allocation13 + $0x484] ss:$16 sps:$4 sm:$0xff]  }
 0x372   :  { %5822 = vmatpush2.bf16.msra.mxu1 %v9452_v40  ;;  %v9488_v40 = vld [vmem:[#allocation13 + $0x480] ss:$16 sps:$4 sm:$0xff]  }
 0x373   :  { %5823 = vmatprep.subr.bf16.mxu1 %v9457_v45  ;;  %v9496_v45 = vld [vmem:[#allocation13 + $0x464] ss:$16 sps:$4 sm:$0xff]  }
 0x376   :  { %5824 = vmatpush2.bf16.msra.mxu1 %v9455_v48  ;;  %v9494_v48 = vld [vmem:[#allocation13 + $0x460] ss:$16 sps:$4 sm:$0xff]  }
 0x377   :  { %5825 = vmatprep.subr.bf16.mxu1 %v9460_v49  ;;  %v9502_v49 = vld [vmem:[#allocation13 + $0x444] ss:$16 sps:$4 sm:$0xff]  }
 0x37a   :  { %5826 = vmatpush2.bf16.msra.mxu1 %v9458_v50  ;;  %v9500_v50 = vld [vmem:[#allocation13 + $0x440] ss:$16 sps:$4 sm:$0xff]  }
 0x37b   :  { %5827 = vmatprep.subr.bf16.mxu1 %v9463_v51  ;;  %v9508_v51 = vld [vmem:[#allocation13 + $0x424] ss:$16 sps:$4 sm:$0xff]  }
 0x37e   :  { %5828 = vmatpush2.bf16.msra.mxu1 %v9461_v23  ;;  %v9506_v23 = vld [vmem:[#allocation13 + $0x420] ss:$16 sps:$4 sm:$0xff]  }
 0x37f   :  { %5829 = vmatprep.subr.bf16.mxu1 %v9466_v24 }
 0x382   :  { %5830 = vmatpush2.bf16.msra.mxu1 %v9464_v56  ;;  %v9514_v56 = vld [vmem:[#allocation13 + $0x404] ss:$16 sps:$4 sm:$0xff]  }
 0x383   :  { %5831 = vmatprep.subr.bf16.mxu1 %v9469_v47 }
 0x386   :  { %5832 = vmatpush2.bf16.msra.mxu1 %v9467_v37  ;;  %v4380_v24 = vpop.f32.mrf.mxu0  ;;  %v9520_v37 = vld [vmem:[#allocation13 + $0x5e4] ss:$16 sps:$4 sm:$0xff]  }
 0x387   :  { %5887 = vmatprep.subr.bf16.mxu1 %v9475_v57  ;;  %v3285_v57 = vrot.slane %v10457_v36, %v10432_v62 }
 0x388   :  { %v4382_v47 = vpop.f32.mrf.mxu0 }
 0x389   :  { %v4337_v61 = vpop.f32.mrf.mxu1 }
 0x38a   :  { %v4338_v63 = vadd.f32 %v4337_v61, %v4295_v60  ;;  %v4384_v33 = vpop.f32.mrf.mxu0  ;;  %v4381_v60 = vadd.f32 %v4380_v24, %v3281_v53 }
 0x38b   :  { %v4339_v0 = vpop.f32.mrf.mxu1 }
 0x38c   :  { %v4340_v2 = vadd.f32 %v4339_v0, %v4297_v41  ;;  %v4530_v3 = vmul.f32 0.70710677, %v4338_v63  ;;  %v4518_v25 = vmul.f32 0.5, %v4338_v63  ;;  %v4383_v41 = vadd.f32 %v4382_v47, %v3285_v57  ;;  %v4386_v0 = vpop.f32.mrf.mxu0 }
 0x38d   :  { %v4341_v6 = vpop.f32.mrf.mxu1 }
 0x38e   :  { %v4531_v4 = vmul.f32 0.70710677, %v4340_v2  ;;  %v4342_v7 = vadd.f32 %v4341_v6, %v4299_v1  ;;  %v4519_v44 = vmul.f32 0.5, %v4340_v2  ;;  %v9532_v2 = vld [vmem:[#allocation13 + $0x5a4] ss:$16 sps:$4 sm:$0xff]  }
 0x38f   :  { %v4343_v8 = vpop.f32.mrf.mxu1 }
 0x390   :  { %9966 = verf.f32 %v4531_v4  ;;  %v4536_v10 = vmul.f32 0.70710677, %v4342_v7  ;;  %v4344_v54 = vadd.f32 %v4343_v8, %v4301_v12  ;;  %v4524_v20 = vmul.f32 0.5, %v4342_v7 }
 0x391   :  { %9968 = verf.f32 %v4530_v3  ;;  %v4385_v3 = vadd.f32 %v4384_v33, %v3281_v53  ;;  %v4387_v7 = vadd.f32 %v4386_v0, %v3285_v57  ;;  %v9479_v53 = vld [vmem:[#allocation13 + $0xc8] ss:$16 sps:$4 sm:$0xff]   ;;  %v9487_v57 = vld [vmem:[#allocation13 + $0xac] ss:$16 sps:$4 sm:$0xff]  }
 0x392   :  { %9970 = verf.f32 %v4536_v10  ;;  %v4537_v11 = vmul.f32 0.70710677, %v4344_v54  ;;  %v4525_v21 = vmul.f32 0.5, %v4344_v54  ;;  %v9530_v54 = vld [vmem:[#allocation13 + $0x5a0] ss:$16 sps:$4 sm:$0xff]  }
 0x393   :  { %v9493_v33 = vld [vmem:[#allocation13 + $0x8c] ss:$16 sps:$4 sm:$0xff]  }
 0x394   :  { %9972 = verf.f32 %v4537_v11 }
 0x39d   :  { %v9967_v13 = vpop.eup %9966 }
 0x39e   :  { %v9969_v9 = vpop.eup %9968  ;;  %v4555_v15 = vadd.f32 1.0, %v9967_v13  ;;  %v9538_v13 = vld [vmem:[#allocation13 + $0x584] ss:$16 sps:$4 sm:$0xff]  }
 0x39f   :  { %v9971_v14 = vpop.eup %9970  ;;  %v4554_v19 = vadd.f32 1.0, %v9969_v9 }
 0x3a0   :  { %v4560_v16 = vadd.f32 1.0, %v9971_v14  ;;  %v4567_v55 = vmul.f32 %v4555_v15, %v4519_v44  ;;  %v9548_v44 = vld [vmem:[#allocation13 + $0x540] ss:$16 sps:$4 sm:$0xff]  }
 0x3a1   :  { %v9973_v18 = vpop.eup %9972  ;;  %v4566_v5 = vmul.f32 %v4554_v19, %v4518_v25  ;;  %v9542_v19 = vld [vmem:[#allocation13 + $0x560] ss:$16 sps:$4 sm:$0xff]  }
 0x3a2   :  { %v4561_v46 = vadd.f32 1.0, %v9973_v18  ;;  %v4572_v26 = vmul.f32 %v4560_v16, %v4524_v20  ;;  %v9536_v16 = vld [vmem:[#allocation13 + $0x580] ss:$16 sps:$4 sm:$0xff]   ;;  %v9544_v18 = vld [vmem:[#allocation13 + $0x564] ss:$16 sps:$4 sm:$0xff]  }
 0x3a3   :  { %v9550_v20 = vld [vmem:[#allocation13 + $0x544] ss:$16 sps:$4 sm:$0xff]  }
 0x3a4   :  { %v4573_v43 = vmul.f32 %v4561_v46, %v4525_v21  ;;  %v10465_v31 = vpack.c.bf16 %v4572_v26, %v4566_v5  ;;  %v9556_v21 = vld [vmem:[#allocation13 + $0x524] ss:$16 sps:$4 sm:$0xff]   ;;  %v9554_v26 = vld [vmem:[#allocation13 + $0x520] ss:$16 sps:$4 sm:$0xff]  }
 0x3a6   :  { %v10463_v27 = vpack.c.bf16 %v4573_v43, %v4567_v55  ;;  %v9562_v43 = vld [vmem:[#allocation13 + $0x504] ss:$16 sps:$4 sm:$0xff]  }
 0x3a8   :  { %5790 = vmatprep.mubr.bf16.mxu0 %v10463_v27 }
 0x3a9   :  { %5791 = vmatmul.mubr.bf16.vlgmr.msra.gmra.mxu0 %v10465_v31 }
 0x3aa   :  { %5845 = vmatpush1.bf16.msra.mxu0 %v9470_v28 }
 0x3ab   :  { %5846 = vmatprep.subr.bf16.mxu0 %v9478_v32 }
 0x3ae   :  { %5847 = vmatpush1.bf16.msra.mxu0 %v9476_v34 }
 0x3af   :  { %5848 = vmatprep.subr.bf16.mxu0 %v9484_v35 }
 0x3b2   :  { %5849 = vmatpush1.bf16.msra.mxu0 %v9482_v39 }
 0x3b3   :  { %5850 = vmatprep.subr.bf16.mxu0 %v9490_v17 }
 0x3b6   :  { %5851 = vmatpush1.bf16.msra.mxu0 %v9488_v40 }
 0x3b7   :  { %5852 = vmatprep.subr.bf16.mxu0 %v9496_v45  ;;  %v9560_v45 = vld [vmem:[#allocation13 + $0x500] ss:$16 sps:$4 sm:$0xff]  }
 0x3ba   :  { %5853 = vmatpush1.bf16.msra.mxu0 %v9494_v48 }
 0x3bb   :  { %5854 = vmatprep.subr.bf16.mxu0 %v9502_v49 }
 0x3be   :  { %5855 = vmatpush1.bf16.msra.mxu0 %v9500_v50  ;;  %v9568_v50 = vld [vmem:[#allocation13 + $0x2ec] ss:$16 sps:$4 sm:$0xff]  }
 0x3bf   :  { %5856 = vmatprep.subr.bf16.mxu0 %v9508_v51 }
 0x3c2   :  { %5857 = vmatpush1.bf16.msra.mxu0 %v9506_v23 }
 0x3c3   :  { %5858 = vmatprep.subr.bf16.mxu0 %v9514_v56 }
 0x3c6   :  { %5859 = vmatpush1.bf16.msra.mxu0 %v9512_v30  ;;  %v9473_v30 = vld [vmem:[#allocation13 + $0xe8] ss:$16 sps:$4 sm:$0xff]   ;;  %v4466_v0 = vpop.f32.mrf.mxu0 }
 0x3c7   :  { %5860 = vmatprep.subr.bf16.mxu0 %v9520_v37  ;;  %v9481_v37 = vld [vmem:[#allocation13 + $0xcc] ss:$16 sps:$4 sm:$0xff]  }
 0x3c9   :  { %v4423_v61 = vpop.f32.mrf.mxu1 }
 0x3ca   :  { %v4424_v63 = vadd.f32 %v4423_v61, %v4381_v60  ;;  %5861 = vmatpush2.bf16.msra.mxu0 %v9518_v38  ;;  %v9485_v38 = vld [vmem:[#allocation13 + $0xa8] ss:$16 sps:$4 sm:$0xff]   ;;  %v9499_v60 = vld [vmem:[#allocation13 + $0x6c] ss:$16 sps:$4 sm:$0xff]  }
 0x3cb   :  { %v4425_v1 = vpop.f32.mrf.mxu1  ;;  %5862 = vmatprep.subr.bf16.mxu0 %v9526_v59  ;;  %v9491_v59 = vld [vmem:[#allocation13 + $0x88] ss:$16 sps:$4 sm:$0xff]  }
 0x3cc   :  { %v4426_v6 = vadd.f32 %v4425_v1, %v4383_v41  ;;  %v4532_v12 = vmul.f32 0.70710677, %v4424_v63  ;;  %v4520_v48 = vmul.f32 0.5, %v4424_v63  ;;  %v9497_v61 = vld [vmem:[#allocation13 + $0x68] ss:$16 sps:$4 sm:$0xff]  }
 0x3cd   :  { %v4427_v4 = vpop.f32.mrf.mxu1  ;;  %v9505_v41 = vld [vmem:[#allocation13 + $0x4c] ss:$16 sps:$4 sm:$0xff]   ;;  %v9503_v63 = vld [vmem:[#allocation13 + $0x48] ss:$16 sps:$4 sm:$0xff]  }
 0x3ce   :  { %v4533_v8 = vmul.f32 0.70710677, %v4426_v6  ;;  %v4428_v10 = vadd.f32 %v4427_v4, %v4385_v3  ;;  %5863 = vmatpush2.bf16.msra.mxu0 %v9524_v42  ;;  %v4521_v39 = vmul.f32 0.5, %v4426_v6  ;;  %v9511_v42 = vld [vmem:[#allocation13 + $0x2c] ss:$16 sps:$4 sm:$0xff]   ;;  %v3292_v3 = vsub.s32 5, %v10396_v22 }
 0x3cf   :  { %v4429_v11 = vpop.f32.mrf.mxu1  ;;  %5864 = vmatprep.subr.bf16.mxu0 %v9532_v2  ;;  %v9517_v1 = vld [vmem:[#allocation13 + $0xc] ss:$16 sps:$4 sm:$0xff]   ;;  %v3288_v2 = vsub.s32 4, %v10396_v22  ;;  %v9515_v6 = vld [vmem:[#allocation13 + $0x8] ss:$16 sps:$4 sm:$0xff]  }
 0x3d0   :  { %9974 = verf.f32 %v4533_v8  ;;  %v4538_v9 = vmul.f32 0.70710677, %v4428_v10  ;;  %v4430_v14 = vadd.f32 %v4429_v11, %v4387_v7  ;;  %v4526_v35 = vmul.f32 0.5, %v4428_v10  ;;  %v9523_v4 = vld [vmem:[#allocation13 + $0x1ec] ss:$16 sps:$4 sm:$0xff]  }
 0x3d1   :  { %9976 = verf.f32 %v4532_v12  ;;  %v4468_v12 = vpop.f32.mrf.mxu0  ;;  %v3289_v7 = vrot.slane %v10457_v36, %v3288_v2  ;;  %v3293_v8 = vrot.slane %v10457_v36, %v3292_v3  ;;  %v9521_v10 = vld [vmem:[#allocation13 + $0x1e8] ss:$16 sps:$4 sm:$0xff]   ;;  %v9529_v11 = vld [vmem:[#allocation13 + $0x1cc] ss:$16 sps:$4 sm:$0xff]  }
 0x3d2   :  { %9978 = verf.f32 %v4538_v9  ;;  %v4539_v15 = vmul.f32 0.70710677, %v4430_v14  ;;  %5865 = vmatpush2.bf16.msra.mxu0 %v9530_v54  ;;  %v4527_v17 = vmul.f32 0.5, %v4430_v14 }
 0x3d3   :  { %5866 = vmatprep.subr.bf16.mxu0 %v9538_v13  ;;  %v4470_v54 = vpop.f32.mrf.mxu0  ;;  %v4467_v13 = vadd.f32 %v4466_v0, %v3289_v7  ;;  %v4469_v14 = vadd.f32 %v4468_v12, %v3293_v8 }
 0x3d4   :  { %9980 = verf.f32 %v4539_v15 }
 0x3d6   :  { %5867 = vmatpush2.bf16.msra.mxu0 %v9536_v16  ;;  %v9527_v16 = vld [vmem:[#allocation13 + $0x1c8] ss:$16 sps:$4 sm:$0xff]  }
 0x3d7   :  { %5868 = vmatprep.subr.bf16.mxu0 %v9544_v18  ;;  %v4472_v18 = vpop.f32.mrf.mxu0 }
 0x3d8   :  { %v4473_v36 = vadd.f32 %v4472_v18, %v3293_v8  ;;  %v9589_v18 = vld [vmem:[#allocation13 + $0x48c] ss:$16 sps:$4 sm:$0xff]  }
 0x3da   :  { %5869 = vmatpush2.bf16.msra.mxu0 %v9542_v19 }
 0x3db   :  { %5870 = vmatprep.subr.bf16.mxu0 %v9550_v20  ;;  %v9535_v20 = vld [vmem:[#allocation13 + $0x1ac] ss:$16 sps:$4 sm:$0xff]  }
 0x3dd   :  { %v9975_v46 = vpop.eup %9974 }
 0x3de   :  { %v9977_v25 = vpop.eup %9976  ;;  %5871 = vmatpush2.bf16.msra.mxu0 %v9548_v44  ;;  %v4557_v5 = vadd.f32 1.0, %v9975_v46  ;;  %v4471_v44 = vadd.f32 %v4470_v54, %v3289_v7  ;;  %v9569_v7 = vld [vmem:[#allocation13 + $0x4e8] ss:$16 sps:$4 sm:$0xff]   ;;  %v9577_v54 = vld [vmem:[#allocation13 + $0x4cc] ss:$16 sps:$4 sm:$0xff]  }
 0x3df   :  { %v9979_v55 = vpop.eup %9978  ;;  %5872 = vmatprep.subr.bf16.mxu0 %v9556_v21  ;;  %v4556_v34 = vadd.f32 1.0, %v9977_v25 }
 0x3e0   :  { %v4562_v28 = vadd.f32 1.0, %v9979_v55  ;;  %v4569_v51 = vmul.f32 %v4557_v5, %v4521_v39  ;;  %v9539_v39 = vld [vmem:[#allocation13 + $0x188] ss:$16 sps:$4 sm:$0xff]  }
 0x3e1   :  { %v9981_v32 = vpop.eup %9980  ;;  %v4568_v24 = vmul.f32 %v4556_v34, %v4520_v48  ;;  %v9551_v48 = vld [vmem:[#allocation13 + $0x148] ss:$16 sps:$4 sm:$0xff]  }
 0x3e2   :  { %v4563_v40 = vadd.f32 1.0, %v9981_v32  ;;  %5873 = vmatpush2.bf16.msra.mxu0 %v9554_v26  ;;  %v4574_v49 = vmul.f32 %v4562_v28, %v4526_v35  ;;  %v9541_v28 = vld [vmem:[#allocation13 + $0x18c] ss:$16 sps:$4 sm:$0xff]  }
 0x3e3   :  { %5874 = vmatprep.subr.bf16.mxu0 %v9562_v43  ;;  %v9533_v43 = vld [vmem:[#allocation13 + $0x1a8] ss:$16 sps:$4 sm:$0xff]  }
 0x3e4   :  { %v4575_v23 = vmul.f32 %v4563_v40, %v4527_v17  ;;  %v10475_v47 = vpack.c.bf16 %v4574_v49, %v4568_v24  ;;  %v9547_v17 = vld [vmem:[#allocation13 + $0x16c] ss:$16 sps:$4 sm:$0xff]   ;;  %v9545_v40 = vld [vmem:[#allocation13 + $0x168] ss:$16 sps:$4 sm:$0xff]  }
 0x3e5   :  { %v9559_v49 = vld [vmem:[#allocation13 + $0x12c] ss:$16 sps:$4 sm:$0xff]  }
 0x3e6   :  { %v10473_v56 = vpack.c.bf16 %v4575_v23, %v4569_v51  ;;  %5875 = vmatpush2.bf16.msra.mxu0 %v9560_v45  ;;  %v9553_v45 = vld [vmem:[#allocation13 + $0x14c] ss:$16 sps:$4 sm:$0xff]   ;;  %v9557_v23 = vld [vmem:[#allocation13 + $0x128] ss:$16 sps:$4 sm:$0xff]  }
 0x3e7   :  { %5930 = vmatprep.subr.bf16.mxu0 %v9568_v50 }
 0x3e8   :  { %5833 = vmatprep.mubr.bf16.mxu1 %v10473_v56 }
 0x3e9   :  { %5834 = vmatmul.mubr.bf16.vlgmr.msra.gmra.mxu1 %v10475_v47 }
 0x3ea   :  { %5888 = vmatpush1.bf16.msra.mxu1 %v9473_v30  ;;  %5919 = vmatprep.mubr.bf16.mxu1 %v10463_v27  ;;  %v9509_v27 = vld [vmem:[#allocation13 + $0x28] ss:$16 sps:$4 sm:$0xff]   ;;  %v9565_v30 = vld [vmem:[#allocation13 + $0x10c] ss:$16 sps:$4 sm:$0xff]  }
 0x3eb   :  { %5889 = vmatprep.subr.bf16.mxu1 %v9481_v37 }
 0x3ee   :  { %5890 = vmatpush1.bf16.msra.mxu1 %v9479_v53 }
 0x3ef   :  { %5891 = vmatprep.subr.bf16.mxu1 %v9487_v57 }
 0x3f2   :  { %5892 = vmatpush1.bf16.msra.mxu1 %v9485_v38 }
 0x3f3   :  { %5893 = vmatprep.subr.bf16.mxu1 %v9493_v33 }
 0x3f6   :  { %5894 = vmatpush1.bf16.msra.mxu1 %v9491_v59 }
 0x3f7   :  { %5895 = vmatprep.subr.bf16.mxu1 %v9499_v60 }
 0x3fa   :  { %5896 = vmatpush1.bf16.msra.mxu1 %v9497_v61 }
 0x3fb   :  { %5897 = vmatprep.subr.bf16.mxu1 %v9505_v41  ;;  %v9563_v41 = vld [vmem:[#allocation13 + $0x108] ss:$16 sps:$4 sm:$0xff]  }
 0x3fe   :  { %5898 = vmatpush1.bf16.msra.mxu1 %v9503_v63 }
 0x3ff   :  { %5899 = vmatprep.subr.bf16.mxu1 %v9511_v42 }
 0x402   :  { %5900 = vmatpush1.bf16.msra.mxu1 %v9509_v27  ;;  %v9571_v27 = vld [vmem:[#allocation13 + $0x4ec] ss:$16 sps:$4 sm:$0xff]  }
 0x403   :  { %5901 = vmatprep.subr.bf16.mxu1 %v9517_v1 }
 0x406   :  { %5902 = vmatpush1.bf16.msra.mxu1 %v9515_v6 }
 0x407   :  { %5903 = vmatprep.subr.bf16.mxu1 %v9523_v4  ;;  %v9566_v4 = vld [vmem:[#allocation13 + $0x2e8] ss:$16 sps:$4 sm:$0xff]  }
 0x409   :  { %v4509_v9 = vpop.f32.mrf.mxu1 }
 0x40a   :  { %v4510_v15 = vadd.f32 %v4509_v9, %v4467_v13  ;;  %5904 = vmatpush2.bf16.msra.mxu1 %v9521_v10  ;;  %v9574_v10 = vld [vmem:[#allocation13 + $0x2cc] ss:$16 sps:$4 sm:$0xff]   ;;  %v9575_v13 = vld [vmem:[#allocation13 + $0x4c8] ss:$16 sps:$4 sm:$0xff]  }
 0x40b   :  { %v4511_v19 = vpop.f32.mrf.mxu1  ;;  %5905 = vmatprep.subr.bf16.mxu1 %v9529_v11  ;;  %v9572_v11 = vld [vmem:[#allocation13 + $0x2c8] ss:$16 sps:$4 sm:$0xff]   ;;  %v9580_v9 = vld [vmem:[#allocation13 + $0x2ac] ss:$16 sps:$4 sm:$0xff]  }
 0x40c   :  { %v4512_v21 = vadd.f32 %v4511_v19, %v4469_v14  ;;  %v4534_v46 = vmul.f32 0.70710677, %v4510_v15  ;;  %v4522_v63 = vmul.f32 0.5, %v4510_v15  ;;  %v9583_v14 = vld [vmem:[#allocation13 + $0x4ac] ss:$16 sps:$4 sm:$0xff]  }
 0x40d   :  { %v4513_v25 = vpop.f32.mrf.mxu1  ;;  %v9578_v15 = vld [vmem:[#allocation13 + $0x2a8] ss:$16 sps:$4 sm:$0xff]  }
 0x40e   :  { %v4535_v26 = vmul.f32 0.70710677, %v4512_v21  ;;  %v4514_v55 = vadd.f32 %v4513_v25, %v4471_v44  ;;  %5906 = vmatpush2.bf16.msra.mxu1 %v9527_v16  ;;  %v4523_v59 = vmul.f32 0.5, %v4512_v21  ;;  %v9581_v16 = vld [vmem:[#allocation13 + $0x4a8] ss:$16 sps:$4 sm:$0xff]  }
 0x40f   :  { %v4515_v5 = vpop.f32.mrf.mxu1  ;;  %5907 = vmatprep.subr.bf16.mxu1 %v9535_v20  ;;  %v9584_v19 = vld [vmem:[#allocation13 + $0x288] ss:$16 sps:$4 sm:$0xff]   ;;  %v9592_v44 = vld [vmem:[#allocation13 + $0x26c] ss:$16 sps:$4 sm:$0xff]  }
 0x410   :  { %9982 = verf.f32 %v4535_v26  ;;  %v4540_v32 = vmul.f32 0.70710677, %v4514_v55  ;;  %v4516_v34 = vadd.f32 %v4515_v5, %v4473_v36  ;;  %v4528_v33 = vmul.f32 0.5, %v4514_v55  ;;  %v9587_v20 = vld [vmem:[#allocation13 + $0x488] ss:$16 sps:$4 sm:$0xff]  }
 0x411   :  { %9984 = verf.f32 %v4534_v46  ;;  %v9590_v21 = vld [vmem:[#allocation13 + $0x268] ss:$16 sps:$4 sm:$0xff]   ;;  %v9598_v25 = vld [vmem:[#allocation13 + $0x24c] ss:$16 sps:$4 sm:$0xff]  }
 0x412   :  { %9986 = verf.f32 %v4540_v32  ;;  %v4541_v35 = vmul.f32 0.70710677, %v4516_v34  ;;  %5908 = vmatpush2.bf16.msra.mxu1 %v9533_v43  ;;  %v4529_v60 = vmul.f32 0.5, %v4516_v34  ;;  %v9593_v46 = vld [vmem:[#allocation13 + $0x468] ss:$16 sps:$4 sm:$0xff]  }
 0x413   :  { %5909 = vmatprep.subr.bf16.mxu1 %v9541_v28  ;;  %v9601_v36 = vld [vmem:[#allocation13 + $0x44c] ss:$16 sps:$4 sm:$0xff]   ;;  %v9596_v26 = vld [vmem:[#allocation13 + $0x248] ss:$16 sps:$4 sm:$0xff]  }
 0x414   :  { %9988 = verf.f32 %v4541_v35  ;;  %v9599_v55 = vld [vmem:[#allocation13 + $0x448] ss:$16 sps:$4 sm:$0xff]   ;;  %v9604_v43 = vld [vmem:[#allocation13 + $0x22c] ss:$16 sps:$4 sm:$0xff]  }
 0x415   :  { %v9607_v5 = vld [vmem:[#allocation13 + $0x42c] ss:$16 sps:$4 sm:$0xff]   ;;  %v9602_v28 = vld [vmem:[#allocation13 + $0x228] ss:$16 sps:$4 sm:$0xff]  }
 0x416   :  { %5910 = vmatpush2.bf16.msra.mxu1 %v9539_v39  ;;  %v9605_v32 = vld [vmem:[#allocation13 + $0x428] ss:$16 sps:$4 sm:$0xff]   ;;  %v9610_v34 = vld [vmem:[#allocation13 + $0x20c] ss:$16 sps:$4 sm:$0xff]  }
 0x417   :  { %5911 = vmatprep.subr.bf16.mxu1 %v9547_v17  ;;  %v9613_v35 = vld [vmem:[#allocation13 + $0x40c] ss:$16 sps:$4 sm:$0xff]   ;;  %v9608_v39 = vld [vmem:[#allocation13 + $0x208] ss:$16 sps:$4 sm:$0xff]  }
 0x418   :  { %v9611_v17 = vld [vmem:[#allocation13 + $0x408] ss:$16 sps:$4 sm:$0xff]  }
 0x41a   :  { %5912 = vmatpush2.bf16.msra.mxu1 %v9545_v40  ;;  %v9616_v40 = vld [vmem:[#allocation13 + $0x3ec] ss:$16 sps:$4 sm:$0xff]  }
 0x41b   :  { %5913 = vmatprep.subr.bf16.mxu1 %v9553_v45  ;;  %v9619_v45 = vld [vmem:[#allocation13 + $0x5ec] ss:$16 sps:$4 sm:$0xff]  }
 0x41d   :  { %v9983_v50 = vpop.eup %9982 }
 0x41e   :  { %v9985_v51 = vpop.eup %9984  ;;  %5914 = vmatpush2.bf16.msra.mxu1 %v9551_v48  ;;  %v4559_v37 = vadd.f32 1.0, %v9983_v50  ;;  %v9614_v48 = vld [vmem:[#allocation13 + $0x3e8] ss:$16 sps:$4 sm:$0xff]   ;;  %v9622_v50 = vld [vmem:[#allocation13 + $0x3cc] ss:$16 sps:$4 sm:$0xff]  }
 0x41f   :  { %v9987_v24 = vpop.eup %9986  ;;  %5915 = vmatprep.subr.bf16.mxu1 %v9559_v49  ;;  %v4558_v38 = vadd.f32 1.0, %v9985_v51  ;;  %v9617_v49 = vld [vmem:[#allocation13 + $0x5e8] ss:$16 sps:$4 sm:$0xff]   ;;  %v9625_v51 = vld [vmem:[#allocation13 + $0x5cc] ss:$16 sps:$4 sm:$0xff]  }
 0x420   :  { %v4564_v53 = vadd.f32 1.0, %v9987_v24  ;;  %v4571_v0 = vmul.f32 %v4559_v37, %v4523_v59  ;;  %v9623_v24 = vld [vmem:[#allocation13 + $0x5c8] ss:$16 sps:$4 sm:$0xff]   ;;  %v9631_v37 = vld [vmem:[#allocation13 + $0x5ac] ss:$16 sps:$4 sm:$0xff]  }
 0x421   :  { %v9989_v57 = vpop.eup %9988  ;;  %v4570_v6 = vmul.f32 %v4558_v38, %v4522_v63  ;;  %v9634_v38 = vld [vmem:[#allocation13 + $0x38c] ss:$16 sps:$4 sm:$0xff]   ;;  %v9632_v59 = vld [vmem:[#allocation13 + $0x388] ss:$16 sps:$4 sm:$0xff]  }
 0x422   :  { %v4565_v61 = vadd.f32 1.0, %v9989_v57  ;;  %5916 = vmatpush2.bf16.msra.mxu1 %v9557_v23  ;;  %v4576_v42 = vmul.f32 %v4564_v53, %v4528_v33  ;;  %v9620_v23 = vld [vmem:[#allocation13 + $0x3c8] ss:$16 sps:$4 sm:$0xff]   ;;  %v9637_v33 = vld [vmem:[#allocation13 + $0x58c] ss:$16 sps:$4 sm:$0xff]  }
 0x423   :  { %5917 = vmatprep.subr.bf16.mxu1 %v9565_v30  ;;  %v9628_v30 = vld [vmem:[#allocation13 + $0x3ac] ss:$16 sps:$4 sm:$0xff]   ;;  %v9626_v53 = vld [vmem:[#allocation13 + $0x3a8] ss:$16 sps:$4 sm:$0xff]  }
 0x424   :  { %v4577_v1 = vmul.f32 %v4565_v61, %v4529_v60  ;;  %v10488_v8 = vpack.c.bf16 %v4576_v42, %v4570_v6  ;;  %v9629_v57 = vld [vmem:[#allocation13 + $0x5a8] ss:$16 sps:$4 sm:$0xff]   ;;  %v9640_v61 = vld [vmem:[#allocation13 + $0x36c] ss:$16 sps:$4 sm:$0xff]  }
 0x425   :  { %v9635_v60 = vld [vmem:[#allocation13 + $0x588] ss:$16 sps:$4 sm:$0xff]  }
 0x426   :  { %5918 = vmatpush2.bf16.msra.mxu1 %v9563_v41  ;;  %v4583_v12 = vpack.c.bf16 %v4577_v1, %v4571_v0  ;;  %v9643_v41 = vld [vmem:[#allocation13 + $0x56c] ss:$16 sps:$4 sm:$0xff]   ;;  %v9638_v63 = vld [vmem:[#allocation13 + $0x368] ss:$16 sps:$4 sm:$0xff]  }
 0x427   :  { %5973 = vmatprep.subr.bf16.mxu1 %v9571_v27  ;;  %v9641_v42 = vld [vmem:[#allocation13 + $0x568] ss:$16 sps:$4 sm:$0xff]   ;;  %v9646_v27 = vld [vmem:[#allocation13 + $0x34c] ss:$16 sps:$4 sm:$0xff]  }
 0x428   :  { %5876 = vmatprep.mubr.bf16.mxu0 %v4583_v12  ;;  %v9649_v0 = vld [vmem:[#allocation13 + $0x54c] ss:$16 sps:$4 sm:$0xff]   ;;  %v9644_v1 = vld [vmem:[#allocation13 + $0x348] ss:$16 sps:$4 sm:$0xff]  }
 0x429   :  { %5920 = vmatmul.mubr.bf16.vlgmr.msra.gmra.mxu1 %v10465_v31  ;;  %5877 = vmatmul.mubr.bf16.vlgmr.msra.gmra.mxu0 %v10488_v8  ;;  %v9586_v31 = vld [vmem:[#allocation13 + $0x28c] ss:$16 sps:$4 sm:$0xff]   ;;  %v9647_v6 = vld [vmem:[#allocation13 + $0x548] ss:$16 sps:$4 sm:$0xff]  }
 0x42a   :  { %5931 = vmatpush1.bf16.msra.mxu0 %v9566_v4  ;;  %5974 = vmatpush1.bf16.msra.mxu1 %v9569_v7  ;;  %v9655_v4 = vld [vmem:[#allocation13 + $0x52c] ss:$16 sps:$4 sm:$0xff]   ;;  %v9650_v7 = vld [vmem:[#allocation13 + $0x328] ss:$16 sps:$4 sm:$0xff]  }
 0x42b   :  { %6005 = vmatprep.mubr.bf16.mxu1 %v4583_v12  ;;  %5962 = vmatprep.mubr.bf16.mxu0 %v10473_v56  ;;  %v9595_v56 = vld [vmem:[#allocation13 + $0x46c] ss:$16 sps:$4 sm:$0xff]  }
 0x42c   :  { %5932 = vmatprep.subr.bf16.mxu0 %v9574_v10  ;;  %5975 = vmatprep.subr.bf16.mxu1 %v9577_v54  ;;  %v9652_v12 = vld [vmem:[#allocation13 + $0x32c] ss:$16 sps:$4 sm:$0xff]   ;;  %v9653_v10 = vld [vmem:[#allocation13 + $0x528] ss:$16 sps:$4 sm:$0xff]  }
 0x42d   :  { %v9658_v54 = vld [vmem:[#allocation13 + $0x30c] ss:$16 sps:$4 sm:$0xff]  }
 0x42e   :  { %5933 = vmatpush1.bf16.msra.mxu0 %v9572_v11  ;;  %5976 = vmatpush1.bf16.msra.mxu1 %v9575_v13  ;;  %v9661_v11 = vld [vmem:[#allocation13 + $0x50c] ss:$16 sps:$4 sm:$0xff]   ;;  %v9656_v13 = vld [vmem:[#allocation13 + $0x308] ss:$16 sps:$4 sm:$0xff]  }
 0x42f   :  { %5934 = vmatprep.subr.bf16.mxu0 %v9580_v9  ;;  %5977 = vmatprep.subr.bf16.mxu1 %v9583_v14  ;;  %v9659_v9 = vld [vmem:[#allocation13 + $0x508] ss:$16 sps:$4 sm:$0xff]   ;;  %v9664_v14 = vld [vmem:[#allocation14 + $0x154] ss:$24 sps:$4 sm:$0xff]  }
 0x432   :  { %5935 = vmatpush1.bf16.msra.mxu0 %v9578_v15  ;;  %5978 = vmatpush1.bf16.msra.mxu1 %v9581_v16  ;;  %v9662_v15 = vld [vmem:[#allocation14 + $0x150] ss:$24 sps:$4 sm:$0xff]   ;;  %v9667_v16 = vld [vmem:[#allocation14 + $0x124] ss:$24 sps:$4 sm:$0xff]  }
 0x433   :  { %5936 = vmatprep.subr.bf16.mxu0 %v9586_v31  ;;  %5979 = vmatprep.subr.bf16.mxu1 %v9589_v18  ;;  %v9665_v31 = vld [vmem:[#allocation14 + $0x120] ss:$24 sps:$4 sm:$0xff]   ;;  %v9670_v18 = vld [vmem:[#allocation14 + $0xf4] ss:$24 sps:$4 sm:$0xff]  }
 0x436   :  { %5937 = vmatpush1.bf16.msra.mxu0 %v9584_v19  ;;  %5980 = vmatpush1.bf16.msra.mxu1 %v9587_v20  ;;  %v9668_v19 = vld [vmem:[#allocation14 + $0xf0] ss:$24 sps:$4 sm:$0xff]   ;;  %v9673_v20 = vld [vmem:[#allocation14 + $0xc4] ss:$24 sps:$4 sm:$0xff]  }
 0x437   :  { %5938 = vmatprep.subr.bf16.mxu0 %v9592_v44  ;;  %5981 = vmatprep.subr.bf16.mxu1 %v9595_v56  ;;  %v9671_v44 = vld [vmem:[#allocation14 + $0xc0] ss:$24 sps:$4 sm:$0xff]   ;;  %v9676_v56 = vld [vmem:[#allocation14 + $0x94] ss:$24 sps:$4 sm:$0xff]  }
 0x43a   :  { %5939 = vmatpush1.bf16.msra.mxu0 %v9590_v21  ;;  %5982 = vmatpush1.bf16.msra.mxu1 %v9593_v46  ;;  %v9674_v21 = vld [vmem:[#allocation14 + $0x90] ss:$24 sps:$4 sm:$0xff]   ;;  %v9679_v46 = vld [vmem:[#allocation14 + $0x64] ss:$24 sps:$4 sm:$0xff]  }
 0x43b   :  { %5940 = vmatprep.subr.bf16.mxu0 %v9598_v25  ;;  %5983 = vmatprep.subr.bf16.mxu1 %v9601_v36  ;;  %v9680_v25 = vld [vmem:[#allocation14 + $0x30] ss:$24 sps:$4 sm:$0xff]   ;;  %v9685_v36 = vld [vmem:[#allocation14 + $0x4] ss:$24 sps:$4 sm:$0xff]  }
 0x43e   :  { %5941 = vmatpush1.bf16.msra.mxu0 %v9596_v26  ;;  %5984 = vmatpush1.bf16.msra.mxu1 %v9599_v55  ;;  %v9683_v26 = vld [vmem:[#allocation14] ss:$24 sps:$4 sm:$0xff]   ;;  %v9688_v55 = vld [vmem:[#allocation14 + $0x2d4] ss:$24 sps:$4 sm:$0xff]  }
 0x43f   :  { %5942 = vmatprep.subr.bf16.mxu0 %v9604_v43  ;;  %5985 = vmatprep.subr.bf16.mxu1 %v9607_v5  ;;  %v9686_v43 = vld [vmem:[#allocation14 + $0x2d0] ss:$24 sps:$4 sm:$0xff]   ;;  %v9691_v5 = vld [vmem:[#allocation14 + $0x2a4] ss:$24 sps:$4 sm:$0xff]  }
 0x442   :  { %5943 = vmatpush1.bf16.msra.mxu0 %v9602_v28  ;;  %5986 = vmatpush1.bf16.msra.mxu1 %v9605_v32  ;;  %v9713_v28 = vld [vmem:[#allocation14 + $0x450] ss:$24 sps:$4 sm:$0xff]   ;;  %v9715_v32 = vld [vmem:[#allocation14 + $0x454] ss:$24 sps:$4 sm:$0xff]  }
 0x443   :  { %5944 = vmatprep.subr.bf16.mxu0 %v9610_v34  ;;  %5987 = vmatprep.subr.bf16.mxu1 %v9613_v35  ;;  %v9689_v34 = vld [vmem:[#allocation14 + $0x2a0] ss:$24 sps:$4 sm:$0xff]   ;;  %v9694_v35 = vld [vmem:[#allocation14 + $0x274] ss:$24 sps:$4 sm:$0xff]  }
 0x446   :  { %5945 = vmatpush1.bf16.msra.mxu0 %v9608_v39  ;;  %5988 = vmatpush1.bf16.msra.mxu1 %v9611_v17  ;;  %v9721_v39 = vld [vmem:[#allocation14 + $0x424] ss:$24 sps:$4 sm:$0xff]   ;;  %v9719_v17 = vld [vmem:[#allocation14 + $0x420] ss:$24 sps:$4 sm:$0xff]  }
 0x447   :  { %5946 = vmatprep.subr.bf16.mxu0 %v9616_v40  ;;  %5989 = vmatprep.subr.bf16.mxu1 %v9619_v45  ;;  %v9692_v40 = vld [vmem:[#allocation14 + $0x270] ss:$24 sps:$4 sm:$0xff]   ;;  %v9697_v45 = vld [vmem:[#allocation14 + $0x244] ss:$24 sps:$4 sm:$0xff]  }
 0x44a   :  { %5947 = vmatpush2.bf16.msra.mxu0 %v9614_v48  ;;  %5990 = vmatpush2.bf16.msra.mxu1 %v9617_v49  ;;  %v9727_v48 = vld [vmem:[#allocation14 + $0x3f4] ss:$24 sps:$4 sm:$0xff]   ;;  %v9725_v49 = vld [vmem:[#allocation14 + $0x3f0] ss:$24 sps:$4 sm:$0xff]  }
 0x44b   :  { %5948 = vmatprep.subr.bf16.mxu0 %v9622_v50  ;;  %5991 = vmatprep.subr.bf16.mxu1 %v9625_v51  ;;  %v9695_v50 = vld [vmem:[#allocation14 + $0x240] ss:$24 sps:$4 sm:$0xff]   ;;  %v9700_v51 = vld [vmem:[#allocation14 + $0x214] ss:$24 sps:$4 sm:$0xff]  }
 0x44e   :  { %5949 = vmatpush2.bf16.msra.mxu0 %v9620_v23  ;;  %5992 = vmatpush2.bf16.msra.mxu1 %v9623_v24  ;;  %v9733_v23 = vld [vmem:[#allocation14 + $0x3c4] ss:$24 sps:$4 sm:$0xff]   ;;  %v9731_v24 = vld [vmem:[#allocation14 + $0x3c0] ss:$24 sps:$4 sm:$0xff]  }
 0x44f   :  { %5950 = vmatprep.subr.bf16.mxu0 %v9628_v30  ;;  %5993 = vmatprep.subr.bf16.mxu1 %v9631_v37  ;;  %v9698_v30 = vld [vmem:[#allocation14 + $0x210] ss:$24 sps:$4 sm:$0xff]   ;;  %v9703_v37 = vld [vmem:[#allocation14 + $0x1e4] ss:$24 sps:$4 sm:$0xff]  }
 0x452   :  { %5951 = vmatpush2.bf16.msra.mxu0 %v9626_v53  ;;  %5994 = vmatpush2.bf16.msra.mxu1 %v9629_v57  ;;  %v9739_v53 = vld [vmem:[#allocation14 + $0x394] ss:$24 sps:$4 sm:$0xff]   ;;  %v9737_v57 = vld [vmem:[#allocation14 + $0x390] ss:$24 sps:$4 sm:$0xff]  }
 0x453   :  { %5952 = vmatprep.subr.bf16.mxu0 %v9634_v38  ;;  %5995 = vmatprep.subr.bf16.mxu1 %v9637_v33  ;;  %v9701_v38 = vld [vmem:[#allocation14 + $0x1e0] ss:$24 sps:$4 sm:$0xff]   ;;  %v9706_v33 = vld [vmem:[#allocation14 + $0x1b4] ss:$24 sps:$4 sm:$0xff]  }
 0x456   :  { %5953 = vmatpush2.bf16.msra.mxu0 %v9632_v59  ;;  %5996 = vmatpush2.bf16.msra.mxu1 %v9635_v60  ;;  %v9745_v59 = vld [vmem:[#allocation14 + $0x364] ss:$24 sps:$4 sm:$0xff]   ;;  %v9743_v60 = vld [vmem:[#allocation14 + $0x360] ss:$24 sps:$4 sm:$0xff]  }
 0x457   :  { %5954 = vmatprep.subr.bf16.mxu0 %v9640_v61  ;;  %5997 = vmatprep.subr.bf16.mxu1 %v9643_v41  ;;  %v9704_v61 = vld [vmem:[#allocation14 + $0x1b0] ss:$24 sps:$4 sm:$0xff]   ;;  %v9709_v41 = vld [vmem:[#allocation14 + $0x184] ss:$24 sps:$4 sm:$0xff]  }
 0x45a   :  { %5955 = vmatpush2.bf16.msra.mxu0 %v9638_v63  ;;  %5998 = vmatpush2.bf16.msra.mxu1 %v9641_v42  ;;  %v9751_v63 = vld [vmem:[#allocation14 + $0x334] ss:$24 sps:$4 sm:$0xff]   ;;  %v9749_v42 = vld [vmem:[#allocation14 + $0x330] ss:$24 sps:$4 sm:$0xff]  }
 0x45b   :  { %5956 = vmatprep.subr.bf16.mxu0 %v9646_v27  ;;  %5999 = vmatprep.subr.bf16.mxu1 %v9649_v0  ;;  %v9707_v27 = vld [vmem:[#allocation14 + $0x180] ss:$24 sps:$4 sm:$0xff]   ;;  %v9712_v0 = vld [vmem:[#allocation14 + $0x15c] ss:$24 sps:$4 sm:$0xff]  }
 0x45e   :  { %5957 = vmatpush2.bf16.msra.mxu0 %v9644_v1  ;;  %6000 = vmatpush2.bf16.msra.mxu1 %v9647_v6  ;;  %v9757_v1 = vld [vmem:[#allocation14 + $0x304] ss:$24 sps:$4 sm:$0xff]   ;;  %v9755_v6 = vld [vmem:[#allocation14 + $0x300] ss:$24 sps:$4 sm:$0xff]  }
 0x45f   :  { %5958 = vmatprep.subr.bf16.mxu0 %v9652_v12  ;;  %6001 = vmatprep.subr.bf16.mxu1 %v9655_v4  ;;  %v9763_v12 = vld [vmem:[#allocation14 + $0x5d4] ss:$24 sps:$4 sm:$0xff]   ;;  %v9761_v4 = vld [vmem:[#allocation14 + $0x5d0] ss:$24 sps:$4 sm:$0xff]  }
 0x462   :  { %5959 = vmatpush2.bf16.msra.mxu0 %v9650_v7  ;;  %6002 = vmatpush2.bf16.msra.mxu1 %v9653_v10  ;;  %v9769_v7 = vld [vmem:[#allocation14 + $0x5a4] ss:$24 sps:$4 sm:$0xff]   ;;  %v9767_v10 = vld [vmem:[#allocation14 + $0x5a0] ss:$24 sps:$4 sm:$0xff]  }
 0x463   :  { %5960 = vmatprep.subr.bf16.mxu0 %v9658_v54  ;;  %6003 = vmatprep.subr.bf16.mxu1 %v9661_v11  ;;  %v9775_v54 = vld [vmem:[#allocation14 + $0x574] ss:$24 sps:$4 sm:$0xff]   ;;  %v9773_v11 = vld [vmem:[#allocation14 + $0x570] ss:$24 sps:$4 sm:$0xff]  }
 0x466   :  { %5961 = vmatpush2.bf16.msra.mxu0 %v9656_v13  ;;  %6004 = vmatpush2.bf16.msra.mxu1 %v9659_v9  ;;  %v9781_v13 = vld [vmem:[#allocation14 + $0x544] ss:$24 sps:$4 sm:$0xff]   ;;  %v9779_v9 = vld [vmem:[#allocation14 + $0x540] ss:$24 sps:$4 sm:$0xff]  }
 0x467   :  { %7244 = vmatprep.subr.bf16.mxu0 %v9664_v14  ;;  %7287 = vmatprep.subr.bf16.mxu1 %v9715_v32  ;;  %v9787_v14 = vld [vmem:[#allocation14 + $0x514] ss:$24 sps:$4 sm:$0xff]  }
 0x469   :  { %5963 = vmatmul.mubr.bf16.vlgmr.msra.gmra.mxu0 %v10475_v47  ;;  %6006 = vmatmul.mubr.bf16.vlgmr.msra.gmra.mxu1 %v10488_v8  ;;  %v9677_v47 = vld [vmem:[#allocation14 + $0x60] ss:$24 sps:$4 sm:$0xff]   ;;  %v9682_v8 = vld [vmem:[#allocation14 + $0x34] ss:$24 sps:$4 sm:$0xff]  }
 0x46a   :  { %7245 = vmatpush1.bf16.msra.mxu0 %v9662_v15  ;;  %7288 = vmatpush1.bf16.msra.mxu1 %v9713_v28  ;;  %v9785_v15 = vld [vmem:[#allocation14 + $0x510] ss:$24 sps:$4 sm:$0xff]  }
 0x46b   :  { %7246 = vmatprep.subr.bf16.mxu0 %v9667_v16  ;;  %7289 = vmatprep.subr.bf16.mxu1 %v9721_v39  ;;  %v9793_v16 = vld [vmem:[#allocation14 + $0x4e4] ss:$24 sps:$4 sm:$0xff]  }
 0x46e   :  { %7247 = vmatpush1.bf16.msra.mxu0 %v9665_v31  ;;  %7290 = vmatpush1.bf16.msra.mxu1 %v9719_v17  ;;  %v9791_v31 = vld [vmem:[#allocation14 + $0x4e0] ss:$24 sps:$4 sm:$0xff]  }
 0x46f   :  { %7248 = vmatprep.subr.bf16.mxu0 %v9670_v18  ;;  %7291 = vmatprep.subr.bf16.mxu1 %v9727_v48  ;;  %v9799_v18 = vld [vmem:[#allocation14 + $0x4b4] ss:$24 sps:$4 sm:$0xff]  }
 0x472   :  { %7249 = vmatpush1.bf16.msra.mxu0 %v9668_v19  ;;  %7292 = vmatpush1.bf16.msra.mxu1 %v9725_v49  ;;  %v9797_v19 = vld [vmem:[#allocation14 + $0x4b0] ss:$24 sps:$4 sm:$0xff]  }
 0x473   :  { %7250 = vmatprep.subr.bf16.mxu0 %v9673_v20  ;;  %7293 = vmatprep.subr.bf16.mxu1 %v9733_v23  ;;  %v9805_v20 = vld [vmem:[#allocation14 + $0x484] ss:$24 sps:$4 sm:$0xff]  }
 0x476   :  { %7251 = vmatpush1.bf16.msra.mxu0 %v9671_v44  ;;  %7294 = vmatpush1.bf16.msra.mxu1 %v9731_v24  ;;  %v9803_v44 = vld [vmem:[#allocation14 + $0x480] ss:$24 sps:$4 sm:$0xff]  }
 0x477   :  { %7252 = vmatprep.subr.bf16.mxu0 %v9676_v56  ;;  %7295 = vmatprep.subr.bf16.mxu1 %v9739_v53  ;;  %v9811_v56 = vld [vmem:[#allocation14 + $0x45c] ss:$24 sps:$4 sm:$0xff]  }
 0x47a   :  { %7253 = vmatpush1.bf16.msra.mxu0 %v9674_v21  ;;  %7296 = vmatpush1.bf16.msra.mxu1 %v9737_v57  ;;  %v5792_v21 = vpop.f32.mrf.mxu0 }
 0x47b   :  { %7254 = vmatprep.subr.bf16.mxu0 %v9679_v46  ;;  %7297 = vmatprep.subr.bf16.mxu1 %v9745_v59  ;;  %v10498_v46 = vld [vmem:[%s10553_s8] sm:$0xf] }
 0x47e   :  { %7255 = vmatpush1.bf16.msra.mxu0 %v9677_v47  ;;  %7298 = vmatpush1.bf16.msra.mxu1 %v9743_v60  ;;  %v5794_v47 = vpop.f32.mrf.mxu0 }
 0x47f   :  { %7256 = vmatprep.subr.bf16.mxu0 %v9682_v8  ;;  %7299 = vmatprep.subr.bf16.mxu1 %v9751_v63 }
 0x482   :  { %7257 = vmatpush1.bf16.msra.mxu0 %v9680_v25  ;;  %7300 = vmatpush1.bf16.msra.mxu1 %v9749_v42  ;;  %v4781_v25 = vrot.slane %v10498_v46, %v10405_v52 }
 0x483   :  { %7258 = vmatprep.subr.bf16.mxu0 %v9685_v36  ;;  %7301 = vmatprep.subr.bf16.mxu1 %v9757_v1  ;;  %v5796_v36 = vpop.f32.mrf.mxu0 }
 0x486   :  { %7259 = vmatpush1.bf16.msra.mxu0 %v9683_v26  ;;  %7302 = vmatpush1.bf16.msra.mxu1 %v9755_v6 }
 0x487   :  { %7260 = vmatprep.subr.bf16.mxu0 %v9688_v55  ;;  %7303 = vmatprep.subr.bf16.mxu1 %v9763_v12  ;;  %v4785_v55 = vrot.slane %v10498_v46, %v10411_v29 }
 0x489   :  { %v5795_v32 = vadd.f32 %v5794_v47, %v4785_v55  ;;  %v9742_v47 = vld [vmem:[#allocation14 + $0x6c] ss:$24 sps:$4 sm:$0xff]  }
 0x48a   :  { %7261 = vmatpush2.bf16.msra.mxu0 %v9686_v43  ;;  %7304 = vmatpush2.bf16.msra.mxu1 %v9761_v4  ;;  %v5793_v43 = vadd.f32 %v5792_v21, %v4781_v25  ;;  %v9734_v21 = vld [vmem:[#allocation14 + $0x98] ss:$24 sps:$4 sm:$0xff]  }
 0x48b   :  { %7262 = vmatprep.subr.bf16.mxu0 %v9691_v5  ;;  %7305 = vmatprep.subr.bf16.mxu1 %v9769_v7  ;;  %v5798_v5 = vpop.f32.mrf.mxu0 }
 0x48c   :  { %v5799_v49 = vadd.f32 %v5798_v5, %v4785_v55  ;;  %v9752_v5 = vld [vmem:[#allocation14 + $0x8] ss:$24 sps:$4 sm:$0xff]  }
 0x48e   :  { %7263 = vmatpush2.bf16.msra.mxu0 %v9689_v34  ;;  %7306 = vmatpush2.bf16.msra.mxu1 %v9767_v10 }
 0x48f   :  { %7264 = vmatprep.subr.bf16.mxu0 %v9694_v35  ;;  %7307 = vmatprep.subr.bf16.mxu1 %v9775_v54 }
 0x492   :  { %7265 = vmatpush2.bf16.msra.mxu0 %v9692_v40  ;;  %7308 = vmatpush2.bf16.msra.mxu1 %v9773_v11  ;;  %v5797_v40 = vadd.f32 %v5796_v36, %v4781_v25  ;;  %v9748_v36 = vld [vmem:[#allocation14 + $0x3c] ss:$24 sps:$4 sm:$0xff]  }
 0x493   :  { %7266 = vmatprep.subr.bf16.mxu0 %v9697_v45  ;;  %7309 = vmatprep.subr.bf16.mxu1 %v9781_v13 }
 0x496   :  { %7267 = vmatpush2.bf16.msra.mxu0 %v9695_v50  ;;  %7310 = vmatpush2.bf16.msra.mxu1 %v9779_v9 }
 0x497   :  { %7268 = vmatprep.subr.bf16.mxu0 %v9700_v51  ;;  %7311 = vmatprep.subr.bf16.mxu1 %v9787_v14  ;;  %v9710_v14 = vld [vmem:[#allocation14 + $0x158] ss:$24 sps:$4 sm:$0xff]  }
 0x49a   :  { %7269 = vmatpush2.bf16.msra.mxu0 %v9698_v30  ;;  %7312 = vmatpush2.bf16.msra.mxu1 %v9785_v15 }
 0x49b   :  { %7270 = vmatprep.subr.bf16.mxu0 %v9703_v37  ;;  %7313 = vmatprep.subr.bf16.mxu1 %v9793_v16  ;;  %v9718_v16 = vld [vmem:[#allocation14 + $0x12c] ss:$24 sps:$4 sm:$0xff]  }
 0x49e   :  { %7271 = vmatpush2.bf16.msra.mxu0 %v9701_v38  ;;  %7314 = vmatpush2.bf16.msra.mxu1 %v9791_v31  ;;  %v9716_v31 = vld [vmem:[#allocation14 + $0x128] ss:$24 sps:$4 sm:$0xff]  }
 0x49f   :  { %7272 = vmatprep.subr.bf16.mxu0 %v9706_v33  ;;  %7315 = vmatprep.subr.bf16.mxu1 %v9799_v18  ;;  %v9724_v18 = vld [vmem:[#allocation14 + $0xfc] ss:$24 sps:$4 sm:$0xff]  }
 0x4a2   :  { %7273 = vmatpush2.bf16.msra.mxu0 %v9704_v61  ;;  %7316 = vmatpush2.bf16.msra.mxu1 %v9797_v19  ;;  %v9722_v19 = vld [vmem:[#allocation14 + $0xf8] ss:$24 sps:$4 sm:$0xff]  }
 0x4a3   :  { %7274 = vmatprep.subr.bf16.mxu0 %v9709_v41  ;;  %7317 = vmatprep.subr.bf16.mxu1 %v9805_v20  ;;  %v9730_v20 = vld [vmem:[#allocation14 + $0xcc] ss:$24 sps:$4 sm:$0xff]  }
 0x4a6   :  { %7275 = vmatpush2.bf16.msra.mxu0 %v9707_v27  ;;  %7318 = vmatpush2.bf16.msra.mxu1 %v9803_v44  ;;  %v9728_v44 = vld [vmem:[#allocation14 + $0xc8] ss:$24 sps:$4 sm:$0xff]  }
 0x4a7   :  { %7330 = vmatprep.subr.bf16.mxu0 %v9712_v0  ;;  %7373 = vmatprep.subr.bf16.mxu1 %v9811_v56  ;;  %v9736_v56 = vld [vmem:[#allocation14 + $0x9c] ss:$24 sps:$4 sm:$0xff]  }
 0x4a9   :  { %v5835_v8 = vpop.f32.mrf.mxu1 }
 0x4aa   :  { %v5836_v34 = vadd.f32 %v5835_v8, %v5793_v43  ;;  %v9740_v8 = vld [vmem:[#allocation14 + $0x68] ss:$24 sps:$4 sm:$0xff]   ;;  %v9754_v43 = vld [vmem:[#allocation14 + $0xc] ss:$24 sps:$4 sm:$0xff]  }
 0x4ab   :  { %v5837_v26 = vpop.f32.mrf.mxu1 }
 0x4ac   :  { %v5838_v39 = vadd.f32 %v5837_v26, %v5795_v32  ;;  %v9746_v26 = vld [vmem:[#allocation14 + $0x38] ss:$24 sps:$4 sm:$0xff]   ;;  %v9760_v32 = vld [vmem:[#allocation14 + $0x2dc] ss:$24 sps:$4 sm:$0xff]  }
 0x4ad   :  { %v5839_v28 = vpop.f32.mrf.mxu1 }
 0x4ae   :  { %v5840_v51 = vadd.f32 %v5839_v28, %v5797_v40  ;;  %v9766_v40 = vld [vmem:[#allocation14 + $0x2ac] ss:$24 sps:$4 sm:$0xff]  }
 0x4af   :  { %v5841_v45 = vpop.f32.mrf.mxu1 }
 0x4b0   :  { %v5842_v30 = vadd.f32 %v5841_v45, %v5799_v49 }
 0x4e9   :  { %v5878_v35 = vpop.f32.mrf.mxu0  ;;  %v5921_v25 = vpop.f32.mrf.mxu1 }
 0x4ea   :  { %v5879_v17 = vadd.f32 %v5878_v35, %v5836_v34  ;;  %v4789_v34 = vrot.slane %v10498_v46, %v10428_v58  ;;  %v4793_v35 = vrot.slane %v10498_v46, %v10432_v62 }
 0x4eb   :  { %v5880_v48 = vpop.f32.mrf.mxu0  ;;  %v5923_v55 = vpop.f32.mrf.mxu1 }
 0x4ec   :  { %v5881_v50 = vadd.f32 %v5880_v48, %v5838_v39  ;;  %v6024_v23 = vmul.f32 0.70710677, %v5879_v17  ;;  %v6016_v7 = vmul.f32 0.5, %v5879_v17  ;;  %v9758_v39 = vld [vmem:[#allocation14 + $0x2d8] ss:$24 sps:$4 sm:$0xff]   ;;  %v5922_v45 = vadd.f32 %v5921_v25, %v4789_v34 }
 0x4ed   :  { %v5882_v24 = vpop.f32.mrf.mxu0  ;;  %v5925_v28 = vpop.f32.mrf.mxu1  ;;  %v9808_v25 = vld [vmem:[#allocation14 + $0x164] ss:$24 sps:$4 sm:$0xff]  }
 0x4ee   :  { %v6025_v37 = vmul.f32 0.70710677, %v5881_v50  ;;  %v5883_v53 = vadd.f32 %v5882_v24, %v5840_v51  ;;  %v6017_v6 = vmul.f32 0.5, %v5881_v50  ;;  %v5924_v50 = vadd.f32 %v5923_v55, %v4793_v35 }
 0x4ef   :  { %v5884_v57 = vpop.f32.mrf.mxu0  ;;  %v5927_v17 = vpop.f32.mrf.mxu1 }
 0x4f0   :  { %9990 = verf.f32 %v6025_v37  ;;  %v5885_v38 = vadd.f32 %v5884_v57, %v5842_v30  ;;  %v6028_v33 = vmul.f32 0.70710677, %v5883_v53  ;;  %v6020_v0 = vmul.f32 0.5, %v5883_v53  ;;  %v9772_v37 = vld [vmem:[#allocation14 + $0x27c] ss:$24 sps:$4 sm:$0xff]  }
 0x4f1   :  { %9992 = verf.f32 %v6024_v23  ;;  %v9764_v23 = vld [vmem:[#allocation14 + $0x2a8] ss:$24 sps:$4 sm:$0xff]   ;;  %v5926_v53 = vadd.f32 %v5925_v28, %v4789_v34 }
 0x4f2   :  { %v6029_v59 = vmul.f32 0.70710677, %v5885_v38  ;;  %9994 = verf.f32 %v6028_v33  ;;  %v6021_v12 = vmul.f32 0.5, %v5885_v38 }
 0x4f4   :  { %9996 = verf.f32 %v6029_v59 }
 0x4fd   :  { %v9991_v60 = vpop.eup %9990 }
 0x4fe   :  { %v9993_v61 = vpop.eup %9992  ;;  %v6041_v63 = vadd.f32 1.0, %v9991_v60 }
 0x4ff   :  { %v9995_v41 = vpop.eup %9994  ;;  %v6040_v27 = vadd.f32 1.0, %v9993_v61 }
 0x500   :  { %v6044_v1 = vadd.f32 1.0, %v9995_v41  ;;  %v6049_v54 = vmul.f32 %v6041_v63, %v6017_v6  ;;  %v9770_v41 = vld [vmem:[#allocation14 + $0x278] ss:$24 sps:$4 sm:$0xff]   ;;  %v5928_v63 = vadd.f32 %v5927_v17, %v4793_v35 }
 0x501   :  { %v9997_v42 = vpop.eup %9996  ;;  %v6048_v13 = vmul.f32 %v6040_v27, %v6016_v7  ;;  %v9778_v27 = vld [vmem:[#allocation14 + $0x24c] ss:$24 sps:$4 sm:$0xff]   ;;  %v9776_v7 = vld [vmem:[#allocation14 + $0x248] ss:$24 sps:$4 sm:$0xff]  }
 0x502   :  { %v6045_v4 = vadd.f32 1.0, %v9997_v42  ;;  %v6052_v10 = vmul.f32 %v6044_v1, %v6020_v0  ;;  %v9806_v35 = vld [vmem:[#allocation14 + $0x160] ss:$24 sps:$4 sm:$0xff]  }
 0x504   :  { %v6053_v11 = vmul.f32 %v6045_v4, %v6021_v12  ;;  %v10506_v15 = vpack.c.bf16 %v6052_v10, %v6048_v13  ;;  %v9782_v13 = vld [vmem:[#allocation14 + $0x218] ss:$24 sps:$4 sm:$0xff]  }
 0x506   :  { %v10504_v9 = vpack.c.bf16 %v6053_v11, %v6049_v54  ;;  %v9784_v54 = vld [vmem:[#allocation14 + $0x21c] ss:$24 sps:$4 sm:$0xff]  }
 0x508   :  { %7276 = vmatprep.mubr.bf16.mxu0 %v10504_v9 }
 0x509   :  { %7277 = vmatmul.mubr.bf16.vlgmr.msra.gmra.mxu0 %v10506_v15 }
 0x50a   :  { %7331 = vmatpush1.bf16.msra.mxu0 %v9710_v14  ;;  %7362 = vmatprep.mubr.bf16.mxu0 %v10504_v9  ;;  %v9790_v14 = vld [vmem:[#allocation14 + $0x1ec] ss:$24 sps:$4 sm:$0xff]  }
 0x50b   :  { %7332 = vmatprep.subr.bf16.mxu0 %v9718_v16  ;;  %v9788_v16 = vld [vmem:[#allocation14 + $0x1e8] ss:$24 sps:$4 sm:$0xff]  }
 0x50e   :  { %7333 = vmatpush1.bf16.msra.mxu0 %v9716_v31  ;;  %v9796_v31 = vld [vmem:[#allocation14 + $0x1bc] ss:$24 sps:$4 sm:$0xff]  }
 0x50f   :  { %7334 = vmatprep.subr.bf16.mxu0 %v9724_v18  ;;  %v9794_v18 = vld [vmem:[#allocation14 + $0x1b8] ss:$24 sps:$4 sm:$0xff]  }
 0x512   :  { %7335 = vmatpush1.bf16.msra.mxu0 %v9722_v19 }
 0x513   :  { %7336 = vmatprep.subr.bf16.mxu0 %v9730_v20  ;;  %v9802_v20 = vld [vmem:[#allocation14 + $0x18c] ss:$24 sps:$4 sm:$0xff]  }
 0x516   :  { %7337 = vmatpush1.bf16.msra.mxu0 %v9728_v44 }
 0x517   :  { %7338 = vmatprep.subr.bf16.mxu0 %v9736_v56 }
 0x51a   :  { %7339 = vmatpush1.bf16.msra.mxu0 %v9734_v21 }
 0x51b   :  { %7340 = vmatprep.subr.bf16.mxu0 %v9742_v47  ;;  %v9800_v47 = vld [vmem:[#allocation14 + $0x188] ss:$24 sps:$4 sm:$0xff]  }
 0x51e   :  { %7341 = vmatpush1.bf16.msra.mxu0 %v9740_v8 }
 0x51f   :  { %7342 = vmatprep.subr.bf16.mxu0 %v9748_v36 }
 0x522   :  { %7343 = vmatpush1.bf16.msra.mxu0 %v9746_v26 }
 0x523   :  { %7344 = vmatprep.subr.bf16.mxu0 %v9754_v43 }
 0x526   :  { %7345 = vmatpush1.bf16.msra.mxu0 %v9752_v5 }
 0x527   :  { %7346 = vmatprep.subr.bf16.mxu0 %v9760_v32 }
 0x529   :  { %v5964_v48 = vpop.f32.mrf.mxu0  ;;  %v6007_v49 = vpop.f32.mrf.mxu1 }
 0x52a   :  { %v5965_v51 = vadd.f32 %v5964_v48, %v5922_v45  ;;  %7347 = vmatpush2.bf16.msra.mxu0 %v9758_v39 }
 0x52b   :  { %v5966_v24 = vpop.f32.mrf.mxu0  ;;  %v6009_v30 = vpop.f32.mrf.mxu1  ;;  %7348 = vmatprep.subr.bf16.mxu0 %v9766_v40  ;;  %v9814_v40 = vld [vmem:[#allocation14 + $0x134] ss:$24 sps:$4 sm:$0xff]  }
 0x52c   :  { %v6008_v57 = vadd.f32 %v6007_v49, %v5965_v51  ;;  %v5967_v38 = vadd.f32 %v5966_v24, %v5924_v50  ;;  %v9809_v49 = vld [vmem:[#allocation14 + $0x458] ss:$24 sps:$4 sm:$0xff]   ;;  %v9820_v24 = vld [vmem:[#allocation14 + $0x104] ss:$24 sps:$4 sm:$0xff]  }
 0x52d   :  { %v5968_v46 = vpop.f32.mrf.mxu0  ;;  %v6011_v61 = vpop.f32.mrf.mxu1  ;;  %v9812_v51 = vld [vmem:[#allocation14 + $0x130] ss:$24 sps:$4 sm:$0xff]  }
 0x52e   :  { %v6026_v33 = vmul.f32 0.70710677, %v6008_v57  ;;  %v6010_v59 = vadd.f32 %v6009_v30, %v5967_v38  ;;  %v5969_v60 = vadd.f32 %v5968_v46, %v5926_v53  ;;  %7349 = vmatpush2.bf16.msra.mxu0 %v9764_v23  ;;  %v6018_v32 = vmul.f32 0.5, %v6008_v57  ;;  %v9817_v23 = vld [vmem:[#allocation14 + $0x42c] ss:$24 sps:$4 sm:$0xff]  }
 0x52f   :  { %v5970_v42 = vpop.f32.mrf.mxu0  ;;  %7350 = vmatprep.subr.bf16.mxu0 %v9772_v37  ;;  %v6013_v4 = vpop.f32.mrf.mxu1  ;;  %v9815_v30 = vld [vmem:[#allocation14 + $0x428] ss:$24 sps:$4 sm:$0xff]   ;;  %v9823_v53 = vld [vmem:[#allocation14 + $0x3fc] ss:$24 sps:$4 sm:$0xff]   ;;  %v9829_v46 = vld [vmem:[#allocation14 + $0x3cc] ss:$24 sps:$4 sm:$0xff]  }
 0x530   :  { %v6027_v0 = vmul.f32 0.70710677, %v6010_v59  ;;  %v6012_v1 = vadd.f32 %v6011_v61, %v5969_v60  ;;  %v5971_v6 = vadd.f32 %v5970_v42, %v5928_v63  ;;  %9998 = verf.f32 %v6026_v33  ;;  %v9818_v37 = vld [vmem:[#allocation14 + $0x100] ss:$24 sps:$4 sm:$0xff]   ;;  %v9826_v57 = vld [vmem:[#allocation14 + $0xd4] ss:$24 sps:$4 sm:$0xff]  }
 0x531   :  { %v6019_v43 = vmul.f32 0.5, %v6010_v59  ;;  %v9824_v38 = vld [vmem:[#allocation14 + $0xd0] ss:$24 sps:$4 sm:$0xff]   ;;  %v9832_v33 = vld [vmem:[#allocation14 + $0xa4] ss:$24 sps:$4 sm:$0xff]  }
 0x532   :  { %v6030_v12 = vmul.f32 0.70710677, %v6012_v1  ;;  %7351 = vmatpush2.bf16.msra.mxu0 %v9770_v41  ;;  %10000 = verf.f32 %v6027_v0  ;;  %v6014_v10 = vadd.f32 %v6013_v4, %v5971_v6  ;;  %v6022_v55 = vmul.f32 0.5, %v6012_v1  ;;  %v9827_v59 = vld [vmem:[#allocation14 + $0x3c8] ss:$24 sps:$4 sm:$0xff]  }
 0x533   :  { %7352 = vmatprep.subr.bf16.mxu0 %v9778_v27  ;;  %v9830_v60 = vld [vmem:[#allocation14 + $0xa0] ss:$24 sps:$4 sm:$0xff]   ;;  %v9835_v61 = vld [vmem:[#allocation14 + $0x39c] ss:$24 sps:$4 sm:$0xff]   ;;  %v9836_v42 = vld [vmem:[#allocation14 + $0x70] ss:$24 sps:$4 sm:$0xff]  }
 0x534   :  { %10002 = verf.f32 %v6030_v12  ;;  %v6031_v11 = vmul.f32 0.70710677, %v6014_v10  ;;  %v6023_v5 = vmul.f32 0.5, %v6014_v10  ;;  %v9838_v41 = vld [vmem:[#allocation14 + $0x74] ss:$24 sps:$4 sm:$0xff]  }
 0x535   :  { %v9833_v63 = vld [vmem:[#allocation14 + $0x398] ss:$24 sps:$4 sm:$0xff]   ;;  %v9841_v27 = vld [vmem:[#allocation14 + $0x36c] ss:$24 sps:$4 sm:$0xff]   ;;  %v9839_v1 = vld [vmem:[#allocation14 + $0x368] ss:$24 sps:$4 sm:$0xff]  }
 0x536   :  { %7353 = vmatpush2.bf16.msra.mxu0 %v9776_v7  ;;  %10004 = verf.f32 %v6031_v11  ;;  %v9844_v0 = vld [vmem:[#allocation14 + $0x44] ss:$24 sps:$4 sm:$0xff]   ;;  %v9842_v6 = vld [vmem:[#allocation14 + $0x40] ss:$24 sps:$4 sm:$0xff]   ;;  %v9850_v4 = vld [vmem:[#allocation14 + $0x14] ss:$24 sps:$4 sm:$0xff]  }
 0x537   :  { %7354 = vmatprep.subr.bf16.mxu0 %v9784_v54  ;;  %v9847_v12 = vld [vmem:[#allocation14 + $0x33c] ss:$24 sps:$4 sm:$0xff]   ;;  %v9845_v7 = vld [vmem:[#allocation14 + $0x338] ss:$24 sps:$4 sm:$0xff]   ;;  %v9853_v54 = vld [vmem:[#allocation14 + $0x30c] ss:$24 sps:$4 sm:$0xff]  }
 0x538   :  { %v9848_v10 = vld [vmem:[#allocation14 + $0x10] ss:$24 sps:$4 sm:$0xff]   ;;  %v9856_v11 = vld [vmem:[#allocation14 + $0x2e4] ss:$24 sps:$4 sm:$0xff]  }
 0x53a   :  { %7355 = vmatpush2.bf16.msra.mxu0 %v9782_v13  ;;  %v9851_v13 = vld [vmem:[#allocation14 + $0x308] ss:$24 sps:$4 sm:$0xff]  }
 0x53b   :  { %7356 = vmatprep.subr.bf16.mxu0 %v9790_v14  ;;  %v9854_v14 = vld [vmem:[#allocation14 + $0x2e0] ss:$24 sps:$4 sm:$0xff]  }
 0x53d   :  { %v9999_v19 = vpop.eup %9998 }
 0x53e   :  { %7357 = vmatpush2.bf16.msra.mxu0 %v9788_v16  ;;  %v6042_v26 = vadd.f32 1.0, %v9999_v19  ;;  %v9859_v16 = vld [vmem:[#allocation14 + $0x5dc] ss:$24 sps:$4 sm:$0xff]   ;;  %v9860_v19 = vld [vmem:[#allocation14 + $0x2b0] ss:$24 sps:$4 sm:$0xff]  }
 0x53f   :  { %7358 = vmatprep.subr.bf16.mxu0 %v9796_v31  ;;  %v10001_v44 = vpop.eup %10000  ;;  %v9862_v31 = vld [vmem:[#allocation14 + $0x2b4] ss:$24 sps:$4 sm:$0xff]  }
 0x540   :  { %v6043_v8 = vadd.f32 1.0, %v10001_v44  ;;  %v6050_v45 = vmul.f32 %v6042_v26, %v6018_v32  ;;  %v9868_v44 = vld [vmem:[#allocation14 + $0x284] ss:$24 sps:$4 sm:$0xff]   ;;  %v9886_v32 = vld [vmem:[#allocation14 + $0x1f4] ss:$24 sps:$4 sm:$0xff]  }
 0x541   :  { %v10003_v56 = vpop.eup %10002  ;;  %v9877_v26 = vld [vmem:[#allocation14 + $0x54c] ss:$24 sps:$4 sm:$0xff]  }
 0x542   :  { %v6046_v21 = vadd.f32 1.0, %v10003_v56  ;;  %7359 = vmatpush2.bf16.msra.mxu0 %v9794_v18  ;;  %v6051_v39 = vmul.f32 %v6043_v8, %v6019_v43  ;;  %v9857_v18 = vld [vmem:[#allocation14 + $0x5d8] ss:$24 sps:$4 sm:$0xff]   ;;  %v9863_v56 = vld [vmem:[#allocation14 + $0x5a8] ss:$24 sps:$4 sm:$0xff]  }
 0x543   :  { %7360 = vmatprep.subr.bf16.mxu0 %v9802_v20  ;;  %v10005_v36 = vpop.eup %10004  ;;  %v9865_v20 = vld [vmem:[#allocation14 + $0x5ac] ss:$24 sps:$4 sm:$0xff]   ;;  %v9875_v43 = vld [vmem:[#allocation14 + $0x548] ss:$24 sps:$4 sm:$0xff]  }
 0x544   :  { %v6047_v28 = vadd.f32 1.0, %v10005_v36  ;;  %v6054_v34 = vmul.f32 %v6046_v21, %v6022_v55  ;;  %v9866_v21 = vld [vmem:[#allocation14 + $0x280] ss:$24 sps:$4 sm:$0xff]   ;;  %v9874_v8 = vld [vmem:[#allocation14 + $0x254] ss:$24 sps:$4 sm:$0xff]  }
 0x545   :  { %v9872_v36 = vld [vmem:[#allocation14 + $0x250] ss:$24 sps:$4 sm:$0xff]   ;;  %v9880_v55 = vld [vmem:[#allocation14 + $0x224] ss:$24 sps:$4 sm:$0xff]  }
 0x546   :  { %7361 = vmatpush2.bf16.msra.mxu0 %v9800_v47  ;;  %v6055_v17 = vmul.f32 %v6047_v28, %v6023_v5  ;;  %v10518_v50 = vpack.c.bf16 %v6054_v34, %v6050_v45  ;;  %v9871_v47 = vld [vmem:[#allocation14 + $0x57c] ss:$24 sps:$4 sm:$0xff]   ;;  %v9878_v5 = vld [vmem:[#allocation14 + $0x220] ss:$24 sps:$4 sm:$0xff]  }
 0x547   :  { %7416 = vmatprep.subr.bf16.mxu0 %v9808_v25  ;;  %v9869_v25 = vld [vmem:[#allocation14 + $0x578] ss:$24 sps:$4 sm:$0xff]   ;;  %v9883_v28 = vld [vmem:[#allocation14 + $0x51c] ss:$24 sps:$4 sm:$0xff]  }
 0x548   :  { %v10516_v48 = vpack.c.bf16 %v6055_v17, %v6051_v39  ;;  %v9881_v34 = vld [vmem:[#allocation14 + $0x518] ss:$24 sps:$4 sm:$0xff]   ;;  %v9889_v39 = vld [vmem:[#allocation14 + $0x4ec] ss:$24 sps:$4 sm:$0xff]  }
 0x549   :  { %7363 = vmatmul.mubr.bf16.vlgmr.msra.gmra.mxu0 %v10506_v15  ;;  %v9892_v17 = vld [vmem:[#allocation14 + $0x1c4] ss:$24 sps:$4 sm:$0xff]   ;;  %v9890_v45 = vld [vmem:[#allocation14 + $0x1c0] ss:$24 sps:$4 sm:$0xff]  }
 0x54a   :  { %7417 = vmatpush1.bf16.msra.mxu0 %v9806_v35  ;;  %7448 = vmatprep.mubr.bf16.mxu0 %v10504_v9  ;;  %v9821_v9 = vld [vmem:[#allocation14 + $0x3f8] ss:$24 sps:$4 sm:$0xff]  }
 0x54b   :  { %7319 = vmatprep.mubr.bf16.mxu1 %v10516_v48  ;;  %7418 = vmatprep.subr.bf16.mxu0 %v9814_v40  ;;  %v9884_v35 = vld [vmem:[#allocation14 + $0x1f0] ss:$24 sps:$4 sm:$0xff]  }
 0x54c   :  { %7320 = vmatmul.mubr.bf16.vlgmr.msra.gmra.mxu1 %v10518_v50  ;;  %v9887_v40 = vld [vmem:[#allocation14 + $0x4e8] ss:$24 sps:$4 sm:$0xff]  }
 0x54d   :  { %7374 = vmatpush1.bf16.msra.mxu1 %v9809_v49  ;;  %7405 = vmatprep.mubr.bf16.mxu1 %v10516_v48  ;;  %v9895_v49 = vld [vmem:[#allocation14 + $0x4bc] ss:$24 sps:$4 sm:$0xff]  }
 0x54e   :  { %7375 = vmatprep.subr.bf16.mxu1 %v9817_v23  ;;  %7419 = vmatpush1.bf16.msra.mxu0 %v9812_v51  ;;  %v9898_v51 = vld [vmem:[#allocation14 + $0x194] ss:$24 sps:$4 sm:$0xff]   ;;  %v9893_v23 = vld [vmem:[#allocation14 + $0x4b8] ss:$24 sps:$4 sm:$0xff]  }
 0x54f   :  { %7420 = vmatprep.subr.bf16.mxu0 %v9820_v24  ;;  %v9896_v24 = vld [vmem:[#allocation14 + $0x190] ss:$24 sps:$4 sm:$0xff]  }
 0x551   :  { %7376 = vmatpush1.bf16.msra.mxu1 %v9815_v30  ;;  %v9901_v30 = vld [vmem:[#allocation14 + $0x48c] ss:$24 sps:$4 sm:$0xff]  }
 0x552   :  { %7377 = vmatprep.subr.bf16.mxu1 %v9823_v53  ;;  %7421 = vmatpush1.bf16.msra.mxu0 %v9818_v37  ;;  %v9899_v37 = vld [vmem:[#allocation14 + $0x488] ss:$24 sps:$4 sm:$0xff]   ;;  %v9904_v53 = vld [vmem:[#allocation14 + $0x464] ss:$24 sps:$4 sm:$0xff]  }
 0x553   :  { %7422 = vmatprep.subr.bf16.mxu0 %v9826_v57  ;;  %v9902_v57 = vld [vmem:[#allocation14 + $0x460] ss:$24 sps:$4 sm:$0xff]  }
 0x555   :  { %7378 = vmatpush1.bf16.msra.mxu1 %v9821_v9  ;;  %v9907_v9 = vld [vmem:[#allocation14 + $0x434] ss:$24 sps:$4 sm:$0xff]  }
 0x556   :  { %7379 = vmatprep.subr.bf16.mxu1 %v9829_v46  ;;  %7423 = vmatpush1.bf16.msra.mxu0 %v9824_v38  ;;  %v9905_v38 = vld [vmem:[#allocation14 + $0x430] ss:$24 sps:$4 sm:$0xff]   ;;  %v9910_v46 = vld [vmem:[#allocation14 + $0x404] ss:$24 sps:$4 sm:$0xff]  }
 0x557   :  { %7424 = vmatprep.subr.bf16.mxu0 %v9832_v33  ;;  %v9908_v33 = vld [vmem:[#allocation14 + $0x400] ss:$24 sps:$4 sm:$0xff]  }
 0x559   :  { %7380 = vmatpush1.bf16.msra.mxu1 %v9827_v59  ;;  %v9913_v59 = vld [vmem:[#allocation14 + $0x3d4] ss:$24 sps:$4 sm:$0xff]  }
 0x55a   :  { %7381 = vmatprep.subr.bf16.mxu1 %v9835_v61  ;;  %7425 = vmatpush1.bf16.msra.mxu0 %v9830_v60  ;;  %v9911_v60 = vld [vmem:[#allocation14 + $0x3d0] ss:$24 sps:$4 sm:$0xff]   ;;  %v9916_v61 = vld [vmem:[#allocation14 + $0x3a4] ss:$24 sps:$4 sm:$0xff]  }
 0x55b   :  { %7426 = vmatprep.subr.bf16.mxu0 %v9838_v41  ;;  %v9919_v41 = vld [vmem:[#allocation14 + $0x374] ss:$24 sps:$4 sm:$0xff]  }
 0x55d   :  { %7382 = vmatpush1.bf16.msra.mxu1 %v9833_v63  ;;  %v9917_v63 = vld [vmem:[#allocation14 + $0x370] ss:$24 sps:$4 sm:$0xff]  }
 0x55e   :  { %7383 = vmatprep.subr.bf16.mxu1 %v9841_v27  ;;  %7427 = vmatpush1.bf16.msra.mxu0 %v9836_v42  ;;  %v9922_v42 = vld [vmem:[#allocation14 + $0x344] ss:$24 sps:$4 sm:$0xff]   ;;  %v9925_v27 = vld [vmem:[#allocation14 + $0x314] ss:$24 sps:$4 sm:$0xff]  }
 0x55f   :  { %7428 = vmatprep.subr.bf16.mxu0 %v9844_v0  ;;  %v9923_v0 = vld [vmem:[#allocation14 + $0x310] ss:$24 sps:$4 sm:$0xff]  }
 0x561   :  { %7384 = vmatpush1.bf16.msra.mxu1 %v9839_v1  ;;  %v9928_v1 = vld [vmem:[#allocation14 + $0x5e4] ss:$24 sps:$4 sm:$0xff]  }
 0x562   :  { %7385 = vmatprep.subr.bf16.mxu1 %v9847_v12  ;;  %7429 = vmatpush1.bf16.msra.mxu0 %v9842_v6  ;;  %v9926_v6 = vld [vmem:[#allocation14 + $0x5e0] ss:$24 sps:$4 sm:$0xff]   ;;  %v9931_v12 = vld [vmem:[#allocation14 + $0x5b4] ss:$24 sps:$4 sm:$0xff]  }
 0x563   :  { %7430 = vmatprep.subr.bf16.mxu0 %v9850_v4  ;;  %v9929_v4 = vld [vmem:[#allocation14 + $0x5b0] ss:$24 sps:$4 sm:$0xff]  }
 0x565   :  { %7386 = vmatpush1.bf16.msra.mxu1 %v9845_v7  ;;  %v9934_v7 = vld [vmem:[#allocation14 + $0x584] ss:$24 sps:$4 sm:$0xff]  }
 0x566   :  { %7387 = vmatprep.subr.bf16.mxu1 %v9853_v54  ;;  %7431 = vmatpush1.bf16.msra.mxu0 %v9848_v10  ;;  %v9932_v10 = vld [vmem:[#allocation14 + $0x580] ss:$24 sps:$4 sm:$0xff]   ;;  %v9937_v54 = vld [vmem:[#allocation14 + $0x554] ss:$24 sps:$4 sm:$0xff]  }
 0x567   :  { %7432 = vmatprep.subr.bf16.mxu0 %v9856_v11  ;;  %v9935_v11 = vld [vmem:[#allocation14 + $0x550] ss:$24 sps:$4 sm:$0xff]  }
 0x569   :  { %7388 = vmatpush1.bf16.msra.mxu1 %v9851_v13  ;;  %v9940_v13 = vld [vmem:[#allocation14 + $0x524] ss:$24 sps:$4 sm:$0xff]  }
 0x56a   :  { %7389 = vmatprep.subr.bf16.mxu1 %v9859_v16  ;;  %7433 = vmatpush2.bf16.msra.mxu0 %v9854_v14  ;;  %v9938_v14 = vld [vmem:[#allocation14 + $0x520] ss:$24 sps:$4 sm:$0xff]   ;;  %v9943_v16 = vld [vmem:[#allocation14 + $0x4f4] ss:$24 sps:$4 sm:$0xff]  }
 0x56b   :  { %7434 = vmatprep.subr.bf16.mxu0 %v9862_v31  ;;  %v9941_v31 = vld [vmem:[#allocation14 + $0x4f0] ss:$24 sps:$4 sm:$0xff]  }
 0x56d   :  { %7390 = vmatpush2.bf16.msra.mxu1 %v9857_v18  ;;  %v9946_v18 = vld [vmem:[#allocation14 + $0x4c4] ss:$24 sps:$4 sm:$0xff]  }
 0x56e   :  { %7391 = vmatprep.subr.bf16.mxu1 %v9865_v20  ;;  %7435 = vmatpush2.bf16.msra.mxu0 %v9860_v19  ;;  %v9944_v19 = vld [vmem:[#allocation14 + $0x4c0] ss:$24 sps:$4 sm:$0xff]   ;;  %v9949_v20 = vld [vmem:[#allocation14 + $0x494] ss:$24 sps:$4 sm:$0xff]  }
 0x56f   :  { %7436 = vmatprep.subr.bf16.mxu0 %v9868_v44  ;;  %v9947_v44 = vld [vmem:[#allocation14 + $0x490] ss:$24 sps:$4 sm:$0xff]  }
 0x571   :  { %7392 = vmatpush2.bf16.msra.mxu1 %v9863_v56 }
 0x572   :  { %7393 = vmatprep.subr.bf16.mxu1 %v9871_v47  ;;  %7437 = vmatpush2.bf16.msra.mxu0 %v9866_v21  ;;  %v6252_v21 = vld [vmem:[%s10555_s10] sm:$0x3f]  ;;  %s10212_s10 = smov [#allocation16]  }
 0x573   :  { %7438 = vmatprep.subr.bf16.mxu0 %v9874_v8  ;;  %v6257_v8 = vrot.slane %v6252_v21, %v10405_v52  ;;  %s7519_s14 = sshll.u32 %s10212_s10, 4  ;;  %s7520_s14 = int_to_ptr.vmem [resolvable:$true] %s7519_s14 }
 0x574   :  { %s10166_s15 = scalar_lea.vmem %s7520_s14, 1536  ;;  %p10171_p13 = scmp.lt.s32.totalorder %s7520_s14, %s7520_s14 }
 0x575   :  { %7394 = vmatpush2.bf16.msra.mxu1 %v9869_v25  ;;  %v6261_v25 = vrot.slane %v6252_v21, %v10411_v29  ;;  %p10167_p12 = scmp.ne.s32.totalorder %s7520_s14, %s10166_s15  ;;  %p10172_p0 = scmp.lt.s32.totalorder %s10166_s15, %s10166_s15 }
 0x576   :  { %7395 = vmatprep.subr.bf16.mxu1 %v9877_v26  ;;  %7439 = vmatpush2.bf16.msra.mxu0 %v9872_v36 }
 0x577   :  { %7440 = vmatprep.subr.bf16.mxu0 %v9880_v55  ;;  %p10173_p1 = por %p10172_p0, %p10171_p13 }
 0x579   :  { %7396 = vmatpush2.bf16.msra.mxu1 %v9875_v43  ;;  %p10174_p2 = pnand %p10173_p1, %p10167_p12 }
 0x57a   :  { %7397 = vmatprep.subr.bf16.mxu1 %v9883_v28  ;;  %7441 = vmatpush2.bf16.msra.mxu0 %v9878_v5 }
 0x57b   :  { %7442 = vmatprep.subr.bf16.mxu0 %v9886_v32 }
 0x57d   :  { %7398 = vmatpush2.bf16.msra.mxu1 %v9881_v34 }
 0x57e   :  { %7399 = vmatprep.subr.bf16.mxu1 %v9889_v39  ;;  %7443 = vmatpush2.bf16.msra.mxu0 %v9884_v35 }
 0x57f   :  { %7444 = vmatprep.subr.bf16.mxu0 %v9892_v17 }
 0x581   :  { %7400 = vmatpush2.bf16.msra.mxu1 %v9887_v40 }
 0x582   :  { %7401 = vmatprep.subr.bf16.mxu1 %v9895_v49  ;;  %7445 = vmatpush2.bf16.msra.mxu0 %v9890_v45  ;;  %v6265_v49 = vrot.slane %v6252_v21, %v10428_v58 }
 0x583   :  { %7446 = vmatprep.subr.bf16.mxu0 %v9898_v51  ;;  %v6269_v51 = vrot.slane %v6252_v21, %v10432_v62 }
 0x585   :  { %7402 = vmatpush2.bf16.msra.mxu1 %v9893_v23 }
 0x586   :  { %7403 = vmatprep.subr.bf16.mxu1 %v9901_v30  ;;  %7447 = vmatpush2.bf16.msra.mxu0 %v9896_v24 }
 0x589   :  { %7404 = vmatpush2.bf16.msra.mxu1 %v9899_v37  ;;  %7449 = vmatmul.mubr.bf16.vlgmr.msra.gmra.mxu0 %v10506_v15  ;;  %v9914_v15 = vld [vmem:[#allocation14 + $0x3a0] ss:$24 sps:$4 sm:$0xff]  }
 0x58a   :  { %7459 = vmatprep.subr.bf16.mxu1 %v9904_v53 }
 0x58c   :  { %7406 = vmatmul.mubr.bf16.vlgmr.msra.gmra.mxu1 %v10518_v50 }
 0x58d   :  { %7460 = vmatpush1.bf16.msra.mxu1 %v9902_v57  ;;  %7491 = vmatprep.mubr.bf16.mxu1 %v10516_v48  ;;  %v9920_v48 = vld [vmem:[#allocation14 + $0x340] ss:$24 sps:$4 sm:$0xff]  }
 0x58e   :  { %7461 = vmatprep.subr.bf16.mxu1 %v9907_v9 }
 0x591   :  { %7462 = vmatpush1.bf16.msra.mxu1 %v9905_v38 }
 0x592   :  { %7463 = vmatprep.subr.bf16.mxu1 %v9910_v46 }
 0x595   :  { %7464 = vmatpush1.bf16.msra.mxu1 %v9908_v33 }
 0x596   :  { %7465 = vmatprep.subr.bf16.mxu1 %v9913_v59 }
 0x599   :  { %7466 = vmatpush1.bf16.msra.mxu1 %v9911_v60 }
 0x59a   :  { %7467 = vmatprep.subr.bf16.mxu1 %v9916_v61 }
 0x59d   :  { %7468 = vmatpush1.bf16.msra.mxu1 %v9914_v15 }
 0x59e   :  { %7469 = vmatprep.subr.bf16.mxu1 %v9919_v41  ;;  %v6273_v41 = vrot.slane %v6252_v21, %v3288_v2 }
 0x5a1   :  { %7470 = vmatpush1.bf16.msra.mxu1 %v9917_v63  ;;  %v6277_v63 = vrot.slane %v6252_v21, %v3292_v3 }
 0x5a2   :  { %7471 = vmatprep.subr.bf16.mxu1 %v9922_v42 }
 0x5a5   :  { %7472 = vmatpush1.bf16.msra.mxu1 %v9920_v48 }
 0x5a6   :  { %7473 = vmatprep.subr.bf16.mxu1 %v9925_v27 }
 0x5a9   :  { %7474 = vmatpush1.bf16.msra.mxu1 %v9923_v0 }
 0x5aa   :  { %7475 = vmatprep.subr.bf16.mxu1 %v9928_v1 }
 0x5ad   :  { %7476 = vmatpush2.bf16.msra.mxu1 %v9926_v6 }
 0x5ae   :  { %7477 = vmatprep.subr.bf16.mxu1 %v9931_v12 }
 0x5b1   :  { %7478 = vmatpush2.bf16.msra.mxu1 %v9929_v4 }
 0x5b2   :  { %7479 = vmatprep.subr.bf16.mxu1 %v9934_v7 }
 0x5b5   :  { %7480 = vmatpush2.bf16.msra.mxu1 %v9932_v10 }
 0x5b6   :  { %7481 = vmatprep.subr.bf16.mxu1 %v9937_v54 }
 0x5b9   :  { %7482 = vmatpush2.bf16.msra.mxu1 %v9935_v11 }
 0x5ba   :  { %7483 = vmatprep.subr.bf16.mxu1 %v9940_v13 }
 0x5bd   :  { %7484 = vmatpush2.bf16.msra.mxu1 %v9938_v14 }
 0x5be   :  { %7485 = vmatprep.subr.bf16.mxu1 %v9943_v16 }
 0x5c1   :  { %7486 = vmatpush2.bf16.msra.mxu1 %v9941_v31 }
 0x5c2   :  { %7487 = vmatprep.subr.bf16.mxu1 %v9946_v18 }
 0x5c5   :  { %7488 = vmatpush2.bf16.msra.mxu1 %v9944_v19 }
 0x5c6   :  { %7489 = vmatprep.subr.bf16.mxu1 %v9949_v20 }
 0x5c9   :  { %7490 = vmatpush2.bf16.msra.mxu1 %v9947_v44  ;;  %v7278_v56 = vpop.f32.mrf.mxu0 }
 0x5ca   :  { %v7279_v26 = vadd.f32 %v7278_v56, %v6257_v8 }
 0x5cb   :  { %v7280_v47 = vpop.f32.mrf.mxu0 }
 0x5cc   :  { %7492 = vmatmul.mubr.bf16.vlgmr.msra.gmra.mxu1 %v10518_v50  ;;  %v7281_v43 = vadd.f32 %v7280_v47, %v6261_v25 }
 0x5cd   :  { %v7282_v36 = vpop.f32.mrf.mxu0 }
 0x5ce   :  { %v7283_v34 = vadd.f32 %v7282_v36, %v6257_v8 }
 0x5cf   :  { %v7284_v28 = vpop.f32.mrf.mxu0 }
 0x5d0   :  { %v7285_v39 = vadd.f32 %v7284_v28, %v6261_v25 }
 0x609   :  { %v7364_v52 = vpop.f32.mrf.mxu0 }
 0x60a   :  { %v7365_v24 = vadd.f32 %v7364_v52, %v6265_v49 }
 0x60b   :  { %v7366_v29 = vpop.f32.mrf.mxu0 }
 0x60c   :  { %v7321_v55 = vpop.f32.mrf.mxu1  ;;  %v7367_v37 = vadd.f32 %v7366_v29, %v6269_v51 }
 0x60d   :  { %v7322_v5 = vadd.f32 %v7321_v55, %v7279_v26  ;;  %v7368_v23 = vpop.f32.mrf.mxu0 }
 0x60e   :  { %v7323_v32 = vpop.f32.mrf.mxu1  ;;  %v7369_v38 = vadd.f32 %v7368_v23, %v6265_v49 }
 0x60f   :  { %7502 = vst [vmem:[#allocation16] sm:$0xff] %v7322_v5  ;;  %v7324_v50 = vadd.f32 %v7323_v32, %v7281_v43  ;;  %v7370_v57 = vpop.f32.mrf.mxu0 }
 0x610   :  { %v7325_v35 = vpop.f32.mrf.mxu1  ;;  %v7371_v59 = vadd.f32 %v7370_v57, %v6269_v51 }
 0x611   :  { %7503 = vst [vmem:[#allocation16 + $0x8] sm:$0xff] %v7324_v50  ;;  %v7326_v17 = vadd.f32 %v7325_v35, %v7283_v34 }
 0x612   :  { %v7327_v40 = vpop.f32.mrf.mxu1 }
 0x613   :  { %7508 = vst [vmem:[#allocation16 + $0x30] sm:$0xff] %v7326_v17  ;;  %v7328_v45 = vadd.f32 %v7327_v40, %v7285_v39 }
 0x615   :  { %7509 = vst [vmem:[#allocation16 + $0x38] sm:$0xff] %v7328_v45 }
 0x649   :  { %v7450_v58 = vpop.f32.mrf.mxu0 }
 0x64a   :  { %v7451_v48 = vadd.f32 %v7450_v58, %v6273_v41 }
 0x64b   :  { %v7452_v62 = vpop.f32.mrf.mxu0 }
 0x64c   :  { %v7407_v30 = vpop.f32.mrf.mxu1  ;;  %v7453_v0 = vadd.f32 %v7452_v62, %v6277_v63 }
 0x64d   :  { %v7408_v53 = vadd.f32 %v7407_v30, %v7365_v24  ;;  %v7454_v42 = vpop.f32.mrf.mxu0 }
 0x64e   :  { %v7409_v9 = vpop.f32.mrf.mxu1  ;;  %v7455_v4 = vadd.f32 %v7454_v42, %v6273_v41 }
 0x64f   :  { %7504 = vst [vmem:[#allocation16 + $0x10] sm:$0xff] %v7408_v53  ;;  %v7410_v46 = vadd.f32 %v7409_v9, %v7367_v37  ;;  %v7456_v6 = vpop.f32.mrf.mxu0 }
 0x650   :  { %v7411_v33 = vpop.f32.mrf.mxu1  ;;  %v7457_v54 = vadd.f32 %v7456_v6, %v6277_v63 }
 0x651   :  { %7505 = vst [vmem:[#allocation16 + $0x18] sm:$0xff] %v7410_v46  ;;  %v7412_v60 = vadd.f32 %v7411_v33, %v7369_v38 }
 0x652   :  { %v7413_v61 = vpop.f32.mrf.mxu1 }
 0x653   :  { %7510 = vst [vmem:[#allocation16 + $0x40] sm:$0xff] %v7412_v60  ;;  %v7414_v15 = vadd.f32 %v7413_v61, %v7371_v59 }
 0x655   :  { %7511 = vst [vmem:[#allocation16 + $0x48] sm:$0xff] %v7414_v15 }
 0x68c   :  { %v7493_v27 = vpop.f32.mrf.mxu1 }
 0x68d   :  { %v7494_v1 = vadd.f32 %v7493_v27, %v7451_v48 }
 0x68e   :  { %v7495_v12 = vpop.f32.mrf.mxu1 }
 0x68f   :  { %7506 = vst [vmem:[#allocation16 + $0x20] sm:$0xff] %v7494_v1  ;;  %v7496_v7 = vadd.f32 %v7495_v12, %v7453_v0 }
 0x690   :  { %v7497_v10 = vpop.f32.mrf.mxu1 }
 0x691   :  { %7507 = vst [vmem:[#allocation16 + $0x28] sm:$0xff] %v7496_v7  ;;  %v7498_v11 = vadd.f32 %v7497_v10, %v7455_v4 }
 0x692   :  { %v7499_v2 = vpop.f32.mrf.mxu1 }
 0x693   :  { %7512 = vst [vmem:[#allocation16 + $0x50] sm:$0xff] %v7498_v11  ;;  %v7500_v22 = vadd.f32 %v7499_v2, %v7457_v54 }
 0x695   :  { %7513 = vst [vmem:[#allocation16 + $0x58] sm:$0xff] %v7500_v22 }
 0x696   :  { %10177 = shalt.err (!%p10174_p2)
}
 0x697   :  { %7525 = dma.vmem_to_hbm [thread:$0]  %s7520_s14, 1536, %s10556_s11, [#allocation4], %s10199_s20, %s10199_s20, %s10200_s21  }
 0x698   :  { %10196 = dma.done.wait [#allocation4], 1536  }
 0x699   :  { %10197 = vsyncadd [#allocation4], 4294965760 }
 0x69a   :  { %7529 = vsyncpa [#allocation3], 1 }
 0x69b   :  { %7530 = vsyncpa [#allocation6], 1 }
 0x69c   :  { %7531 = vsyncpa [#allocation9], 1 }
 0x69d   :  { %7532 = vsyncpa [#allocation12], 1 }
 0x69e   :  { %7533 = vsyncpa [#allocation15], 1 }
 0x69f   :  { %7534 = vsyncpa [#allocation4], 1 }

</bundles_post_ra>
